<compile_context>
chip_gen: v7x
topology: tpu7x:2x2x1
jax: 0.10.0
libtpu: 0.0.40
codegen_flags: <defaults>
</compile_context>

<pallas_src>
import functools

import jax
import jax.numpy as jnp
from jax.experimental import pallas as pl
from jax.experimental.pallas import tpu as pltpu

D_IN = 40
D_MODEL = 80
D_FF = 256
N_HEADS = 2
HEAD_DIM = D_MODEL // N_HEADS       # 40
N_LAYERS = 2
N_SPKS = 5
LN_EPS = 1e-5
NEG_INF = -1e30
LANE = 128                          # lane-dense output width (sliced to N_SPKS outside)
QKV_HEAD_STRIDE = 128               # per-head [Q|K|V|pad] group, 128-lane aligned
assert 3 * HEAD_DIM <= QKV_HEAD_STRIDE


def _layernorm(x, gamma, beta):
    mu = jnp.mean(x, axis=-1, keepdims=True)
    xc = x - mu
    var = jnp.mean(xc * xc, axis=-1, keepdims=True)
    inv = jax.lax.rsqrt(var + LN_EPS)
    return xc * inv * gamma + beta


def classifier_kernel(*refs, has_bias):
    if has_bias:
        (x_ref, bias_ref, pool_ref, w0_ref, b0_ref, wqkv_ref, bqkv_ref,
         wo_ref, bo_ref, ln1g_ref, ln1b_ref, w1_ref, b1_ref, w2_ref, b2_ref,
         ln2g_ref, ln2b_ref, wp_ref, bp_ref, out_ref) = refs
        bias = bias_ref[...]
    else:
        (x_ref, pool_ref, w0_ref, b0_ref, wqkv_ref, bqkv_ref,
         wo_ref, bo_ref, ln1g_ref, ln1b_ref, w1_ref, b1_ref, w2_ref, b2_ref,
         ln2g_ref, ln2b_ref, wp_ref, bp_ref, out_ref) = refs
        bias = None

    # prenet: (rows, 40) @ (40, 80) — bf16 operands, f32 accumulation
    h = jnp.dot(x_ref[...].astype(jnp.bfloat16), w0_ref[...],
                preferred_element_type=jnp.float32) + b0_ref[...]          # (rows, D) f32

    for l in range(N_LAYERS):
        # ---- multi-head self-attention (post-norm encoder layer) ----
        # fused per-head [Q|K|V|pad] projection: (rows, 80) @ (80, 256)
        qkv = jnp.dot(h.astype(jnp.bfloat16), wqkv_ref[l],
                      preferred_element_type=jnp.float32) + bqkv_ref[l]    # (rows, 256) f32
        attn = bo_ref[l]                                                    # (1, D)
        for hd in range(N_HEADS):
            base = hd * QKV_HEAD_STRIDE                    # head group is tile-aligned
            q = qkv[:, base:base + HEAD_DIM]               # 1/sqrt(hd) folded into Wq/bq
            k = qkv[:, base + HEAD_DIM:base + 2 * HEAD_DIM]
            v = qkv[:, base + 2 * HEAD_DIM:base + 3 * HEAD_DIM]
            # q @ k.T without an explicit transpose (bf16 MXU, f32 acc)
            s = jax.lax.dot_general(q.astype(jnp.bfloat16), k.astype(jnp.bfloat16),
                                    (((1,), (1,)), ((), ())),
                                    preferred_element_type=jnp.float32)
            if bias is not None:
                s = s + bias
            s = s - jnp.max(s, axis=-1, keepdims=True)
            e = jnp.exp(s)
            p = e * pl.reciprocal(jnp.sum(e, axis=-1, keepdims=True), approx=True)
            ctx = jnp.dot(p.astype(jnp.bfloat16), v.astype(jnp.bfloat16),
                          preferred_element_type=jnp.float32)              # (rows, HD)
            # per-head output projection (no concat -> no relayout copy)
            attn = attn + jnp.dot(ctx.astype(jnp.bfloat16), wo_ref[l, hd],
                                  preferred_element_type=jnp.float32)
        h = _layernorm(h + attn, ln1g_ref[l], ln1b_ref[l])

        # ---- feed-forward ----
        ff = jnp.dot(h.astype(jnp.bfloat16), w1_ref[l],
                     preferred_element_type=jnp.float32) + b1_ref[l]
        ff = jnp.maximum(ff, 0.0)
        ff = jnp.dot(ff.astype(jnp.bfloat16), w2_ref[l],
                     preferred_element_type=jnp.float32) + b2_ref[l]
        h = _layernorm(h + ff, ln2g_ref[l], ln2b_ref[l])

    # ---- per-sequence mean pool (as a matmul) + lane-padded prediction head ----
    # (tiny matmuls: kept in f32 for accuracy)
    stats = jnp.dot(pool_ref[...], h, preferred_element_type=jnp.float32)  # (b_tile, D)
    out_ref[0] = jnp.dot(stats, wp_ref[...],
                         preferred_element_type=jnp.float32) + bp_ref[...]  # (b_tile, 128)


def _multi_tensorcore():
    """True on chips with >1 TensorCore (v4/v5p megacore, v7x)."""
    try:
        kind = jax.devices()[0].device_kind.lower()
    except Exception:
        return False
    return any(t in kind for t in ("v4", "v5p", "v7"))


def _choose_b_tile(B, L_pad):
    """How many sequences to fold into one grid step (~128 rows per block)."""
    bt = max(1, min(B, 128 // max(L_pad, 1)))
    # split a small batch into 2 grid steps only when a 2nd TensorCore can take it
    if _multi_tensorcore() and bt >= B and B > 1 and (-(-B // 2)) * L_pad >= 64:
        bt = -(-B // 2)
    return max(1, bt)


def _param_bytes(packed):
    return sum(int(p.size) * jnp.dtype(p.dtype).itemsize for p in packed)


def _vmem_estimate(rows, b_tile, need_bias, packed):
    acts = rows * (N_HEADS * QKV_HEAD_STRIDE + D_FF + 4 * D_MODEL) * 4
    acts += 3 * rows * rows * 4                      # s / e / p live simultaneously
    io = 2 * (rows * D_IN * 4 + b_tile * rows * 4 + b_tile * LANE * 4)
    if need_bias:
        io += 2 * rows * rows * 4
    return acts + io + 2 * _param_bytes(packed)


def _cost_estimate(n_blocks, rows, b_tile, need_bias, packed):
    fl = 2 * rows * D_IN * D_MODEL
    for _ in range(N_LAYERS):
        fl += 2 * rows * D_MODEL * (N_HEADS * QKV_HEAD_STRIDE)     # fused QKV
        fl += N_HEADS * (2 * 2 * rows * rows * HEAD_DIM)           # QK^T + PV
        fl += N_HEADS * 2 * rows * HEAD_DIM * D_MODEL              # per-head Wo
        fl += 2 * 2 * rows * D_MODEL * D_FF                        # FF1 + FF2
    fl += 2 * b_tile * rows * D_MODEL + 2 * b_tile * D_MODEL * LANE
    trans = N_LAYERS * N_HEADS * rows * rows + 4 * N_LAYERS * rows  # exp + rsqrt-ish
    by = rows * D_IN * 4 + b_tile * rows * 4 + b_tile * LANE * 4
    if need_bias:
        by += rows * rows * 4
    return pl.CostEstimate(flops=int(n_blocks * fl),
                           transcendentals=int(n_blocks * trans),
                           bytes_accessed=int(n_blocks * by + _param_bytes(packed)))


def classifier_forward(mels, packed_params, *, b_tile=None):
    B, L, d_in = mels.shape
    assert d_in == D_IN

    # Pad each sequence's length to a sublane multiple (instead of inflating b_tile);
    # padded rows are masked out of attention and excluded from the pooling matrix.
    L_pad = -(-L // 8) * 8
    if L_pad != L:
        mels = jnp.pad(mels, ((0, 0), (0, L_pad - L), (0, 0)))

    if b_tile is None:
        b_tile = _choose_b_tile(B, L_pad)
    b_tile = max(1, int(b_tile))

    n_blocks = pl.cdiv(B, b_tile)
    b_pad = n_blocks * b_tile
    if b_pad != B:
        mels = jnp.pad(mels, ((0, b_pad - B), (0, 0), (0, 0)))

    rows = b_tile * L_pad
    x2d = mels.reshape(b_pad * L_pad, D_IN)   # flatten batch*length onto sublanes

    # Precomputed constants (VMEM-resident across grid steps):
    seq_id = jnp.repeat(jnp.arange(b_tile, dtype=jnp.int32), L_pad)        # (rows,)
    pos = jnp.arange(rows, dtype=jnp.int32) % L_pad
    valid = pos < L
    # per-sequence mean-pool matrix over the real length only
    pool = ((jnp.arange(b_tile, dtype=jnp.int32)[:, None] == seq_id[None, :])
            & valid[None, :]).astype(jnp.float32) / L                      # (b_tile, rows)

    need_bias = (b_tile > 1) or (L_pad != L)   # all-zero bias is skipped entirely

    inputs = [x2d]
    in_specs = [pl.BlockSpec((rows, D_IN), lambda b: (b, 0))]

    def full_spec(arr):
        n = arr.ndim
        return pl.BlockSpec(arr.shape, lambda b, _n=n: (0,) * _n)

    if need_bias:
        same = seq_id[:, None] == seq_id[None, :]
        # keep the diagonal unmasked so padded rows never produce an all-masked softmax row
        allowed = (same & valid[:, None] & valid[None, :]) | jnp.eye(rows, dtype=bool)
        attn_bias = jnp.where(allowed, 0.0, NEG_INF).astype(jnp.float32)   # (rows, rows)
        inputs.append(attn_bias)
        in_specs.append(full_spec(attn_bias))

    inputs.append(pool)
    in_specs.append(full_spec(pool))
    inputs.extend(packed_params)
    in_specs.extend(full_spec(p) for p in packed_params)

    compiler_kwargs = dict(dimension_semantics=("parallel",))
    vmem_est = _vmem_estimate(rows, b_tile, need_bias, packed_params)
    if vmem_est > 24 * 2**20:
        # TODO(synk): for very long sequences (rows^2 buffers approaching v7x's 64 MiB
        # physical VMEM) the attention should be tiled flash-style over the KV axis.
        compiler_kwargs["vmem_limit_bytes"] = int(min(vmem_est + (8 << 20), 96 << 20))

    out = pl.pallas_call(
        functools.partial(classifier_kernel, has_bias=need_bias),
        out_shape=jax.ShapeDtypeStruct((n_blocks, b_tile, LANE), jnp.float32),
        grid=(n_blocks,),
        in_specs=in_specs,
        out_specs=pl.BlockSpec((1, b_tile, LANE), lambda b: (b, 0, 0)),
        compiler_params=pltpu.CompilerParams(**compiler_kwargs),
        cost_estimate=_cost_estimate(n_blocks, rows, b_tile, need_bias, packed_params),
    )(*inputs)
    return out.reshape(b_pad, LANE)[:B, :N_SPKS]


def init_params(key):
    """PyTorch-layout parameters (used by the pure-JAX reference)."""
    ks = jax.random.split(key, 32)
    i = iter(range(32))

    def w(shape, k):
        fan_in = shape[-2] if len(shape) >= 2 else shape[-1]
        bound = 1.0 / (fan_in ** 0.5)
        return jax.random.uniform(k, shape, jnp.float32, -bound, bound)

    w0 = w((D_IN, D_MODEL), ks[next(i)]);            b0 = w((1, D_MODEL), ks[next(i)])
    wq = w((N_LAYERS, N_HEADS, D_MODEL, HEAD_DIM), ks[next(i)])
    bq = w((N_LAYERS, N_HEADS, 1, HEAD_DIM), ks[next(i)])
    wk = w((N_LAYERS, N_HEADS, D_MODEL, HEAD_DIM), ks[next(i)])
    bk = w((N_LAYERS, N_HEADS, 1, HEAD_DIM), ks[next(i)])
    wv = w((N_LAYERS, N_HEADS, D_MODEL, HEAD_DIM), ks[next(i)])
    bv = w((N_LAYERS, N_HEADS, 1, HEAD_DIM), ks[next(i)])
    wo = w((N_LAYERS, N_HEADS, HEAD_DIM, D_MODEL), ks[next(i)])
    bo = w((N_LAYERS, 1, D_MODEL), ks[next(i)])
    ln1g = jnp.ones((N_LAYERS, 1, D_MODEL), jnp.float32)
    ln1b = jnp.zeros((N_LAYERS, 1, D_MODEL), jnp.float32)
    w1 = w((N_LAYERS, D_MODEL, D_FF), ks[next(i)]);  b1 = w((N_LAYERS, 1, D_FF), ks[next(i)])
    w2 = w((N_LAYERS, D_FF, D_MODEL), ks[next(i)]);  b2 = w((N_LAYERS, 1, D_MODEL), ks[next(i)])
    ln2g = jnp.ones((N_LAYERS, 1, D_MODEL), jnp.float32)
    ln2b = jnp.zeros((N_LAYERS, 1, D_MODEL), jnp.float32)
    wp = w((D_MODEL, N_SPKS), ks[next(i)]);          bp = w((1, N_SPKS), ks[next(i)])

    return (w0, b0, wq, bq, wk, bk, wv, bv, wo, bo, ln1g, ln1b,
            w1, b1, w2, b2, ln2g, ln2b, wp, bp)


def pack_params(params):
    """One-time transform: 128-lane-aligned fused per-head [Q|K|V] blocks with the
    attention scale folded into Wq/bq, bf16 weights for every rows-scaled matmul,
    and a lane-padded (80, 128) prediction head."""
    (w0, b0, wq, bq, wk, bk, wv, bv, wo, bo, ln1g, ln1b,
     w1, b1, w2, b2, ln2g, ln2b, wp, bp) = params
    scale = 1.0 / (HEAD_DIM ** 0.5)

    wqkv = jnp.zeros((N_LAYERS, D_MODEL, N_HEADS * QKV_HEAD_STRIDE), jnp.float32)
    bqkv = jnp.zeros((N_LAYERS, 1, N_HEADS * QKV_HEAD_STRIDE), jnp.float32)
    for hd in range(N_HEADS):
        base = hd * QKV_HEAD_STRIDE
        wqkv = wqkv.at[:, :, base:base + HEAD_DIM].set(wq[:, hd] * scale)
        wqkv = wqkv.at[:, :, base + HEAD_DIM:base + 2 * HEAD_DIM].set(wk[:, hd])
        wqkv = wqkv.at[:, :, base + 2 * HEAD_DIM:base + 3 * HEAD_DIM].set(wv[:, hd])
        bqkv = bqkv.at[:, :, base:base + HEAD_DIM].set(bq[:, hd] * scale)
        bqkv = bqkv.at[:, :, base + HEAD_DIM:base + 2 * HEAD_DIM].set(bk[:, hd])
        bqkv = bqkv.at[:, :, base + 2 * HEAD_DIM:base + 3 * HEAD_DIM].set(bv[:, hd])

    wp_pad = jnp.zeros((D_MODEL, LANE), jnp.float32).at[:, :N_SPKS].set(wp)
    bp_pad = jnp.zeros((1, LANE), jnp.float32).at[:, :N_SPKS].set(bp)

    bf = lambda a: a.astype(jnp.bfloat16)
    return (bf(w0), b0, bf(wqkv), bqkv, bf(wo), bo, ln1g, ln1b,
            bf(w1), b1, bf(w2), b2, ln2g, ln2b, wp_pad, bp_pad)


def classifier_reference(mels, params):
    """Pure-JAX f32 reference (same math as the PyTorch module in eval mode)."""
    (w0, b0, wq, bq, wk, bk, wv, bv, wo, bo, ln1g, ln1b,
     w1, b1, w2, b2, ln2g, ln2b, wp, bp) = params
    h = mels @ w0 + b0  # (B, L, D)
    scale = 1.0 / (HEAD_DIM ** 0.5)
    for l in range(N_LAYERS):
        ao = bo[l]
        for hd in range(N_HEADS):
            q = h @ wq[l, hd] + bq[l, hd]
            k = h @ wk[l, hd] + bk[l, hd]
            v = h @ wv[l, hd] + bv[l, hd]
            s = jnp.einsum("bqd,bkd->bqk", q * scale, k)
            p = jax.nn.softmax(s, axis=-1)
            o = jnp.einsum("bqk,bkd->bqd", p, v)
            ao = ao + o @ wo[l, hd]
        h = _layernorm(h + ao, ln1g[l], ln1b[l])
        ff = jnp.maximum(h @ w1[l] + b1[l], 0.0) @ w2[l] + b2[l]
        h = _layernorm(h + ff, ln2g[l], ln2b[l])
    stats = jnp.mean(h, axis=1)
    return stats @ wp + bp


if __name__ == "__main__":
    key = jax.random.PRNGKey(0)
    k_param, k_x, k_x2 = jax.random.split(key, 3)

    B, L = 10, 8
    mels = jax.random.normal(k_x, (B, L, D_IN), jnp.float32)
    params = init_params(k_param)
    packed = pack_params(params)

    # default tiling
    out = jax.block_until_ready(jax.jit(classifier_forward)(mels, packed))
    # multi-step grid + padded-batch path (grid=3, pad 10 -> 12)
    out_small = jax.block_until_ready(
        jax.jit(functools.partial(classifier_forward, b_tile=4))(mels, packed))
    # single-sequence blocks: bias-free attention path
    out_single = jax.block_until_ready(
        jax.jit(functools.partial(classifier_forward, b_tile=1))(mels, packed))

    ref = classifier_reference(mels, params)
    assert out.shape == (B, N_SPKS)
    assert jnp.all(jnp.isfinite(out))
    # bf16 matmul operands + EUP approximate reciprocal -> inference-grade tolerance
    assert jnp.allclose(out, ref, rtol=2e-2, atol=2e-2), (out, ref)
    assert jnp.allclose(out_small, ref, rtol=2e-2, atol=2e-2), (out_small, ref)
    assert jnp.allclose(out_single, ref, rtol=2e-2, atol=2e-2), (out_single, ref)
    assert jnp.allclose(out, out_small, rtol=1e-3, atol=1e-3)
    assert jnp.allclose(out, out_single, rtol=1e-3, atol=1e-3)

    # ragged-length path: L=6 padded to 8, padded rows masked from attention & pool
    B2, L2 = 3, 6
    mels2 = jax.random.normal(k_x2, (B2, L2, D_IN), jnp.float32)
    out2 = jax.block_until_ready(jax.jit(classifier_forward)(mels2, packed))
    ref2 = classifier_reference(mels2, params)
    assert jnp.allclose(out2, ref2, rtol=2e-2, atol=2e-2), (out2, ref2)

    print("KERNEL_OK")
</pallas_src>

<mosaic_0001>
module attributes {stable_mosaic.version = 11 : i64} {
  func.func @classifier_kernel(%arg0: i32, %arg1: memref<80x40xf32, #tpu.memory_space<vmem>>, %arg2: memref<80x80xf32, #tpu.memory_space<vmem>>, %arg3: memref<10x80xf32, #tpu.memory_space<vmem>>, %arg4: memref<40x80xbf16, #tpu.memory_space<vmem>>, %arg5: memref<1x80xf32, #tpu.memory_space<vmem>>, %arg6: memref<2x80x256xbf16, #tpu.memory_space<vmem>>, %arg7: memref<2x1x256xf32, #tpu.memory_space<vmem>>, %arg8: memref<2x2x40x80xbf16, #tpu.memory_space<vmem>>, %arg9: memref<2x1x80xf32, #tpu.memory_space<vmem>>, %arg10: memref<2x1x80xf32, #tpu.memory_space<vmem>>, %arg11: memref<2x1x80xf32, #tpu.memory_space<vmem>>, %arg12: memref<2x80x256xbf16, #tpu.memory_space<vmem>>, %arg13: memref<2x1x256xf32, #tpu.memory_space<vmem>>, %arg14: memref<2x256x80xbf16, #tpu.memory_space<vmem>>, %arg15: memref<2x1x80xf32, #tpu.memory_space<vmem>>, %arg16: memref<2x1x80xf32, #tpu.memory_space<vmem>>, %arg17: memref<2x1x80xf32, #tpu.memory_space<vmem>>, %arg18: memref<80x128xf32, #tpu.memory_space<vmem>>, %arg19: memref<1x128xf32, #tpu.memory_space<vmem>>, %arg20: memref<1x10x128xf32, #tpu.memory_space<vmem>>) attributes {dimension_semantics = [#tpu.dimension_semantics<parallel>], iteration_bounds = array<i64: 1>, scalar_prefetch = 0 : i64, scratch_operands = 0 : i64, tpu.core_type = #tpu.core_type<tc>, window_params = [{transform_indices = @transform_0, window_bounds = array<i64: 80, 40>}, {pipeline_mode = #tpu.pipeline_mode<synchronous>, transform_indices = @transform_1, window_bounds = array<i64: 80, 80>}, {pipeline_mode = #tpu.pipeline_mode<synchronous>, transform_indices = @transform_2, window_bounds = array<i64: 10, 80>}, {pipeline_mode = #tpu.pipeline_mode<synchronous>, transform_indices = @transform_3, window_bounds = array<i64: 40, 80>}, {pipeline_mode = #tpu.pipeline_mode<synchronous>, transform_indices = @transform_4, window_bounds = array<i64: 1, 80>}, {pipeline_mode = #tpu.pipeline_mode<synchronous>, transform_indices = @transform_5, window_bounds = array<i64: 2, 80, 256>}, {pipeline_mode = #tpu.pipeline_mode<synchronous>, transform_indices = @transform_6, window_bounds = array<i64: 2, 1, 256>}, {pipeline_mode = #tpu.pipeline_mode<synchronous>, transform_indices = @transform_7, window_bounds = array<i64: 2, 2, 40, 80>}, {pipeline_mode = #tpu.pipeline_mode<synchronous>, transform_indices = @transform_8, window_bounds = array<i64: 2, 1, 80>}, {pipeline_mode = #tpu.pipeline_mode<synchronous>, transform_indices = @transform_9, window_bounds = array<i64: 2, 1, 80>}, {pipeline_mode = #tpu.pipeline_mode<synchronous>, transform_indices = @transform_10, window_bounds = array<i64: 2, 1, 80>}, {pipeline_mode = #tpu.pipeline_mode<synchronous>, transform_indices = @transform_11, window_bounds = array<i64: 2, 80, 256>}, {pipeline_mode = #tpu.pipeline_mode<synchronous>, transform_indices = @transform_12, window_bounds = array<i64: 2, 1, 256>}, {pipeline_mode = #tpu.pipeline_mode<synchronous>, transform_indices = @transform_13, window_bounds = array<i64: 2, 256, 80>}, {pipeline_mode = #tpu.pipeline_mode<synchronous>, transform_indices = @transform_14, window_bounds = array<i64: 2, 1, 80>}, {pipeline_mode = #tpu.pipeline_mode<synchronous>, transform_indices = @transform_15, window_bounds = array<i64: 2, 1, 80>}, {pipeline_mode = #tpu.pipeline_mode<synchronous>, transform_indices = @transform_16, window_bounds = array<i64: 2, 1, 80>}, {pipeline_mode = #tpu.pipeline_mode<synchronous>, transform_indices = @transform_17, window_bounds = array<i64: 80, 128>}, {pipeline_mode = #tpu.pipeline_mode<synchronous>, transform_indices = @transform_18, window_bounds = array<i64: 1, 128>}, {transform_indices = @transform_19, window_bounds = array<i64: 1, 10, 128>}]} {
    %c0 = arith.constant 0 : index
    %c0_0 = arith.constant 0 : index
    %0 = vector.load %arg2[%c0, %c0_0] : memref<80x80xf32, #tpu.memory_space<vmem>>, vector<80x80xf32>
    %c0_1 = arith.constant 0 : index
    %c0_2 = arith.constant 0 : index
    %1 = vector.load %arg1[%c0_1, %c0_2] : memref<80x40xf32, #tpu.memory_space<vmem>>, vector<80x40xf32>
    %2 = arith.truncf %1 : vector<80x40xf32> to vector<80x40xbf16>
    %c0_3 = arith.constant 0 : index
    %c0_4 = arith.constant 0 : index
    %3 = vector.load %arg4[%c0_3, %c0_4] : memref<40x80xbf16, #tpu.memory_space<vmem>>, vector<40x80xbf16>
    %cst = arith.constant dense<0.000000e+00> : vector<80x80xf32>
    %4 = tpu.matmul %2, %3, %cst {dimension_numbers = #tpu.dot_dimension_numbers<[1], [0], [0], [1], [0, 0, 1, 1], [], []>} : vector<80x40xbf16>, vector<40x80xbf16>, vector<80x80xf32> -> vector<80x80xf32>
    %c0_5 = arith.constant 0 : index
    %c0_6 = arith.constant 0 : index
    %5 = vector.load %arg5[%c0_5, %c0_6] : memref<1x80xf32, #tpu.memory_space<vmem>>, vector<1x80xf32>
    %6 = vector.broadcast %5 : vector<1x80xf32> to vector<80x80xf32>
    %7 = arith.addf %4, %6 : vector<80x80xf32>
    %8 = arith.truncf %7 : vector<80x80xf32> to vector<80x80xbf16>
    %c0_7 = arith.constant 0 : index
    %c0_8 = arith.constant 0 : index
    %c0_9 = arith.constant 0 : index
    %9 = vector.load %arg6[%c0_7, %c0_8, %c0_9] : memref<2x80x256xbf16, #tpu.memory_space<vmem>>, vector<1x80x256xbf16>
    %10 = vector.shape_cast %9 : vector<1x80x256xbf16> to vector<80x256xbf16>
    %cst_10 = arith.constant dense<0.000000e+00> : vector<80x256xf32>
    %11 = tpu.matmul %8, %10, %cst_10 {dimension_numbers = #tpu.dot_dimension_numbers<[1], [0], [0], [1], [0, 0, 1, 1], [], []>} : vector<80x80xbf16>, vector<80x256xbf16>, vector<80x256xf32> -> vector<80x256xf32>
    %c0_11 = arith.constant 0 : index
    %c0_12 = arith.constant 0 : index
    %c0_13 = arith.constant 0 : index
    %12 = vector.load %arg7[%c0_11, %c0_12, %c0_13] : memref<2x1x256xf32, #tpu.memory_space<vmem>>, vector<1x1x256xf32>
    %13 = vector.shape_cast %12 : vector<1x1x256xf32> to vector<1x256xf32>
    %14 = vector.broadcast %13 : vector<1x256xf32> to vector<80x256xf32>
    %15 = arith.addf %11, %14 : vector<80x256xf32>
    %c0_14 = arith.constant 0 : index
    %c0_15 = arith.constant 0 : index
    %c0_16 = arith.constant 0 : index
    %16 = vector.load %arg9[%c0_14, %c0_15, %c0_16] : memref<2x1x80xf32, #tpu.memory_space<vmem>>, vector<1x1x80xf32>
    %17 = vector.shape_cast %16 : vector<1x1x80xf32> to vector<1x80xf32>
    %18 = vector.extract_strided_slice %15 {offsets = [0, 0], sizes = [80, 40], strides = [1, 1]} : vector<80x256xf32> to vector<80x40xf32>
    %19 = vector.extract_strided_slice %15 {offsets = [0, 40], sizes = [80, 40], strides = [1, 1]} : vector<80x256xf32> to vector<80x40xf32>
    %20 = vector.extract_strided_slice %15 {offsets = [0, 80], sizes = [80, 40], strides = [1, 1]} : vector<80x256xf32> to vector<80x40xf32>
    %21 = arith.truncf %18 : vector<80x40xf32> to vector<80x40xbf16>
    %22 = arith.truncf %19 : vector<80x40xf32> to vector<80x40xbf16>
    %cst_17 = arith.constant dense<0.000000e+00> : vector<80x80xf32>
    %23 = tpu.matmul %21, %22, %cst_17 {dimension_numbers = #tpu.dot_dimension_numbers<[1], [1], [0], [0], [0, 0, 1, 0], [], []>} : vector<80x40xbf16>, vector<80x40xbf16>, vector<80x80xf32> -> vector<80x80xf32>
    %24 = arith.addf %23, %0 : vector<80x80xf32>
    %cst_18 = arith.constant dense<0xFF800000> : vector<80xf32>
    %25 = vector.multi_reduction <maximumf>, %24, %cst_18 [1] : vector<80x80xf32> to vector<80xf32>
    %26 = vector.shape_cast %25 : vector<80xf32> to vector<80x1xf32>
    %27 = vector.broadcast %26 : vector<80x1xf32> to vector<80x80xf32>
    %28 = arith.subf %24, %27 : vector<80x80xf32>
    %29 = math.exp %28 : vector<80x80xf32>
    %cst_19 = arith.constant dense<0.000000e+00> : vector<80xf32>
    %30 = vector.multi_reduction <add>, %29, %cst_19 [1] : vector<80x80xf32> to vector<80xf32>
    %31 = vector.shape_cast %30 : vector<80xf32> to vector<80x1xf32>
    %32 = tpu.reciprocal %31 {approx = true} : vector<80x1xf32> -> vector<80x1xf32>
    %33 = vector.broadcast %32 : vector<80x1xf32> to vector<80x80xf32>
    %34 = arith.mulf %29, %33 : vector<80x80xf32>
    %35 = arith.truncf %34 : vector<80x80xf32> to vector<80x80xbf16>
    %36 = arith.truncf %20 : vector<80x40xf32> to vector<80x40xbf16>
    %cst_20 = arith.constant dense<0.000000e+00> : vector<80x40xf32>
    %37 = tpu.matmul %35, %36, %cst_20 {dimension_numbers = #tpu.dot_dimension_numbers<[1], [0], [0], [1], [0, 0, 1, 1], [], []>} : vector<80x80xbf16>, vector<80x40xbf16>, vector<80x40xf32> -> vector<80x40xf32>
    %38 = arith.truncf %37 : vector<80x40xf32> to vector<80x40xbf16>
    %c0_21 = arith.constant 0 : index
    %c0_22 = arith.constant 0 : index
    %c0_23 = arith.constant 0 : index
    %c0_24 = arith.constant 0 : index
    %39 = vector.load %arg8[%c0_21, %c0_22, %c0_23, %c0_24] : memref<2x2x40x80xbf16, #tpu.memory_space<vmem>>, vector<1x1x40x80xbf16>
    %40 = vector.shape_cast %39 : vector<1x1x40x80xbf16> to vector<40x80xbf16>
    %cst_25 = arith.constant dense<0.000000e+00> : vector<80x80xf32>
    %41 = tpu.matmul %38, %40, %cst_25 {dimension_numbers = #tpu.dot_dimension_numbers<[1], [0], [0], [1], [0, 0, 1, 1], [], []>} : vector<80x40xbf16>, vector<40x80xbf16>, vector<80x80xf32> -> vector<80x80xf32>
    %42 = vector.broadcast %17 : vector<1x80xf32> to vector<80x80xf32>
    %43 = arith.addf %42, %41 : vector<80x80xf32>
    %44 = vector.extract_strided_slice %15 {offsets = [0, 128], sizes = [80, 40], strides = [1, 1]} : vector<80x256xf32> to vector<80x40xf32>
    %45 = vector.extract_strided_slice %15 {offsets = [0, 168], sizes = [80, 40], strides = [1, 1]} : vector<80x256xf32> to vector<80x40xf32>
    %46 = vector.extract_strided_slice %15 {offsets = [0, 208], sizes = [80, 40], strides = [1, 1]} : vector<80x256xf32> to vector<80x40xf32>
    %47 = arith.truncf %44 : vector<80x40xf32> to vector<80x40xbf16>
    %48 = arith.truncf %45 : vector<80x40xf32> to vector<80x40xbf16>
    %cst_26 = arith.constant dense<0.000000e+00> : vector<80x80xf32>
    %49 = tpu.matmul %47, %48, %cst_26 {dimension_numbers = #tpu.dot_dimension_numbers<[1], [1], [0], [0], [0, 0, 1, 0], [], []>} : vector<80x40xbf16>, vector<80x40xbf16>, vector<80x80xf32> -> vector<80x80xf32>
    %50 = arith.addf %49, %0 : vector<80x80xf32>
    %cst_27 = arith.constant dense<0xFF800000> : vector<80xf32>
    %51 = vector.multi_reduction <maximumf>, %50, %cst_27 [1] : vector<80x80xf32> to vector<80xf32>
    %52 = vector.shape_cast %51 : vector<80xf32> to vector<80x1xf32>
    %53 = vector.broadcast %52 : vector<80x1xf32> to vector<80x80xf32>
    %54 = arith.subf %50, %53 : vector<80x80xf32>
    %55 = math.exp %54 : vector<80x80xf32>
    %cst_28 = arith.constant dense<0.000000e+00> : vector<80xf32>
    %56 = vector.multi_reduction <add>, %55, %cst_28 [1] : vector<80x80xf32> to vector<80xf32>
    %57 = vector.shape_cast %56 : vector<80xf32> to vector<80x1xf32>
    %58 = tpu.reciprocal %57 {approx = true} : vector<80x1xf32> -> vector<80x1xf32>
    %59 = vector.broadcast %58 : vector<80x1xf32> to vector<80x80xf32>
    %60 = arith.mulf %55, %59 : vector<80x80xf32>
    %61 = arith.truncf %60 : vector<80x80xf32> to vector<80x80xbf16>
    %62 = arith.truncf %46 : vector<80x40xf32> to vector<80x40xbf16>
    %cst_29 = arith.constant dense<0.000000e+00> : vector<80x40xf32>
    %63 = tpu.matmul %61, %62, %cst_29 {dimension_numbers = #tpu.dot_dimension_numbers<[1], [0], [0], [1], [0, 0, 1, 1], [], []>} : vector<80x80xbf16>, vector<80x40xbf16>, vector<80x40xf32> -> vector<80x40xf32>
    %64 = arith.truncf %63 : vector<80x40xf32> to vector<80x40xbf16>
    %c0_30 = arith.constant 0 : index
    %c1 = arith.constant 1 : index
    %c0_31 = arith.constant 0 : index
    %c0_32 = arith.constant 0 : index
    %65 = vector.load %arg8[%c0_30, %c1, %c0_31, %c0_32] : memref<2x2x40x80xbf16, #tpu.memory_space<vmem>>, vector<1x1x40x80xbf16>
    %66 = vector.shape_cast %65 : vector<1x1x40x80xbf16> to vector<40x80xbf16>
    %cst_33 = arith.constant dense<0.000000e+00> : vector<80x80xf32>
    %67 = tpu.matmul %64, %66, %cst_33 {dimension_numbers = #tpu.dot_dimension_numbers<[1], [0], [0], [1], [0, 0, 1, 1], [], []>} : vector<80x40xbf16>, vector<40x80xbf16>, vector<80x80xf32> -> vector<80x80xf32>
    %68 = arith.addf %43, %67 : vector<80x80xf32>
    %69 = arith.addf %7, %68 : vector<80x80xf32>
    %c0_34 = arith.constant 0 : index
    %c0_35 = arith.constant 0 : index
    %c0_36 = arith.constant 0 : index
    %70 = vector.load %arg10[%c0_34, %c0_35, %c0_36] : memref<2x1x80xf32, #tpu.memory_space<vmem>>, vector<1x1x80xf32>
    %71 = vector.shape_cast %70 : vector<1x1x80xf32> to vector<1x80xf32>
    %c0_37 = arith.constant 0 : index
    %c0_38 = arith.constant 0 : index
    %c0_39 = arith.constant 0 : index
    %72 = vector.load %arg11[%c0_37, %c0_38, %c0_39] : memref<2x1x80xf32, #tpu.memory_space<vmem>>, vector<1x1x80xf32>
    %73 = vector.shape_cast %72 : vector<1x1x80xf32> to vector<1x80xf32>
    %cst_40 = arith.constant dense<0.000000e+00> : vector<80xf32>
    %74 = vector.multi_reduction <add>, %69, %cst_40 [1] : vector<80x80xf32> to vector<80xf32>
    %75 = vector.shape_cast %74 : vector<80xf32> to vector<80x1xf32>
    %cst_41 = arith.constant 8.000000e+01 : f32
    %76 = vector.broadcast %cst_41 : f32 to vector<80x1xf32>
    %77 = arith.divf %75, %76 : vector<80x1xf32>
    %78 = vector.broadcast %77 : vector<80x1xf32> to vector<80x80xf32>
    %79 = arith.subf %69, %78 : vector<80x80xf32>
    %80 = arith.mulf %79, %79 : vector<80x80xf32>
    %cst_42 = arith.constant dense<0.000000e+00> : vector<80xf32>
    %81 = vector.multi_reduction <add>, %80, %cst_42 [1] : vector<80x80xf32> to vector<80xf32>
    %82 = vector.shape_cast %81 : vector<80xf32> to vector<80x1xf32>
    %cst_43 = arith.constant 8.000000e+01 : f32
    %83 = vector.broadcast %cst_43 : f32 to vector<80x1xf32>
    %84 = arith.divf %82, %83 : vector<80x1xf32>
    %cst_44 = arith.constant 9.99999974E-6 : f32
    %85 = vector.broadcast %cst_44 : f32 to vector<80x1xf32>
    %86 = arith.addf %84, %85 : vector<80x1xf32>
    %87 = math.rsqrt %86 : vector<80x1xf32>
    %88 = vector.broadcast %87 : vector<80x1xf32> to vector<80x80xf32>
    %89 = arith.mulf %79, %88 : vector<80x80xf32>
    %90 = vector.broadcast %71 : vector<1x80xf32> to vector<80x80xf32>
    %91 = arith.mulf %89, %90 : vector<80x80xf32>
    %92 = vector.broadcast %73 : vector<1x80xf32> to vector<80x80xf32>
    %93 = arith.addf %91, %92 : vector<80x80xf32>
    %94 = arith.truncf %93 : vector<80x80xf32> to vector<80x80xbf16>
    %c0_45 = arith.constant 0 : index
    %c0_46 = arith.constant 0 : index
    %c0_47 = arith.constant 0 : index
    %95 = vector.load %arg12[%c0_45, %c0_46, %c0_47] : memref<2x80x256xbf16, #tpu.memory_space<vmem>>, vector<1x80x256xbf16>
    %96 = vector.shape_cast %95 : vector<1x80x256xbf16> to vector<80x256xbf16>
    %cst_48 = arith.constant dense<0.000000e+00> : vector<80x256xf32>
    %97 = tpu.matmul %94, %96, %cst_48 {dimension_numbers = #tpu.dot_dimension_numbers<[1], [0], [0], [1], [0, 0, 1, 1], [], []>} : vector<80x80xbf16>, vector<80x256xbf16>, vector<80x256xf32> -> vector<80x256xf32>
    %c0_49 = arith.constant 0 : index
    %c0_50 = arith.constant 0 : index
    %c0_51 = arith.constant 0 : index
    %98 = vector.load %arg13[%c0_49, %c0_50, %c0_51] : memref<2x1x256xf32, #tpu.memory_space<vmem>>, vector<1x1x256xf32>
    %99 = vector.shape_cast %98 : vector<1x1x256xf32> to vector<1x256xf32>
    %100 = vector.broadcast %99 : vector<1x256xf32> to vector<80x256xf32>
    %101 = arith.addf %97, %100 : vector<80x256xf32>
    %cst_52 = arith.constant 0.000000e+00 : f32
    %102 = vector.broadcast %cst_52 : f32 to vector<80x256xf32>
    %103 = arith.maximumf %101, %102 : vector<80x256xf32>
    %104 = arith.truncf %103 : vector<80x256xf32> to vector<80x256xbf16>
    %c0_53 = arith.constant 0 : index
    %c0_54 = arith.constant 0 : index
    %c0_55 = arith.constant 0 : index
    %105 = vector.load %arg14[%c0_53, %c0_54, %c0_55] : memref<2x256x80xbf16, #tpu.memory_space<vmem>>, vector<1x256x80xbf16>
    %106 = vector.shape_cast %105 : vector<1x256x80xbf16> to vector<256x80xbf16>
    %cst_56 = arith.constant dense<0.000000e+00> : vector<80x80xf32>
    %107 = tpu.matmul %104, %106, %cst_56 {dimension_numbers = #tpu.dot_dimension_numbers<[1], [0], [0], [1], [0, 0, 1, 1], [], []>} : vector<80x256xbf16>, vector<256x80xbf16>, vector<80x80xf32> -> vector<80x80xf32>
    %c0_57 = arith.constant 0 : index
    %c0_58 = arith.constant 0 : index
    %c0_59 = arith.constant 0 : index
    %108 = vector.load %arg15[%c0_57, %c0_58, %c0_59] : memref<2x1x80xf32, #tpu.memory_space<vmem>>, vector<1x1x80xf32>
    %109 = vector.shape_cast %108 : vector<1x1x80xf32> to vector<1x80xf32>
    %110 = vector.broadcast %109 : vector<1x80xf32> to vector<80x80xf32>
    %111 = arith.addf %107, %110 : vector<80x80xf32>
    %112 = arith.addf %93, %111 : vector<80x80xf32>
    %c0_60 = arith.constant 0 : index
    %c0_61 = arith.constant 0 : index
    %c0_62 = arith.constant 0 : index
    %113 = vector.load %arg16[%c0_60, %c0_61, %c0_62] : memref<2x1x80xf32, #tpu.memory_space<vmem>>, vector<1x1x80xf32>
    %114 = vector.shape_cast %113 : vector<1x1x80xf32> to vector<1x80xf32>
    %c0_63 = arith.constant 0 : index
    %c0_64 = arith.constant 0 : index
    %c0_65 = arith.constant 0 : index
    %115 = vector.load %arg17[%c0_63, %c0_64, %c0_65] : memref<2x1x80xf32, #tpu.memory_space<vmem>>, vector<1x1x80xf32>
    %116 = vector.shape_cast %115 : vector<1x1x80xf32> to vector<1x80xf32>
    %cst_66 = arith.constant dense<0.000000e+00> : vector<80xf32>
    %117 = vector.multi_reduction <add>, %112, %cst_66 [1] : vector<80x80xf32> to vector<80xf32>
    %118 = vector.shape_cast %117 : vector<80xf32> to vector<80x1xf32>
    %cst_67 = arith.constant 8.000000e+01 : f32
    %119 = vector.broadcast %cst_67 : f32 to vector<80x1xf32>
    %120 = arith.divf %118, %119 : vector<80x1xf32>
    %121 = vector.broadcast %120 : vector<80x1xf32> to vector<80x80xf32>
    %122 = arith.subf %112, %121 : vector<80x80xf32>
    %123 = arith.mulf %122, %122 : vector<80x80xf32>
    %cst_68 = arith.constant dense<0.000000e+00> : vector<80xf32>
    %124 = vector.multi_reduction <add>, %123, %cst_68 [1] : vector<80x80xf32> to vector<80xf32>
    %125 = vector.shape_cast %124 : vector<80xf32> to vector<80x1xf32>
    %cst_69 = arith.constant 8.000000e+01 : f32
    %126 = vector.broadcast %cst_69 : f32 to vector<80x1xf32>
    %127 = arith.divf %125, %126 : vector<80x1xf32>
    %cst_70 = arith.constant 9.99999974E-6 : f32
    %128 = vector.broadcast %cst_70 : f32 to vector<80x1xf32>
    %129 = arith.addf %127, %128 : vector<80x1xf32>
    %130 = math.rsqrt %129 : vector<80x1xf32>
    %131 = vector.broadcast %130 : vector<80x1xf32> to vector<80x80xf32>
    %132 = arith.mulf %122, %131 : vector<80x80xf32>
    %133 = vector.broadcast %114 : vector<1x80xf32> to vector<80x80xf32>
    %134 = arith.mulf %132, %133 : vector<80x80xf32>
    %135 = vector.broadcast %116 : vector<1x80xf32> to vector<80x80xf32>
    %136 = arith.addf %134, %135 : vector<80x80xf32>
    %137 = arith.truncf %136 : vector<80x80xf32> to vector<80x80xbf16>
    %c1_71 = arith.constant 1 : index
    %c0_72 = arith.constant 0 : index
    %c0_73 = arith.constant 0 : index
    %138 = vector.load %arg6[%c1_71, %c0_72, %c0_73] : memref<2x80x256xbf16, #tpu.memory_space<vmem>>, vector<1x80x256xbf16>
    %139 = vector.shape_cast %138 : vector<1x80x256xbf16> to vector<80x256xbf16>
    %cst_74 = arith.constant dense<0.000000e+00> : vector<80x256xf32>
    %140 = tpu.matmul %137, %139, %cst_74 {dimension_numbers = #tpu.dot_dimension_numbers<[1], [0], [0], [1], [0, 0, 1, 1], [], []>} : vector<80x80xbf16>, vector<80x256xbf16>, vector<80x256xf32> -> vector<80x256xf32>
    %c1_75 = arith.constant 1 : index
    %c0_76 = arith.constant 0 : index
    %c0_77 = arith.constant 0 : index
    %141 = vector.load %arg7[%c1_75, %c0_76, %c0_77] : memref<2x1x256xf32, #tpu.memory_space<vmem>>, vector<1x1x256xf32>
    %142 = vector.shape_cast %141 : vector<1x1x256xf32> to vector<1x256xf32>
    %143 = vector.broadcast %142 : vector<1x256xf32> to vector<80x256xf32>
    %144 = arith.addf %140, %143 : vector<80x256xf32>
    %c1_78 = arith.constant 1 : index
    %c0_79 = arith.constant 0 : index
    %c0_80 = arith.constant 0 : index
    %145 = vector.load %arg9[%c1_78, %c0_79, %c0_80] : memref<2x1x80xf32, #tpu.memory_space<vmem>>, vector<1x1x80xf32>
    %146 = vector.shape_cast %145 : vector<1x1x80xf32> to vector<1x80xf32>
    %147 = vector.extract_strided_slice %144 {offsets = [0, 0], sizes = [80, 40], strides = [1, 1]} : vector<80x256xf32> to vector<80x40xf32>
    %148 = vector.extract_strided_slice %144 {offsets = [0, 40], sizes = [80, 40], strides = [1, 1]} : vector<80x256xf32> to vector<80x40xf32>
    %149 = vector.extract_strided_slice %144 {offsets = [0, 80], sizes = [80, 40], strides = [1, 1]} : vector<80x256xf32> to vector<80x40xf32>
    %150 = arith.truncf %147 : vector<80x40xf32> to vector<80x40xbf16>
    %151 = arith.truncf %148 : vector<80x40xf32> to vector<80x40xbf16>
    %cst_81 = arith.constant dense<0.000000e+00> : vector<80x80xf32>
    %152 = tpu.matmul %150, %151, %cst_81 {dimension_numbers = #tpu.dot_dimension_numbers<[1], [1], [0], [0], [0, 0, 1, 0], [], []>} : vector<80x40xbf16>, vector<80x40xbf16>, vector<80x80xf32> -> vector<80x80xf32>
    %153 = arith.addf %152, %0 : vector<80x80xf32>
    %cst_82 = arith.constant dense<0xFF800000> : vector<80xf32>
    %154 = vector.multi_reduction <maximumf>, %153, %cst_82 [1] : vector<80x80xf32> to vector<80xf32>
    %155 = vector.shape_cast %154 : vector<80xf32> to vector<80x1xf32>
    %156 = vector.broadcast %155 : vector<80x1xf32> to vector<80x80xf32>
    %157 = arith.subf %153, %156 : vector<80x80xf32>
    %158 = math.exp %157 : vector<80x80xf32>
    %cst_83 = arith.constant dense<0.000000e+00> : vector<80xf32>
    %159 = vector.multi_reduction <add>, %158, %cst_83 [1] : vector<80x80xf32> to vector<80xf32>
    %160 = vector.shape_cast %159 : vector<80xf32> to vector<80x1xf32>
    %161 = tpu.reciprocal %160 {approx = true} : vector<80x1xf32> -> vector<80x1xf32>
    %162 = vector.broadcast %161 : vector<80x1xf32> to vector<80x80xf32>
    %163 = arith.mulf %158, %162 : vector<80x80xf32>
    %164 = arith.truncf %163 : vector<80x80xf32> to vector<80x80xbf16>
    %165 = arith.truncf %149 : vector<80x40xf32> to vector<80x40xbf16>
    %cst_84 = arith.constant dense<0.000000e+00> : vector<80x40xf32>
    %166 = tpu.matmul %164, %165, %cst_84 {dimension_numbers = #tpu.dot_dimension_numbers<[1], [0], [0], [1], [0, 0, 1, 1], [], []>} : vector<80x80xbf16>, vector<80x40xbf16>, vector<80x40xf32> -> vector<80x40xf32>
    %167 = arith.truncf %166 : vector<80x40xf32> to vector<80x40xbf16>
    %c1_85 = arith.constant 1 : index
    %c0_86 = arith.constant 0 : index
    %c0_87 = arith.constant 0 : index
    %c0_88 = arith.constant 0 : index
    %168 = vector.load %arg8[%c1_85, %c0_86, %c0_87, %c0_88] : memref<2x2x40x80xbf16, #tpu.memory_space<vmem>>, vector<1x1x40x80xbf16>
    %169 = vector.shape_cast %168 : vector<1x1x40x80xbf16> to vector<40x80xbf16>
    %cst_89 = arith.constant dense<0.000000e+00> : vector<80x80xf32>
    %170 = tpu.matmul %167, %169, %cst_89 {dimension_numbers = #tpu.dot_dimension_numbers<[1], [0], [0], [1], [0, 0, 1, 1], [], []>} : vector<80x40xbf16>, vector<40x80xbf16>, vector<80x80xf32> -> vector<80x80xf32>
    %171 = vector.broadcast %146 : vector<1x80xf32> to vector<80x80xf32>
    %172 = arith.addf %171, %170 : vector<80x80xf32>
    %173 = vector.extract_strided_slice %144 {offsets = [0, 128], sizes = [80, 40], strides = [1, 1]} : vector<80x256xf32> to vector<80x40xf32>
    %174 = vector.extract_strided_slice %144 {offsets = [0, 168], sizes = [80, 40], strides = [1, 1]} : vector<80x256xf32> to vector<80x40xf32>
    %175 = vector.extract_strided_slice %144 {offsets = [0, 208], sizes = [80, 40], strides = [1, 1]} : vector<80x256xf32> to vector<80x40xf32>
    %176 = arith.truncf %173 : vector<80x40xf32> to vector<80x40xbf16>
    %177 = arith.truncf %174 : vector<80x40xf32> to vector<80x40xbf16>
    %cst_90 = arith.constant dense<0.000000e+00> : vector<80x80xf32>
    %178 = tpu.matmul %176, %177, %cst_90 {dimension_numbers = #tpu.dot_dimension_numbers<[1], [1], [0], [0], [0, 0, 1, 0], [], []>} : vector<80x40xbf16>, vector<80x40xbf16>, vector<80x80xf32> -> vector<80x80xf32>
    %179 = arith.addf %178, %0 : vector<80x80xf32>
    %cst_91 = arith.constant dense<0xFF800000> : vector<80xf32>
    %180 = vector.multi_reduction <maximumf>, %179, %cst_91 [1] : vector<80x80xf32> to vector<80xf32>
    %181 = vector.shape_cast %180 : vector<80xf32> to vector<80x1xf32>
    %182 = vector.broadcast %181 : vector<80x1xf32> to vector<80x80xf32>
    %183 = arith.subf %179, %182 : vector<80x80xf32>
    %184 = math.exp %183 : vector<80x80xf32>
    %cst_92 = arith.constant dense<0.000000e+00> : vector<80xf32>
    %185 = vector.multi_reduction <add>, %184, %cst_92 [1] : vector<80x80xf32> to vector<80xf32>
    %186 = vector.shape_cast %185 : vector<80xf32> to vector<80x1xf32>
    %187 = tpu.reciprocal %186 {approx = true} : vector<80x1xf32> -> vector<80x1xf32>
    %188 = vector.broadcast %187 : vector<80x1xf32> to vector<80x80xf32>
    %189 = arith.mulf %184, %188 : vector<80x80xf32>
    %190 = arith.truncf %189 : vector<80x80xf32> to vector<80x80xbf16>
    %191 = arith.truncf %175 : vector<80x40xf32> to vector<80x40xbf16>
    %cst_93 = arith.constant dense<0.000000e+00> : vector<80x40xf32>
    %192 = tpu.matmul %190, %191, %cst_93 {dimension_numbers = #tpu.dot_dimension_numbers<[1], [0], [0], [1], [0, 0, 1, 1], [], []>} : vector<80x80xbf16>, vector<80x40xbf16>, vector<80x40xf32> -> vector<80x40xf32>
    %193 = arith.truncf %192 : vector<80x40xf32> to vector<80x40xbf16>
    %c1_94 = arith.constant 1 : index
    %c1_95 = arith.constant 1 : index
    %c0_96 = arith.constant 0 : index
    %c0_97 = arith.constant 0 : index
    %194 = vector.load %arg8[%c1_94, %c1_95, %c0_96, %c0_97] : memref<2x2x40x80xbf16, #tpu.memory_space<vmem>>, vector<1x1x40x80xbf16>
    %195 = vector.shape_cast %194 : vector<1x1x40x80xbf16> to vector<40x80xbf16>
    %cst_98 = arith.constant dense<0.000000e+00> : vector<80x80xf32>
    %196 = tpu.matmul %193, %195, %cst_98 {dimension_numbers = #tpu.dot_dimension_numbers<[1], [0], [0], [1], [0, 0, 1, 1], [], []>} : vector<80x40xbf16>, vector<40x80xbf16>, vector<80x80xf32> -> vector<80x80xf32>
    %197 = arith.addf %172, %196 : vector<80x80xf32>
    %198 = arith.addf %136, %197 : vector<80x80xf32>
    %c1_99 = arith.constant 1 : index
    %c0_100 = arith.constant 0 : index
    %c0_101 = arith.constant 0 : index
    %199 = vector.load %arg10[%c1_99, %c0_100, %c0_101] : memref<2x1x80xf32, #tpu.memory_space<vmem>>, vector<1x1x80xf32>
    %200 = vector.shape_cast %199 : vector<1x1x80xf32> to vector<1x80xf32>
    %c1_102 = arith.constant 1 : index
    %c0_103 = arith.constant 0 : index
    %c0_104 = arith.constant 0 : index
    %201 = vector.load %arg11[%c1_102, %c0_103, %c0_104] : memref<2x1x80xf32, #tpu.memory_space<vmem>>, vector<1x1x80xf32>
    %202 = vector.shape_cast %201 : vector<1x1x80xf32> to vector<1x80xf32>
    %cst_105 = arith.constant dense<0.000000e+00> : vector<80xf32>
    %203 = vector.multi_reduction <add>, %198, %cst_105 [1] : vector<80x80xf32> to vector<80xf32>
    %204 = vector.shape_cast %203 : vector<80xf32> to vector<80x1xf32>
    %cst_106 = arith.constant 8.000000e+01 : f32
    %205 = vector.broadcast %cst_106 : f32 to vector<80x1xf32>
    %206 = arith.divf %204, %205 : vector<80x1xf32>
    %207 = vector.broadcast %206 : vector<80x1xf32> to vector<80x80xf32>
    %208 = arith.subf %198, %207 : vector<80x80xf32>
    %209 = arith.mulf %208, %208 : vector<80x80xf32>
    %cst_107 = arith.constant dense<0.000000e+00> : vector<80xf32>
    %210 = vector.multi_reduction <add>, %209, %cst_107 [1] : vector<80x80xf32> to vector<80xf32>
    %211 = vector.shape_cast %210 : vector<80xf32> to vector<80x1xf32>
    %cst_108 = arith.constant 8.000000e+01 : f32
    %212 = vector.broadcast %cst_108 : f32 to vector<80x1xf32>
    %213 = arith.divf %211, %212 : vector<80x1xf32>
    %cst_109 = arith.constant 9.99999974E-6 : f32
    %214 = vector.broadcast %cst_109 : f32 to vector<80x1xf32>
    %215 = arith.addf %213, %214 : vector<80x1xf32>
    %216 = math.rsqrt %215 : vector<80x1xf32>
    %217 = vector.broadcast %216 : vector<80x1xf32> to vector<80x80xf32>
    %218 = arith.mulf %208, %217 : vector<80x80xf32>
    %219 = vector.broadcast %200 : vector<1x80xf32> to vector<80x80xf32>
    %220 = arith.mulf %218, %219 : vector<80x80xf32>
    %221 = vector.broadcast %202 : vector<1x80xf32> to vector<80x80xf32>
    %222 = arith.addf %220, %221 : vector<80x80xf32>
    %223 = arith.truncf %222 : vector<80x80xf32> to vector<80x80xbf16>
    %c1_110 = arith.constant 1 : index
    %c0_111 = arith.constant 0 : index
    %c0_112 = arith.constant 0 : index
    %224 = vector.load %arg12[%c1_110, %c0_111, %c0_112] : memref<2x80x256xbf16, #tpu.memory_space<vmem>>, vector<1x80x256xbf16>
    %225 = vector.shape_cast %224 : vector<1x80x256xbf16> to vector<80x256xbf16>
    %cst_113 = arith.constant dense<0.000000e+00> : vector<80x256xf32>
    %226 = tpu.matmul %223, %225, %cst_113 {dimension_numbers = #tpu.dot_dimension_numbers<[1], [0], [0], [1], [0, 0, 1, 1], [], []>} : vector<80x80xbf16>, vector<80x256xbf16>, vector<80x256xf32> -> vector<80x256xf32>
    %c1_114 = arith.constant 1 : index
    %c0_115 = arith.constant 0 : index
    %c0_116 = arith.constant 0 : index
    %227 = vector.load %arg13[%c1_114, %c0_115, %c0_116] : memref<2x1x256xf32, #tpu.memory_space<vmem>>, vector<1x1x256xf32>
    %228 = vector.shape_cast %227 : vector<1x1x256xf32> to vector<1x256xf32>
    %229 = vector.broadcast %228 : vector<1x256xf32> to vector<80x256xf32>
    %230 = arith.addf %226, %229 : vector<80x256xf32>
    %cst_117 = arith.constant 0.000000e+00 : f32
    %231 = vector.broadcast %cst_117 : f32 to vector<80x256xf32>
    %232 = arith.maximumf %230, %231 : vector<80x256xf32>
    %233 = arith.truncf %232 : vector<80x256xf32> to vector<80x256xbf16>
    %c1_118 = arith.constant 1 : index
    %c0_119 = arith.constant 0 : index
    %c0_120 = arith.constant 0 : index
    %234 = vector.load %arg14[%c1_118, %c0_119, %c0_120] : memref<2x256x80xbf16, #tpu.memory_space<vmem>>, vector<1x256x80xbf16>
    %235 = vector.shape_cast %234 : vector<1x256x80xbf16> to vector<256x80xbf16>
    %cst_121 = arith.constant dense<0.000000e+00> : vector<80x80xf32>
    %236 = tpu.matmul %233, %235, %cst_121 {dimension_numbers = #tpu.dot_dimension_numbers<[1], [0], [0], [1], [0, 0, 1, 1], [], []>} : vector<80x256xbf16>, vector<256x80xbf16>, vector<80x80xf32> -> vector<80x80xf32>
    %c1_122 = arith.constant 1 : index
    %c0_123 = arith.constant 0 : index
    %c0_124 = arith.constant 0 : index
    %237 = vector.load %arg15[%c1_122, %c0_123, %c0_124] : memref<2x1x80xf32, #tpu.memory_space<vmem>>, vector<1x1x80xf32>
    %238 = vector.shape_cast %237 : vector<1x1x80xf32> to vector<1x80xf32>
    %239 = vector.broadcast %238 : vector<1x80xf32> to vector<80x80xf32>
    %240 = arith.addf %236, %239 : vector<80x80xf32>
    %241 = arith.addf %222, %240 : vector<80x80xf32>
    %c1_125 = arith.constant 1 : index
    %c0_126 = arith.constant 0 : index
    %c0_127 = arith.constant 0 : index
    %242 = vector.load %arg16[%c1_125, %c0_126, %c0_127] : memref<2x1x80xf32, #tpu.memory_space<vmem>>, vector<1x1x80xf32>
    %243 = vector.shape_cast %242 : vector<1x1x80xf32> to vector<1x80xf32>
    %c1_128 = arith.constant 1 : index
    %c0_129 = arith.constant 0 : index
    %c0_130 = arith.constant 0 : index
    %244 = vector.load %arg17[%c1_128, %c0_129, %c0_130] : memref<2x1x80xf32, #tpu.memory_space<vmem>>, vector<1x1x80xf32>
    %245 = vector.shape_cast %244 : vector<1x1x80xf32> to vector<1x80xf32>
    %cst_131 = arith.constant dense<0.000000e+00> : vector<80xf32>
    %246 = vector.multi_reduction <add>, %241, %cst_131 [1] : vector<80x80xf32> to vector<80xf32>
    %247 = vector.shape_cast %246 : vector<80xf32> to vector<80x1xf32>
    %cst_132 = arith.constant 8.000000e+01 : f32
    %248 = vector.broadcast %cst_132 : f32 to vector<80x1xf32>
    %249 = arith.divf %247, %248 : vector<80x1xf32>
    %250 = vector.broadcast %249 : vector<80x1xf32> to vector<80x80xf32>
    %251 = arith.subf %241, %250 : vector<80x80xf32>
    %252 = arith.mulf %251, %251 : vector<80x80xf32>
    %cst_133 = arith.constant dense<0.000000e+00> : vector<80xf32>
    %253 = vector.multi_reduction <add>, %252, %cst_133 [1] : vector<80x80xf32> to vector<80xf32>
    %254 = vector.shape_cast %253 : vector<80xf32> to vector<80x1xf32>
    %cst_134 = arith.constant 8.000000e+01 : f32
    %255 = vector.broadcast %cst_134 : f32 to vector<80x1xf32>
    %256 = arith.divf %254, %255 : vector<80x1xf32>
    %cst_135 = arith.constant 9.99999974E-6 : f32
    %257 = vector.broadcast %cst_135 : f32 to vector<80x1xf32>
    %258 = arith.addf %256, %257 : vector<80x1xf32>
    %259 = math.rsqrt %258 : vector<80x1xf32>
    %260 = vector.broadcast %259 : vector<80x1xf32> to vector<80x80xf32>
    %261 = arith.mulf %251, %260 : vector<80x80xf32>
    %262 = vector.broadcast %243 : vector<1x80xf32> to vector<80x80xf32>
    %263 = arith.mulf %261, %262 : vector<80x80xf32>
    %264 = vector.broadcast %245 : vector<1x80xf32> to vector<80x80xf32>
    %265 = arith.addf %263, %264 : vector<80x80xf32>
    %c0_136 = arith.constant 0 : index
    %c0_137 = arith.constant 0 : index
    %266 = vector.load %arg3[%c0_136, %c0_137] : memref<10x80xf32, #tpu.memory_space<vmem>>, vector<10x80xf32>
    %cst_138 = arith.constant dense<0.000000e+00> : vector<10x80xf32>
    %267 = tpu.matmul %266, %265, %cst_138 {dimension_numbers = #tpu.dot_dimension_numbers<[1], [0], [0], [1], [0, 0, 1, 1], [], []>} : vector<10x80xf32>, vector<80x80xf32>, vector<10x80xf32> -> vector<10x80xf32>
    %c0_139 = arith.constant 0 : index
    %c0_140 = arith.constant 0 : index
    %268 = vector.load %arg18[%c0_139, %c0_140] : memref<80x128xf32, #tpu.memory_space<vmem>>, vector<80x128xf32>
    %cst_141 = arith.constant dense<0.000000e+00> : vector<10x128xf32>
    %269 = tpu.matmul %267, %268, %cst_141 {dimension_numbers = #tpu.dot_dimension_numbers<[1], [0], [0], [1], [0, 0, 1, 1], [], []>} : vector<10x80xf32>, vector<80x128xf32>, vector<10x128xf32> -> vector<10x128xf32>
    %c0_142 = arith.constant 0 : index
    %c0_143 = arith.constant 0 : index
    %270 = vector.load %arg19[%c0_142, %c0_143] : memref<1x128xf32, #tpu.memory_space<vmem>>, vector<1x128xf32>
    %271 = vector.broadcast %270 : vector<1x128xf32> to vector<10x128xf32>
    %272 = arith.addf %269, %271 : vector<10x128xf32>
    %c0_144 = arith.constant 0 : index
    %c0_145 = arith.constant 0 : index
    %c0_146 = arith.constant 0 : index
    %273 = vector.load %arg20[%c0_144, %c0_145, %c0_146] : memref<1x10x128xf32, #tpu.memory_space<vmem>>, vector<1x10x128xf32>
    %274 = vector.shape_cast %273 : vector<1x10x128xf32> to vector<10x128xf32>
    %275 = vector.shape_cast %272 : vector<10x128xf32> to vector<1x10x128xf32>
    tpu.vector_store %arg20[%c0_144, %c0_145, %c0_146], %275 {strides = array<i32>} : memref<1x10x128xf32, #tpu.memory_space<vmem>>, vector<1x10x128xf32>,
    return
  }
  func.func @transform_0(%arg0: i32) -> (i32, i32) {
    %c0_i32 = arith.constant 0 : i32
    %c0_i32_0 = arith.constant 0 : i32
    return %arg0, %c0_i32 : i32, i32
  }
  func.func @transform_1(%arg0: i32) -> (i32, i32) {
    %c0_i32 = arith.constant 0 : i32
    %c0_i32_0 = arith.constant 0 : i32
    %c0_i32_1 = arith.constant 0 : i32
    return %c0_i32, %c0_i32_0 : i32, i32
  }
  func.func @transform_2(%arg0: i32) -> (i32, i32) {
    %c0_i32 = arith.constant 0 : i32
    %c0_i32_0 = arith.constant 0 : i32
    %c0_i32_1 = arith.constant 0 : i32
    return %c0_i32, %c0_i32_0 : i32, i32
  }
  func.func @transform_3(%arg0: i32) -> (i32, i32) {
    %c0_i32 = arith.constant 0 : i32
    %c0_i32_0 = arith.constant 0 : i32
    %c0_i32_1 = arith.constant 0 : i32
    return %c0_i32, %c0_i32_0 : i32, i32
  }
  func.func @transform_4(%arg0: i32) -> (i32, i32) {
    %c0_i32 = arith.constant 0 : i32
    %c0_i32_0 = arith.constant 0 : i32
    %c0_i32_1 = arith.constant 0 : i32
    return %c0_i32, %c0_i32_0 : i32, i32
  }
  func.func @transform_5(%arg0: i32) -> (i32, i32, i32) {
    %c0_i32 = arith.constant 0 : i32
    %c0_i32_0 = arith.constant 0 : i32
    %c0_i32_1 = arith.constant 0 : i32
    %c0_i32_2 = arith.constant 0 : i32
    return %c0_i32, %c0_i32_0, %c0_i32_1 : i32, i32, i32
  }
  func.func @transform_6(%arg0: i32) -> (i32, i32, i32) {
    %c0_i32 = arith.constant 0 : i32
    %c0_i32_0 = arith.constant 0 : i32
    %c0_i32_1 = arith.constant 0 : i32
    %c0_i32_2 = arith.constant 0 : i32
    return %c0_i32, %c0_i32_0, %c0_i32_1 : i32, i32, i32
  }
  func.func @transform_7(%arg0: i32) -> (i32, i32, i32, i32) {
    %c0_i32 = arith.constant 0 : i32
    %c0_i32_0 = arith.constant 0 : i32
    %c0_i32_1 = arith.constant 0 : i32
    %c0_i32_2 = arith.constant 0 : i32
    %c0_i32_3 = arith.constant 0 : i32
    return %c0_i32, %c0_i32_0, %c0_i32_1, %c0_i32_2 : i32, i32, i32, i32
  }
  func.func @transform_8(%arg0: i32) -> (i32, i32, i32) {
    %c0_i32 = arith.constant 0 : i32
    %c0_i32_0 = arith.constant 0 : i32
    %c0_i32_1 = arith.constant 0 : i32
    %c0_i32_2 = arith.constant 0 : i32
    return %c0_i32, %c0_i32_0, %c0_i32_1 : i32, i32, i32
  }
  func.func @transform_9(%arg0: i32) -> (i32, i32, i32) {
    %c0_i32 = arith.constant 0 : i32
    %c0_i32_0 = arith.constant 0 : i32
    %c0_i32_1 = arith.constant 0 : i32
    %c0_i32_2 = arith.constant 0 : i32
    return %c0_i32, %c0_i32_0, %c0_i32_1 : i32, i32, i32
  }
  func.func @transform_10(%arg0: i32) -> (i32, i32, i32) {
    %c0_i32 = arith.constant 0 : i32
    %c0_i32_0 = arith.constant 0 : i32
    %c0_i32_1 = arith.constant 0 : i32
    %c0_i32_2 = arith.constant 0 : i32
    return %c0_i32, %c0_i32_0, %c0_i32_1 : i32, i32, i32
  }
  func.func @transform_11(%arg0: i32) -> (i32, i32, i32) {
    %c0_i32 = arith.constant 0 : i32
    %c0_i32_0 = arith.constant 0 : i32
    %c0_i32_1 = arith.constant 0 : i32
    %c0_i32_2 = arith.constant 0 : i32
    return %c0_i32, %c0_i32_0, %c0_i32_1 : i32, i32, i32
  }
  func.func @transform_12(%arg0: i32) -> (i32, i32, i32) {
    %c0_i32 = arith.constant 0 : i32
    %c0_i32_0 = arith.constant 0 : i32
    %c0_i32_1 = arith.constant 0 : i32
    %c0_i32_2 = arith.constant 0 : i32
    return %c0_i32, %c0_i32_0, %c0_i32_1 : i32, i32, i32
  }
  func.func @transform_13(%arg0: i32) -> (i32, i32, i32) {
    %c0_i32 = arith.constant 0 : i32
    %c0_i32_0 = arith.constant 0 : i32
    %c0_i32_1 = arith.constant 0 : i32
    %c0_i32_2 = arith.constant 0 : i32
    return %c0_i32, %c0_i32_0, %c0_i32_1 : i32, i32, i32
  }
  func.func @transform_14(%arg0: i32) -> (i32, i32, i32) {
    %c0_i32 = arith.constant 0 : i32
    %c0_i32_0 = arith.constant 0 : i32
    %c0_i32_1 = arith.constant 0 : i32
    %c0_i32_2 = arith.constant 0 : i32
    return %c0_i32, %c0_i32_0, %c0_i32_1 : i32, i32, i32
  }
  func.func @transform_15(%arg0: i32) -> (i32, i32, i32) {
    %c0_i32 = arith.constant 0 : i32
    %c0_i32_0 = arith.constant 0 : i32
    %c0_i32_1 = arith.constant 0 : i32
    %c0_i32_2 = arith.constant 0 : i32
    return %c0_i32, %c0_i32_0, %c0_i32_1 : i32, i32, i32
  }
  func.func @transform_16(%arg0: i32) -> (i32, i32, i32) {
    %c0_i32 = arith.constant 0 : i32
    %c0_i32_0 = arith.constant 0 : i32
    %c0_i32_1 = arith.constant 0 : i32
    %c0_i32_2 = arith.constant 0 : i32
    return %c0_i32, %c0_i32_0, %c0_i32_1 : i32, i32, i32
  }
  func.func @transform_17(%arg0: i32) -> (i32, i32) {
    %c0_i32 = arith.constant 0 : i32
    %c0_i32_0 = arith.constant 0 : i32
    %c0_i32_1 = arith.constant 0 : i32
    return %c0_i32, %c0_i32_0 : i32, i32
  }
  func.func @transform_18(%arg0: i32) -> (i32, i32) {
    %c0_i32 = arith.constant 0 : i32
    %c0_i32_0 = arith.constant 0 : i32
    %c0_i32_1 = arith.constant 0 : i32
    return %c0_i32, %c0_i32_0 : i32, i32
  }
  func.func @transform_19(%arg0: i32) -> (i32, i32, i32) {
    %c0_i32 = arith.constant 0 : i32
    %c0_i32_0 = arith.constant 0 : i32
    %c0_i32_1 = arith.constant 0 : i32
    return %arg0, %c0_i32, %c0_i32_0 : i32, i32, i32
  }
}

</mosaic_0001>

<bundles_post_ra>
// kernel: eq.25
= control target key start
LH: loop header
LB: loop body
LE: loop exit
PB: predicated region body
PF: predicated region fallthrough
CT: control target
= control target key end

     0   :  { %s83_s10 = smov 72   ;;  %s84_s11 = smov 56   ;;  %vm3_vm0 = vcmask 64512   ;;  %vm9_vm1 = vcmask 654912   ;;  %vm15_vm2 = vcmask 589312   ;;  %vm21_vm3 = vcmask 523712   ;;  %s135_s0 = inlined_call_operand.vmem [shape: s32[10,8], index: 0, kind: input, shape index: {}]   ;;  %s136_s1 = inlined_call_operand.vmem [shape: s32[80], index: 1, kind: output, shape index: {}]  }
   0x1   :  { %v65_v0 = vld [vmem:[%s135_s0 + $0x9] sm:$0x1]   ;;  %v67_v1 = vld [vmem:[%s135_s0 + $0x7] sm:$0x1]   ;;  %v66_v2 = vld [vmem:[%s135_s0 + $0x8] sm:$0x1]  }
   0x2   :  { %7 = vrot.lane.b32.xlu0 %v65_v0, %s83_s10  ;;  %19 = vrot.lane.b32.xlu1 %v67_v1, %s84_s11  ;;  %v68_v3 = vld [vmem:[%s135_s0 + $0x6] sm:$0x1]   ;;  %v2_v4 = vld [vmem:[%s135_s0] sm:$0x1]   ;;  %s85_s18 = smov 64   ;;  %s86_s19 = smov 48  }
   0x3   :  { %v69_v5 = vld [vmem:[%s135_s0 + $0x5] sm:$0x1]   ;;  %v70_v6 = vld [vmem:[%s135_s0 + $0x4] sm:$0x1]   ;;  %4 = vst.msk [vmem:[#allocation0] sm:$0x1] %vm3_vm0, %v2_v4  }
   0x4   :  { %s87_s24 = smov 40   ;;  %s88_s25 = smov 32   ;;  %v71_v7 = vld [vmem:[%s135_s0 + $0x3] sm:$0x1]   ;;  %v72_v8 = vld [vmem:[%s135_s0 + $0x2] sm:$0x1]  }
   0x5   :  { %s89_s30 = smov 24   ;;  %s90_s2 = smov 16   ;;  %v73_v9 = vld [vmem:[%s135_s0 + $0x1] sm:$0x1]   ;;  %vm27_vm4 = vcmask 458112   ;;  %vm33_vm5 = vcmask 392512  }
   0x6   :  { %13 = vrot.lane.b32.xlu0 %v66_v2, %s85_s18  ;;  %25 = vrot.lane.b32.xlu1 %v68_v3, %s86_s19  ;;  %s91_s0 = smov 8   ;;  %vm39_vm6 = vcmask 326912   ;;  %vm45_vm7 = vcmask 261312   ;;  %vm51_vm8 = vcmask 195712   ;;  %vm57_vm9 = vcmask 130112  }
   0xa   :  { %31 = vrot.lane.b32.xlu0 %v69_v5, %s87_s24  ;;  %37 = vrot.lane.b32.xlu1 %v70_v6, %s88_s25 }
   0xe   :  { %43 = vrot.lane.b32.xlu0 %v71_v7, %s89_s30  ;;  %49 = vrot.lane.b32.xlu1 %v72_v8, %s90_s2 }
  0x12   :  { %55 = vrot.lane.b32.xlu0 %v73_v9, %s91_s0 }
  0x74   :  { %v8_v10 = vpop.permute.xlu0 %7   ;;  %v20_v11 = vpop.permute.xlu1 %19  }
  0x75   :  { %10 = vst.msk [vmem:[#allocation0] sm:$0x1] %vm9_vm1, %v8_v10  }
  0x78   :  { %v14_v12 = vpop.permute.xlu0 %13   ;;  %v26_v13 = vpop.permute.xlu1 %25  }
  0x79   :  { %16 = vst.msk [vmem:[#allocation0] sm:$0x1] %vm15_vm2, %v14_v12  }
  0x7a   :  { %22 = vst.msk [vmem:[#allocation0] sm:$0x1] %vm21_vm3, %v20_v11  }
  0x7b   :  { %28 = vst.msk [vmem:[#allocation0] sm:$0x1] %vm27_vm4, %v26_v13  }
  0x7c   :  { %v32_v14 = vpop.permute.xlu0 %31   ;;  %v38_v15 = vpop.permute.xlu1 %37  }
  0x7d   :  { %34 = vst.msk [vmem:[#allocation0] sm:$0x1] %vm33_vm5, %v32_v14  }
  0x7e   :  { %40 = vst.msk [vmem:[#allocation0] sm:$0x1] %vm39_vm6, %v38_v15  }
  0x80   :  { %v44_v16 = vpop.permute.xlu0 %43   ;;  %v50_v17 = vpop.permute.xlu1 %49  }
  0x81   :  { %46 = vst.msk [vmem:[#allocation0] sm:$0x1] %vm45_vm7, %v44_v16  }
  0x82   :  { %52 = vst.msk [vmem:[#allocation0] sm:$0x1] %vm51_vm8, %v50_v17  }
  0x84   :  { %v56_v18 = vpop.permute.xlu0 %55  }
  0x85   :  { %58 = vst.msk [vmem:[#allocation0] sm:$0x1] %vm57_vm9, %v56_v18  }
  0x8c   :  { %v62_v19 = vld [vmem:[#allocation0] sm:$0x1] }
  0x8d   :  { %64 = vst [vmem:[%s136_s1] sm:$0x1] %v62_v19 }

// kernel: classifier_forward.1
= control target key start
LH: loop header
LB: loop body
LE: loop exit
PB: predicated region body
PF: predicated region fallthrough
CT: control target
= control target key end

     0   :  { %s7734_s0 = inlined_call_operand.vmem [shape: f32[80,40], index: 0, kind: input, shape index: {}]   ;;  %s7735_s1 = inlined_call_operand.vmem [shape: f32[80,80], index: 1, kind: input, shape index: {}]   ;;  %s7736_s2 = inlined_call_operand.vmem [shape: f32[10,80], index: 2, kind: input, shape index: {}]   ;;  %s7737_s3 = inlined_call_operand.vmem [shape: bf16[40,80], index: 3, kind: input, shape index: {}]   ;;  %s7738_s4 = inlined_call_operand.hbm [shape: f32[1,80], index: 4, kind: input, shape index: {}]   ;;  %s7739_s5 = inlined_call_operand.vmem [shape: bf16[2,80,256], index: 5, kind: input, shape index: {}]   ;;  %s7740_s6 = inlined_call_operand.vmem [shape: f32[2,1,256], index: 6, kind: input, shape index: {}]   ;;  %s7741_s7 = inlined_call_operand.hbm [shape: bf16[2,2,40,80], index: 7, kind: input, shape index: {}]   ;;  %s7742_s8 = inlined_call_operand.vmem [shape: f32[2,1,80], index: 8, kind: input, shape index: {}]   ;;  %s7743_s9 = inlined_call_operand.vmem [shape: f32[2,1,80], index: 9, kind: input, shape index: {}]   ;;  %s7744_s10 = inlined_call_operand.vmem [shape: f32[2,1,80], index: 10, kind: input, shape index: {}]   ;;  %s7745_s11 = inlined_call_operand.vmem [shape: bf16[2,80,256], index: 11, kind: input, shape index: {}]   ;;  %s7746_s12 = inlined_call_operand.vmem [shape: f32[2,1,256], index: 12, kind: input, shape index: {}]   ;;  %s7747_s13 = inlined_call_operand.vmem [shape: bf16[2,256,80], index: 13, kind: input, shape index: {}]   ;;  %s7748_s14 = inlined_call_operand.vmem [shape: f32[2,1,80], index: 14, kind: input, shape index: {}]   ;;  %s7749_s15 = inlined_call_operand.vmem [shape: f32[2,1,80], index: 15, kind: input, shape index: {}]   ;;  %s7750_s16 = inlined_call_operand.vmem [shape: f32[2,1,80], index: 16, kind: input, shape index: {}]   ;;  %s7751_s17 = inlined_call_operand.hbm [shape: f32[80,128], index: 17, kind: input, shape index: {}]   ;;  %s7752_s18 = inlined_call_operand.vmem [shape: f32[1,128], index: 18, kind: input, shape index: {}]   ;;  %s7753_s19 = inlined_call_operand.vmem [shape: f32[1,10,128], index: 19, kind: output, shape index: {}]  }
   0x1   :  { %7759 = sst [smem:[#allocation9_spill]] %s7734_s0 }
   0x2   :  { %7760 = sst [smem:[#allocation10_spill]] %s7735_s1 }
   0x3   :  { %7761 = sst [smem:[#allocation11_spill]] %s7736_s2 }
   0x4   :  { %7762 = sst [smem:[#allocation12_spill]] %s7737_s3 }
   0x5   :  { %7763 = sst [smem:[#allocation13_spill]] %s7753_s19 }
   0x6   :  { %24 = vsyncpa [#allocation3], 0 }
   0x7   :  { %25 = vsyncpa [#allocation5], 0  ;;  %s5587_s0 = smov [#allocation4]   ;;  %s5517_s1 = scalar_lea.hbm %s7741_s7, 1280 }
   0x8   :  { %s53_s30 = sshll.u32 %s5587_s0, 4  ;;  %p5518_p0 = scmp.ne.s32.totalorder %s7741_s7, %s5517_s1  ;;  %s54_s30 = int_to_ptr.vmem [resolvable:$true] %s53_s30 }
   0x9   :  { %p5521_p1 = scmp.lt.u32.totalorder %s5517_s1, %s7741_s7 }
   0xb   :  { %p5523_p2 = pnand %p5521_p1, %p5518_p0 }
   0xd   :  { %5526 = shalt.err (!%p5523_p2)
}
   0xe   :  { %s5527_s25 = scalar_lea.vmem %s54_s30, 1280  ;;  %p5532_p4 = scmp.lt.s32.totalorder %s54_s30, %s54_s30 }
   0xf   :  { %p5528_p3 = scmp.ne.s32.totalorder %s54_s30, %s5527_s25  ;;  %p5533_p5 = scmp.lt.s32.totalorder %s5527_s25, %s5527_s25 }
  0x11   :  { %p5534_p6 = por %p5533_p5, %p5532_p4 }
  0x13   :  { %p5535_p7 = pnand %p5534_p6, %p5528_p3 }
  0x15   :  { %5538 = shalt.err (!%p5535_p7)
}
  0x16   :  { %s5588_s3 = smov 64   ;;  %s5589_s26 = smov 4  }
  0x17   :  { %59 = dma.hbm_to_vmem [thread:$0]  %s7741_s7, 1280, %s54_s30, [#allocation5], %s5588_s3, %s5588_s3, %s5589_s26  }
  0x18   :  { %s5590_s29 = smov [#allocation2]   ;;  %s5591_s20 = smov [#allocation6]  }
  0x19   :  { %s40_s0 = sshll.u32 %s5590_s29, 4  ;;  %s83_s21 = sshll.u32 %s5591_s20, 4  ;;  %s41_s0 = int_to_ptr.vmem [resolvable:$true] %s40_s0  ;;  %s84_s21 = int_to_ptr.vmem [resolvable:$true] %s83_s21 }
  0x1a   :  { %s5539_s2 = scalar_lea.hbm %s7738_s4, 16 }
  0x1b   :  { %p5540_p8 = scmp.ne.s32.totalorder %s7738_s4, %s5539_s2  ;;  %p5543_p9 = scmp.lt.u32.totalorder %s5539_s2, %s7738_s4 }
  0x1d   :  { %p5545_p10 = pnand %p5543_p9, %p5540_p8 }
  0x1f   :  { %5548 = shalt.err (!%p5545_p10)
}
  0x20   :  { %s5549_s7 = scalar_lea.vmem %s41_s0, 16  ;;  %s5553_s30 = scalar_lea.vmem %s41_s0, 32 }
  0x21   :  { %p5550_p11 = scmp.ne.s32.totalorder %s41_s0, %s5549_s7  ;;  %p5554_p12 = scmp.lt.s32.totalorder %s41_s0, %s41_s0 }
  0x22   :  { %p5555_p13 = scmp.lt.s32.totalorder %s5553_s30, %s5549_s7 }
  0x24   :  { %p5556_p0 = por %p5555_p13, %p5554_p12 }
  0x26   :  { %p5557_p1 = pnand %p5556_p0, %p5550_p11 }
  0x28   :  { %5560 = shalt.err (!%p5557_p1)
}
  0x29   :  { %43 = dma.hbm_to_vmem [thread:$0]  %s7738_s4, 16, %s41_s0, [#allocation3]  }
  0x2a   :  { %s5561_s19 = scalar_lea.hbm %s7751_s17, 1280 }
  0x2b   :  { %p5562_p2 = scmp.ne.s32.totalorder %s7751_s17, %s5561_s19  ;;  %p5565_p3 = scmp.lt.u32.totalorder %s5561_s19, %s7751_s17 }
  0x2d   :  { %p5567_p4 = pnand %p5565_p3, %p5562_p2 }
  0x2f   :  { %5570 = shalt.err (!%p5567_p4)
}
  0x30   :  { %s5571_s2 = scalar_lea.vmem %s84_s21, 1280  ;;  %p5576_p6 = scmp.lt.s32.totalorder %s84_s21, %s84_s21 }
  0x31   :  { %p5572_p5 = scmp.ne.s32.totalorder %s84_s21, %s5571_s2  ;;  %p5577_p7 = scmp.lt.s32.totalorder %s5571_s2, %s5571_s2 }
  0x33   :  { %p5578_p8 = por %p5577_p7, %p5576_p6 }
  0x35   :  { %p5579_p9 = pnand %p5578_p8, %p5572_p5 }
  0x37   :  { %5582 = shalt.err (!%p5579_p9)
}
  0x38   :  { %s5592_s4 = smov 128   ;;  %s5593_s0 = smov 8  }
  0x39   :  { %89 = dma.hbm_to_vmem [thread:$0]  %s7751_s17, 1280, %s84_s21, [#allocation5], %s5592_s4, %s5592_s4, %s5593_s0  }
  0x3a   :  { %5583 = dma.done.wait [#allocation3], 16  }
  0x3b   :  { %5584 = vsyncadd [#allocation3], 4294967280 }
  0x3c   :  { %5585 = dma.done.wait [#allocation5], 2560  }
  0x3d   :  { %5586 = vsyncadd [#allocation5], 4294964736  ;;  %v5594_v0 = vmov 0.0   ;;  %vm5595_vm0 = vmmov 0   ;;  %s7764_s30 = sld [smem:[#allocation12_spill]]  ;;  %vm170_vm1 = vcmask 1043456  }
  0x3e   :  { %4692 = vmatprep.subr.bf16.mxu0 %v5594_v0  ;;  %4698 = vmatprep.mubr.msk.bf16.mxu0 %vm5595_vm0, %v5594_v0  ;;  %s7765_s19 = sld [smem:[#allocation9_spill]]  ;;  %v5163_v6 = vld [vmem:[%s7739_s5 + $0x4] ss:$8 sps:$4 sm:$0xff]   ;;  %v5165_v8 = vld [vmem:[%s7739_s5] ss:$8 sps:$4 sm:$0xff]   ;;  %vm154_vm2 = vcmask 326656  }
  0x3f   :  { %340 = vmatprep.subr.bf16.mxu1 %v5163_v6  ;;  %v5166_v9 = vld [vmem:[%s7739_s5 + $0x14] ss:$8 sps:$4 sm:$0xff]   ;;  %v5168_v11 = vld [vmem:[%s7739_s5 + $0x10] ss:$8 sps:$4 sm:$0xff]   ;;  %v5169_v12 = vld [vmem:[%s7739_s5 + $0x24] ss:$8 sps:$4 sm:$0xff]  }
  0x40   :  { %341 = vmatpush1.bf16.msra.mxu1 %v5165_v8  ;;  %v5171_v13 = vld [vmem:[%s7739_s5 + $0x20] ss:$8 sps:$4 sm:$0xff]   ;;  %v5172_v16 = vld [vmem:[%s7739_s5 + $0x34] ss:$8 sps:$4 sm:$0xff]   ;;  %v5174_v27 = vld [vmem:[%s7739_s5 + $0x30] ss:$8 sps:$4 sm:$0xff]  }
  0x41   :  { %342 = vmatprep.subr.bf16.mxu1 %v5166_v9  ;;  %v5175_v28 = vld [vmem:[%s7739_s5 + $0x44] ss:$8 sps:$4 sm:$0xff]   ;;  %v5177_v29 = vld [vmem:[%s7739_s5 + $0x40] ss:$8 sps:$4 sm:$0xff]   ;;  %v5596_v30 = vmov 0   ;;  %vm324_vm3 = vcmask 654336  }
  0x42   :  { %372 = vmatprep.mubr.bf16.mxu1 %v5596_v30  ;;  %v4206_v31 = vld [vmem:[#allocation2] ss:$0 sm:$0xff]  ;;  %s5597_s22 = smov 88   ;;  %s5598_s2 = smov 48  }
  0x43   :  { %v5160_v1 = vld [vmem:[%s7764_s30] sm:$0xff]   ;;  %v5161_v2 = vld [vmem:[%s7764_s30 + $0x8] sm:$0xff]   ;;  %v5162_v3 = vld [vmem:[%s7764_s30 + $0x10] ss:$0 sps:$4 sm:$0xff]   ;;  %s7766_s23 = sld [smem:[#allocation10_spill]]  ;;  %s7767_s30 = sld [smem:[#allocation11_spill]] }
  0x44   :  { %4693 = vmatpush3.bf16.msra.mxu0 %v5160_v1  ;;  %v112_v4 = vld [vmem:[%s7765_s19] sm:$0xff]  ;;  %v113_v5 = vld [vmem:[%s7765_s19 + $0x8] sm:$0xff]  ;;  %v172_v7 = vsel %vm170_vm1, %v5162_v3, 0  ;;  %v114_v14 = vld [vmem:[%s7765_s19 + $0x10] sm:$0xff]  ;;  %343 = vmatpush1.bf16.msra.mxu1 %v5168_v11 }
  0x45   :  { %4694 = vmatprep.subr.bf16.mxu0 %v5594_v0  ;;  %v122_v10 = vpack.c.bf16 %v113_v5, %v112_v4  ;;  %v115_v15 = vld [vmem:[%s7765_s19 + $0x18] sm:$0xff]  ;;  %344 = vmatprep.subr.bf16.mxu1 %v5169_v12  ;;  %v116_v18 = vld [vmem:[%s7765_s19 + $0x20] sm:$0xff]  ;;  %v117_v19 = vld [vmem:[%s7765_s19 + $0x28] sm:$0xff]  ;;  %v264_v4 = vlaneseq }
  0x46   :  { %v123_v17 = vpack.c.bf16 %v115_v15, %v114_v14  ;;  %v124_v20 = vpack.c.bf16 %v117_v19, %v116_v18  ;;  %v118_v21 = vld [vmem:[%s7765_s19 + $0x30] sm:$0xff]  ;;  %v119_v22 = vld [vmem:[%s7765_s19 + $0x38] sm:$0xff]  ;;  %v120_v24 = vld [vmem:[%s7765_s19 + $0x40] sm:$0xff] }
  0x47   :  { %v125_v23 = vpack.c.bf16 %v119_v22, %v118_v21  ;;  %v121_v25 = vld [vmem:[%s7765_s19 + $0x48] sm:$0xff]  ;;  %v265_v5 = vshrl.u32 %v264_v4, 7 }
  0x48   :  { %4695 = vmatpush3.bf16.msra.mxu0 %v5161_v2  ;;  %345 = vmatpush1.bf16.msra.mxu1 %v5171_v13  ;;  %v126_v26 = vpack.c.bf16 %v121_v25, %v120_v24 }
  0x49   :  { %4696 = vmatprep.subr.bf16.mxu0 %v5594_v0  ;;  %346 = vmatprep.subr.bf16.mxu1 %v5172_v16  ;;  %v5869_v6 = vsub.s32 0, %v265_v5  ;;  %v5874_v8 = vsub.s32 1, %v265_v5 }
  0x4c   :  { %4697 = vmatpush3.bf16.msra.mxu0 %v172_v7  ;;  %347 = vmatpush1.bf16.msra.mxu1 %v5174_v27  ;;  %v262_v7 = vld [vmem:[%s7740_s6] sm:$0x3] }
  0x4d   :  { %4718 = vmatprep.subr.bf16.mxu0 %v5594_v0  ;;  %348 = vmatprep.subr.bf16.mxu1 %v5175_v28  ;;  %v267_v9 = vrot.slane %v262_v7, %v5869_v6  ;;  %v271_v11 = vrot.slane %v262_v7, %v5874_v8 }
  0x4f   :  { %4699 = vmatmul.mubr.msk.bf16.vlgmr.msra.gmra.mrb[0].mxu0 %vm154_vm2, %v122_v10 }
  0x50   :  { %4702 = vmatprep.mubr.msk.bf16.mxu0 %vm5595_vm0, %v5594_v0  ;;  %349 = vmatpush1.bf16.msra.mxu1 %v5177_v29 }
  0x51   :  { %4748 = vmatprep.subr.bf16.mxu1 %v5594_v0 }
  0x57   :  { %4703 = vmatmul.mubr.msk.bf16.gmra.mrb[4].mxu0 %vm154_vm2, %v123_v17 }
  0x58   :  { %4706 = vmatprep.mubr.msk.bf16.mxu0 %vm5595_vm0, %v5594_v0 }
  0x5f   :  { %4707 = vmatmul.mubr.msk.bf16.gmra.mrb[8].mxu0 %vm154_vm2, %v124_v20 }
  0x60   :  { %4710 = vmatprep.mubr.msk.bf16.mxu0 %vm5595_vm0, %v5594_v0 }
  0x67   :  { %4711 = vmatmul.mubr.msk.bf16.gmra.mrb[12].mxu0 %vm154_vm2, %v125_v23 }
  0x68   :  { %4714 = vmatprep.mubr.msk.bf16.mxu0 %vm5595_vm0, %v5594_v0 }
  0x6f   :  { %4715 = vmatmul.mubr.msk.bf16.gmra.mrb[16].mxu0 %vm154_vm2, %v126_v26 }
  0x70   :  { %4728 = vmatprep.mubr.msk.bf16.mxu0 %vm5595_vm0, %v5594_v0 }
 0x122   :  { %v208_v32 = vpop.f32.mrb[0].mxu0 }
 0x123   :  { %v4700_v33 = vpop.f32.mrb[1].mxu0  ;;  %v5828_v35 = vadd.f32 %v4206_v31, %v208_v32 }
 0x124   :  { %v211_v34 = vpop.f32.mrb[2].mxu0 }
 0x125   :  { %v5830_v36 = vadd.f32 %v4206_v31, %v211_v34  ;;  %v4701_v37 = vpop.f32.mrb[3].mxu0 }
 0x127   :  { %v247_v38 = vpack.c.bf16 %v5830_v36, %v5828_v35 }
 0x129   :  { %4225 = vmatmul.mubr.msk.bf16.vlgmr.msra.gmra.mrb[0].mxu1 %vm324_vm3, %v247_v38 }
 0x12a   :  { %v216_v39 = vpop.f32.mrb[4].mxu0  ;;  %382 = vmatprep.mubr.bf16.mxu1 %v5596_v30 }
 0x12b   :  { %v4704_v40 = vpop.f32.mrb[5].mxu0  ;;  %v5836_v42 = vadd.f32 %v4206_v31, %v216_v39 }
 0x12c   :  { %v219_v41 = vpop.f32.mrb[6].mxu0 }
 0x12d   :  { %v5838_v43 = vadd.f32 %v4206_v31, %v219_v41  ;;  %v4705_v44 = vpop.f32.mrb[7].mxu0 }
 0x12f   :  { %v248_v45 = vpack.c.bf16 %v5838_v43, %v5836_v42 }
 0x131   :  { %4226 = vmatmul.mubr.msk.bf16.gmra.mrb[4].mxu1 %vm324_vm3, %v248_v45 }
 0x132   :  { %v224_v46 = vpop.f32.mrb[8].mxu0  ;;  %392 = vmatprep.mubr.bf16.mxu1 %v5596_v30 }
 0x133   :  { %v4708_v47 = vpop.f32.mrb[9].mxu0  ;;  %v5844_v49 = vadd.f32 %v4206_v31, %v224_v46 }
 0x134   :  { %v227_v48 = vpop.f32.mrb[10].mxu0 }
 0x135   :  { %v5846_v50 = vadd.f32 %v4206_v31, %v227_v48  ;;  %v4709_v51 = vpop.f32.mrb[11].mxu0 }
 0x137   :  { %v249_v52 = vpack.c.bf16 %v5846_v50, %v5844_v49 }
 0x139   :  { %4227 = vmatmul.mubr.msk.bf16.gmra.mrb[8].mxu1 %vm324_vm3, %v249_v52 }
 0x13a   :  { %v232_v53 = vpop.f32.mrb[12].mxu0  ;;  %402 = vmatprep.mubr.bf16.mxu1 %v5596_v30 }
 0x13b   :  { %v4712_v54 = vpop.f32.mrb[13].mxu0  ;;  %v5852_v56 = vadd.f32 %v4206_v31, %v232_v53 }
 0x13c   :  { %v235_v55 = vpop.f32.mrb[14].mxu0 }
 0x13d   :  { %v5854_v57 = vadd.f32 %v4206_v31, %v235_v55  ;;  %v4713_v58 = vpop.f32.mrb[15].mxu0 }
 0x13f   :  { %v250_v59 = vpack.c.bf16 %v5854_v57, %v5852_v56 }
 0x141   :  { %4228 = vmatmul.mubr.msk.bf16.gmra.mrb[12].mxu1 %vm324_vm3, %v250_v59 }
 0x142   :  { %v240_v60 = vpop.f32.mrb[16].mxu0  ;;  %412 = vmatprep.mubr.bf16.mxu1 %v5596_v30 }
 0x143   :  { %v4716_v61 = vpop.f32.mrb[17].mxu0  ;;  %v5860_v63 = vadd.f32 %v4206_v31, %v240_v60 }
 0x144   :  { %v243_v62 = vpop.f32.mrb[18].mxu0 }
 0x145   :  { %v5862_v1 = vadd.f32 %v4206_v31, %v243_v62  ;;  %v4717_v2 = vpop.f32.mrb[19].mxu0 }
 0x147   :  { %v251_v3 = vpack.c.bf16 %v5862_v1, %v5860_v63 }
 0x149   :  { %4229 = vmatmul.mubr.msk.bf16.gmra.mrb[16].mxu1 %vm324_vm3, %v251_v3 }
 0x14a   :  { %4758 = vmatprep.mubr.msk.bf16.mxu1 %vm5595_vm0, %v5594_v0 }
 0x1fc   :  { %v374_v10 = vpop.f32.mrb[0].mxu1 }
 0x1fd   :  { %v376_v12 = vpop.f32.mrb[1].mxu1  ;;  %v375_v14 = vadd.f32 %v374_v10, %v267_v9 }
 0x1fe   :  { %v378_v13 = vpop.f32.mrb[2].mxu1  ;;  %v377_v17 = vadd.f32 %v376_v12, %v271_v11 }
 0x1ff   :  { %v379_v15 = vadd.f32 %v378_v13, %v267_v9  ;;  %v380_v16 = vpop.f32.mrb[3].mxu1 }
 0x200   :  { %v381_v18 = vadd.f32 %v380_v16, %v271_v11 }
 0x201   :  { %v5878_v19 = vpack.c.bf16 %v379_v15, %v375_v14 }
 0x202   :  { %v5880_v20 = vpack.c.bf16 %v381_v18, %v377_v17 }
 0x203   :  { %434 = vrot.lane.b32.xlu0 %v5878_v19, %s5597_s22 }
 0x204   :  { %v384_v21 = vpop.f32.mrb[4].mxu1 }
 0x205   :  { %v386_v22 = vpop.f32.mrb[5].mxu1  ;;  %v385_v24 = vadd.f32 %v384_v21, %v267_v9 }
 0x206   :  { %v388_v23 = vpop.f32.mrb[6].mxu1  ;;  %v387_v27 = vadd.f32 %v386_v22, %v271_v11 }
 0x207   :  { %v389_v25 = vadd.f32 %v388_v23, %v267_v9  ;;  %v390_v26 = vpop.f32.mrb[7].mxu1 }
 0x208   :  { %v391_v28 = vadd.f32 %v390_v26, %v271_v11 }
 0x209   :  { %v5884_v29 = vpack.c.bf16 %v389_v25, %v385_v24 }
 0x20a   :  { %v5886_v31 = vpack.c.bf16 %v391_v28, %v387_v27  ;;  %v5950_v27 = vld [vmem:[%s7766_s23 + $0x8] sm:$0xff] }
 0x20b   :  { %436 = vrot.lane.b32.xlu0 %v5884_v29, %s5597_s22 }
 0x20c   :  { %v394_v32 = vpop.f32.mrb[8].mxu1 }
 0x20d   :  { %v396_v33 = vpop.f32.mrb[9].mxu1  ;;  %v395_v37 = vadd.f32 %v394_v32, %v267_v9 }
 0x20e   :  { %v398_v34 = vpop.f32.mrb[10].mxu1  ;;  %v397_v40 = vadd.f32 %v396_v33, %v271_v11 }
 0x20f   :  { %v399_v38 = vadd.f32 %v398_v34, %v267_v9  ;;  %v400_v39 = vpop.f32.mrb[11].mxu1 }
 0x210   :  { %v401_v41 = vadd.f32 %v400_v39, %v271_v11  ;;  %v5959_v39 = vld [vmem:[%s7766_s23 + $0x10] sm:$0xff] }
 0x211   :  { %v426_v44 = vpack.c.bf16 %v399_v38, %v395_v37 }
 0x212   :  { %v5890_v45 = vpack.c.bf16 %v401_v41, %v397_v40  ;;  %v5964_v41 = vld [vmem:[%s7766_s23 + $0x18] sm:$0xff] }
 0x213   :  { %438 = vrot.lane.b32.xlu1 %v426_v44, %s5597_s22 }
 0x214   :  { %v404_v46 = vpop.f32.mrb[12].mxu1 }
 0x215   :  { %v406_v47 = vpop.f32.mrb[13].mxu1  ;;  %v405_v51 = vadd.f32 %v404_v46, %v267_v9 }
 0x216   :  { %v408_v48 = vpop.f32.mrb[14].mxu1  ;;  %v407_v54 = vadd.f32 %v406_v47, %v271_v11 }
 0x217   :  { %v409_v52 = vadd.f32 %v408_v48, %v267_v9  ;;  %v410_v53 = vpop.f32.mrb[15].mxu1 }
 0x218   :  { %v411_v55 = vadd.f32 %v410_v53, %v271_v11 }
 0x219   :  { %v5893_v58 = vpack.c.bf16 %v409_v52, %v405_v51 }
 0x21a   :  { %v5895_v59 = vpack.c.bf16 %v411_v55, %v407_v54  ;;  %v5973_v54 = vld [vmem:[%s7766_s23 + $0x20] sm:$0xff] }
 0x21b   :  { %440 = vrot.lane.b32.xlu1 %v5893_v58, %s5597_s22 }
 0x21c   :  { %v414_v60 = vpop.f32.mrb[16].mxu1 }
 0x21d   :  { %v416_v61 = vpop.f32.mrb[17].mxu1  ;;  %v415_v3 = vadd.f32 %v414_v60, %v267_v9  ;;  %v5978_v60 = vld [vmem:[%s7766_s23 + $0x28] sm:$0xff] }
 0x21e   :  { %v417_v62 = vadd.f32 %v416_v61, %v271_v11  ;;  %v418_v2 = vpop.f32.mrb[18].mxu1 }
 0x21f   :  { %v419_v4 = vadd.f32 %v418_v2, %v267_v9  ;;  %664 = vrot.lane.b32.xlu1 %v5884_v29, %s5598_s2  ;;  %v420_v5 = vpop.f32.mrb[19].mxu1 }
 0x220   :  { %v421_v7 = vadd.f32 %v420_v5, %v271_v11 }
 0x221   :  { %v5901_v10 = vpack.c.bf16 %v419_v4, %v415_v3 }
 0x222   :  { %v5903_v12 = vpack.c.bf16 %v421_v7, %v417_v62 }
 0x223   :  { %442 = vrot.lane.b32.xlu0 %v5901_v10, %s5597_s22 }
 0x227   :  { %662 = vrot.lane.b32.xlu0 %v5878_v19, %s5598_s2 }
 0x22b   :  { %666 = vrot.lane.b32.xlu0 %v426_v44, %s5598_s2 }
 0x275   :  { %v435_v13 = vpop.permute.xlu0 %434 }
 0x276   :  { %v460_v9 = vsel %vm154_vm2, %v435_v13, 0  ;;  %v5990_v13 = vld [vmem:[%s7766_s23 + $0x30] sm:$0xff] }
 0x277   :  { %4719 = vmatpush3.bf16.xpose.msra.mxu0 %v460_v9 }
 0x278   :  { %4720 = vmatprep.subr.bf16.mxu0 %v5594_v0 }
 0x27d   :  { %v437_v14 = vpop.permute.xlu0 %436 }
 0x27e   :  { %v463_v11 = vsel %vm154_vm2, %v437_v14, 0  ;;  %v5995_v14 = vld [vmem:[%s7766_s23 + $0x38] sm:$0xff] }
 0x27f   :  { %4721 = vmatpush3.bf16.xpose.msra.mxu0 %v463_v11 }
 0x280   :  { %4722 = vmatprep.subr.bf16.mxu0 %v5594_v0 }
 0x285   :  { %v439_v15 = vpop.permute.xlu1 %438 }
 0x286   :  { %v466_v16 = vsel %vm154_vm2, %v439_v15, 0 }
 0x287   :  { %4723 = vmatpush3.bf16.xpose.msra.mxu0 %v466_v16 }
 0x288   :  { %4724 = vmatprep.subr.bf16.mxu0 %v5594_v0 }
 0x28d   :  { %v441_v17 = vpop.permute.xlu1 %440 }
 0x28e   :  { %v469_v18 = vsel %vm154_vm2, %v441_v17, 0 }
 0x28f   :  { %4725 = vmatpush3.bf16.xpose.msra.mxu0 %v469_v18 }
 0x290   :  { %4726 = vmatprep.subr.bf16.mxu0 %v5594_v0 }
 0x291   :  { %v665_v24 = vpop.permute.xlu1 %664 }
 0x295   :  { %v443_v21 = vpop.permute.xlu0 %442 }
 0x296   :  { %v472_v22 = vsel %vm154_vm2, %v443_v21, 0 }
 0x297   :  { %4727 = vmatpush3.bf16.xpose.msra.mxu0 %v472_v22 }
 0x298   :  { %4778 = vmatprep.subr.bf16.mxu0 %v5594_v0 }
 0x299   :  { %v663_v23 = vpop.permute.xlu0 %662 }
 0x29a   :  { %4749 = vmatpush3.bf16.msra.mxu1 %v663_v23  ;;  %v6007_v23 = vld [vmem:[%s7766_s23 + $0x40] sm:$0xff] }
 0x29b   :  { %4750 = vmatprep.subr.bf16.mxu1 %v5594_v0 }
 0x29d   :  { %v667_v25 = vpop.permute.xlu0 %666 }
 0x29e   :  { %4729 = vmatmul.mubr.msk.bf16.vlgmr.msra.gmra.mrb[20].mxu0 %vm154_vm2, %v5878_v19  ;;  %4751 = vmatpush3.bf16.msra.mxu1 %v665_v24  ;;  %v5945_v19 = vld [vmem:[%s7766_s23] sm:$0xff] }
 0x29f   :  { %4752 = vmatprep.subr.bf16.mxu1 %v5594_v0  ;;  %4732 = vmatprep.mubr.msk.bf16.mxu0 %vm5595_vm0, %v5594_v0 }
 0x2a2   :  { %4753 = vmatpush3.bf16.msra.mxu1 %v667_v25  ;;  %v6012_v25 = vld [vmem:[%s7766_s23 + $0x48] sm:$0xff] }
 0x2a3   :  { %4754 = vmatprep.subr.bf16.mxu1 %v5594_v0 }
 0x2a6   :  { %4733 = vmatmul.mubr.msk.bf16.gmra.mrb[24].mxu0 %vm154_vm2, %v5884_v29 }
 0x2a7   :  { %4736 = vmatprep.mubr.msk.bf16.mxu0 %vm5595_vm0, %v5594_v0 }
 0x2ae   :  { %4737 = vmatmul.mubr.msk.bf16.gmra.mrb[28].mxu0 %vm154_vm2, %v426_v44 }
 0x2af   :  { %4740 = vmatprep.mubr.msk.bf16.mxu0 %vm5595_vm0, %v5594_v0 }
 0x2b6   :  { %4741 = vmatmul.mubr.msk.bf16.gmra.mrb[32].mxu0 %vm154_vm2, %v5893_v58 }
 0x2b7   :  { %4744 = vmatprep.mubr.msk.bf16.mxu0 %vm5595_vm0, %v5594_v0 }
 0x2be   :  { %4745 = vmatmul.mubr.msk.bf16.gmra.mrb[36].mxu0 %vm154_vm2, %v5901_v10 }
 0x2bf   :  { %4784 = vmatprep.mubr.msk.bf16.mxu0 %vm5595_vm0, %v5594_v0 }
 0x371   :  { %v508_v26 = vpop.f32.mrb[20].mxu0 }
 0x372   :  { %v509_v28 = vadd.f32 %v508_v26, %v5945_v19  ;;  %v4730_v29 = vpop.f32.mrb[21].mxu0 }
 0x373   :  { %v511_v32 = vpop.f32.mrb[22].mxu0 }
 0x374   :  { %v512_v33 = vadd.f32 %v511_v32, %v5950_v27  ;;  %v4731_v34 = vpop.f32.mrb[23].mxu0  ;;  %v547_v37 = vsel %vm324_vm3, %v509_v28, -inf }
 0x375   :  { %548 = vmax.xlane.f32.xlu1 %v547_v37 }
 0x376   :  { %v550_v38 = vsel %vm324_vm3, %v512_v33, -inf }
 0x377   :  { %551 = vmax.xlane.f32.xlu0 %v550_v38 }
 0x379   :  { %v516_v40 = vpop.f32.mrb[24].mxu0 }
 0x37a   :  { %v517_v44 = vadd.f32 %v516_v40, %v5959_v39  ;;  %v4734_v46 = vpop.f32.mrb[25].mxu0 }
 0x37b   :  { %v519_v47 = vpop.f32.mrb[26].mxu0 }
 0x37c   :  { %v520_v48 = vadd.f32 %v519_v47, %v5964_v41  ;;  %v4735_v51 = vpop.f32.mrb[27].mxu0  ;;  %v553_v52 = vsel %vm324_vm3, %v517_v44, -inf }
 0x37d   :  { %554 = vmax.xlane.f32.xlu0 %v553_v52 }
 0x37e   :  { %v556_v53 = vsel %vm324_vm3, %v520_v48, -inf }
 0x37f   :  { %557 = vmax.xlane.f32.xlu1 %v556_v53 }
 0x381   :  { %v524_v55 = vpop.f32.mrb[28].mxu0 }
 0x382   :  { %v5981_v61 = vadd.f32 %v524_v55, %v5973_v54  ;;  %v4738_v62 = vpop.f32.mrb[29].mxu0 }
 0x383   :  { %v527_v2 = vpop.f32.mrb[30].mxu0 }
 0x384   :  { %v528_v3 = vadd.f32 %v527_v2, %v5978_v60  ;;  %v4739_v4 = vpop.f32.mrb[31].mxu0  ;;  %v559_v5 = vsel %vm324_vm3, %v5981_v61, -inf }
 0x385   :  { %560 = vmax.xlane.f32.xlu0 %v559_v5 }
 0x386   :  { %v562_v7 = vsel %vm324_vm3, %v528_v3, -inf }
 0x387   :  { %563 = vmax.xlane.f32.xlu1 %v562_v7 }
 0x389   :  { %v532_v9 = vpop.f32.mrb[32].mxu0 }
 0x38a   :  { %v5998_v11 = vadd.f32 %v532_v9, %v5990_v13  ;;  %v4742_v15 = vpop.f32.mrb[33].mxu0 }
 0x38b   :  { %v535_v16 = vpop.f32.mrb[34].mxu0 }
 0x38c   :  { %v536_v17 = vadd.f32 %v535_v16, %v5995_v14  ;;  %v4743_v18 = vpop.f32.mrb[35].mxu0  ;;  %v565_v21 = vsel %vm324_vm3, %v5998_v11, -inf }
 0x38d   :  { %566 = vmax.xlane.f32.xlu0 %v565_v21 }
 0x38e   :  { %v568_v22 = vsel %vm324_vm3, %v536_v17, -inf }
 0x38f   :  { %569 = vmax.xlane.f32.xlu1 %v568_v22 }
 0x391   :  { %v540_v24 = vpop.f32.mrb[36].mxu0 }
 0x392   :  { %v541_v26 = vadd.f32 %v540_v24, %v6007_v23  ;;  %v4746_v29 = vpop.f32.mrb[37].mxu0 }
 0x393   :  { %v543_v32 = vpop.f32.mrb[38].mxu0 }
 0x394   :  { %v544_v34 = vadd.f32 %v543_v32, %v6012_v25  ;;  %v4747_v37 = vpop.f32.mrb[39].mxu0  ;;  %v571_v38 = vsel %vm324_vm3, %v541_v26, -inf }
 0x395   :  { %572 = vmax.xlane.f32.xlu0 %v571_v38 }
 0x396   :  { %v574_v40 = vsel %vm324_vm3, %v544_v34, -inf }
 0x397   :  { %575 = vmax.xlane.f32.xlu1 %v574_v40 }
 0x3a8   :  { %670 = vrot.lane.b32.xlu1 %v5901_v10, %s5598_s2 }
 0x3ab   :  { %668 = vrot.lane.b32.xlu0 %v5893_v58, %s5598_s2 }
 0x402   :  { %v549_v46 = vpop.xlane.xlu1 %548 }
 0x403   :  { %v577_v47 = vsub.f32 %v509_v28, %v549_v46 }
 0x404   :  { %v552_v51 = vpop.xlane.xlu0 %551 }
 0x405   :  { %v587_v52 = vmul.f32 1.442695, %v577_v47  ;;  %v578_v53 = vsub.f32 %v512_v33, %v552_v51 }
 0x407   :  { %5267 = vpow2.f32 %v587_v52  ;;  %v589_v55 = vmul.f32 1.442695, %v578_v53 }
 0x409   :  { %5269 = vpow2.f32 %v589_v55 }
 0x40a   :  { %v555_v62 = vpop.xlane.xlu0 %554 }
 0x40b   :  { %v579_v2 = vsub.f32 %v517_v44, %v555_v62 }
 0x40c   :  { %v558_v4 = vpop.xlane.xlu1 %557 }
 0x40d   :  { %v591_v5 = vmul.f32 1.442695, %v579_v2  ;;  %v580_v7 = vsub.f32 %v520_v48, %v558_v4 }
 0x40f   :  { %5271 = vpow2.f32 %v591_v5  ;;  %v593_v9 = vmul.f32 1.442695, %v580_v7 }
 0x411   :  { %v6022_v15 = vpop.eup %5267  ;;  %5273 = vpow2.f32 %v593_v9 }
 0x412   :  { %v607_v58 = vsel %vm324_vm3, %v6022_v15, 0.0  ;;  %v561_v48 = vpop.xlane.xlu0 %560 }
 0x413   :  { %v6026_v10 = vpop.eup %5269  ;;  %608 = vadd.xlane.f32.xlu0 %v607_v58  ;;  %v581_v4 = vsub.f32 %v5981_v61, %v561_v48 }
 0x414   :  { %v564_v28 = vpop.xlane.xlu1 %563  ;;  %v610_v33 = vsel %vm324_vm3, %v6026_v10, 0.0 }
 0x415   :  { %v582_v16 = vsub.f32 %v528_v3, %v564_v28  ;;  %611 = vadd.xlane.f32.xlu1 %v610_v33  ;;  %v595_v9 = vmul.f32 1.442695, %v581_v4 }
 0x417   :  { %v597_v44 = vmul.f32 1.442695, %v582_v16 }
 0x419   :  { %v6030_v18 = vpop.eup %5271  ;;  %5275 = vpow2.f32 %v597_v44 }
 0x41a   :  { %v613_v21 = vsel %vm324_vm3, %v6030_v18, 0.0  ;;  %v567_v32 = vpop.xlane.xlu0 %566 }
 0x41b   :  { %v6034_v22 = vpop.eup %5273  ;;  %614 = vadd.xlane.f32.xlu1 %v613_v21  ;;  %v583_v58 = vsub.f32 %v5998_v11, %v567_v32  ;;  %v5178_v11 = vld [vmem:[#allocation4] sm:$0xff]   ;;  %v5179_v21 = vld [vmem:[#allocation4 + $0x8] sm:$0xff]  }
 0x41c   :  { %v570_v24 = vpop.xlane.xlu1 %569  ;;  %v616_v37 = vsel %vm324_vm3, %v6034_v22, 0.0  ;;  %4779 = vmatpush3.bf16.msra.mxu0 %v5178_v11 }
 0x41d   :  { %v584_v29 = vsub.f32 %v536_v17, %v570_v24  ;;  %v599_v33 = vmul.f32 1.442695, %v583_v58  ;;  %4780 = vmatprep.subr.bf16.mxu0 %v5594_v0 }
 0x41f   :  { %v601_v38 = vmul.f32 1.442695, %v584_v29  ;;  %617 = vadd.xlane.f32.xlu1 %v616_v37 }
 0x420   :  { %4781 = vmatpush3.bf16.msra.mxu0 %v5179_v21 }
 0x421   :  { %5277 = vpow2.f32 %v601_v38  ;;  %4782 = vmatprep.subr.bf16.mxu0 %v5594_v0 }
 0x422   :  { %v573_v3 = vpop.xlane.xlu0 %572 }
 0x423   :  { %v6038_v40 = vpop.eup %5275  ;;  %v585_v46 = vsub.f32 %v541_v26, %v573_v3 }
 0x424   :  { %v576_v47 = vpop.xlane.xlu1 %575  ;;  %v622_v51 = vsel %vm324_vm3, %v6038_v40, 0.0 }
 0x425   :  { %v603_v52 = vmul.f32 1.442695, %v585_v46  ;;  %v586_v53 = vsub.f32 %v544_v34, %v576_v47  ;;  %623 = vadd.xlane.f32.xlu1 %v622_v51 }
 0x426   :  { %v669_v55 = vpop.permute.xlu0 %668 }
 0x427   :  { %5279 = vpow2.f32 %v603_v52  ;;  %v605_v17 = vmul.f32 1.442695, %v586_v53  ;;  %4755 = vmatpush3.bf16.msra.mxu1 %v669_v55 }
 0x428   :  { %4756 = vmatprep.subr.bf16.mxu1 %v5594_v0  ;;  %v671_v62 = vpop.permute.xlu1 %670 }
 0x429   :  { %5281 = vpow2.f32 %v605_v17  ;;  %907 = vrot.lane.b32.xlu0 %v5880_v20, %s5597_s22 }
 0x42a   :  { %5283 = vpow2.f32 %v595_v9 }
 0x42b   :  { %v6045_v2 = vpop.eup %5277  ;;  %4757 = vmatpush3.bf16.msra.mxu1 %v671_v62  ;;  %5285 = vpow2.f32 %v599_v33 }
 0x42c   :  { %v628_v26 = vsel %vm324_vm3, %v6045_v2, 0.0  ;;  %4804 = vmatprep.subr.bf16.mxu1 %v5594_v0 }
 0x42d   :  { %629 = vadd.xlane.f32.xlu1 %v628_v26 }
 0x431   :  { %v6050_v34 = vpop.eup %5279 }
 0x432   :  { %v631_v5 = vsel %vm324_vm3, %v6050_v34, 0.0 }
 0x433   :  { %v6055_v7 = vpop.eup %5281  ;;  %632 = vadd.xlane.f32.xlu1 %v631_v5 }
 0x434   :  { %v634_v28 = vsel %vm324_vm3, %v6055_v7, 0.0  ;;  %v5284_v16 = vpop.eup %5283 }
 0x435   :  { %v619_v44 = vsel %vm324_vm3, %v5284_v16, 0.0  ;;  %v6061_v61 = vpop.eup %5285 }
 0x436   :  { %v625_v48 = vsel %vm324_vm3, %v6061_v61, 0.0 }
 0x437   :  { %635 = vadd.xlane.f32.xlu1 %v634_v28 }
 0x448   :  { %620 = vadd.xlane.f32.xlu0 %v619_v44  ;;  %909 = vrot.lane.b32.xlu1 %v5886_v31, %s5597_s22 }
 0x44c   :  { %626 = vadd.xlane.f32.xlu0 %v625_v48 }
 0x462   :  { %911 = vrot.lane.b32.xlu0 %v5890_v45, %s5597_s22 }
 0x466   :  { %913 = vrot.lane.b32.xlu0 %v5895_v59, %s5597_s22 }
 0x46a   :  { %915 = vrot.lane.b32.xlu0 %v5903_v12, %s5597_s22 }
 0x4a0   :  { %v609_v24 = vpop.xlane.xlu0 %608 }
 0x4a1   :  { %5287 = vrcp.f32 %v609_v24 }
 0x4a2   :  { %v612_v29 = vpop.xlane.xlu1 %611 }
 0x4a3   :  { %5289 = vrcp.f32 %v612_v29 }
 0x4a4   :  { %v908_v51 = vpop.permute.xlu0 %907 }
 0x4a5   :  { %v933_v53 = vsel %vm154_vm2, %v908_v51, 0 }
 0x4a8   :  { %v615_v32 = vpop.xlane.xlu1 %614 }
 0x4a9   :  { %5291 = vrcp.f32 %v615_v32 }
 0x4ab   :  { %v5288_v37 = vpop.eup %5287 }
 0x4ac   :  { %v618_v38 = vpop.xlane.xlu1 %617  ;;  %v647_v46 = vmul.f32 %v5288_v37, %v6022_v15 }
 0x4ad   :  { %v5290_v3 = vpop.eup %5289  ;;  %5293 = vrcp.f32 %v618_v38 }
 0x4ae   :  { %v648_v47 = vmul.f32 %v5290_v3, %v6026_v10 }
 0x4b0   :  { %v657_v52 = vpack.c.bf16 %v648_v47, %v647_v46 }
 0x4b2   :  { %4759 = vmatmul.mubr.msk.bf16.vlgmr.msra.gmra.mrb[20].mxu1 %vm324_vm3, %v657_v52  ;;  %v624_v62 = vpop.xlane.xlu1 %623 }
 0x4b3   :  { %4805 = vmatpush3.bf16.xpose.msra.mxu1 %v933_v53  ;;  %4762 = vmatprep.mubr.msk.bf16.mxu1 %vm5595_vm0, %v5594_v0  ;;  %v5292_v55 = vpop.eup %5291  ;;  %5295 = vrcp.f32 %v624_v62 }
 0x4b4   :  { %4806 = vmatprep.subr.bf16.mxu1 %v5594_v0  ;;  %v649_v26 = vmul.f32 %v5292_v55, %v6030_v18 }
 0x4b7   :  { %v5294_v17 = vpop.eup %5293 }
 0x4b8   :  { %v650_v15 = vmul.f32 %v5294_v17, %v6034_v22 }
 0x4ba   :  { %v658_v10 = vpack.c.bf16 %v650_v15, %v649_v26  ;;  %v630_v4 = vpop.xlane.xlu1 %629 }
 0x4bc   :  { %4763 = vmatmul.mubr.msk.bf16.gmra.mrb[24].mxu1 %vm324_vm3, %v658_v10 }
 0x4bd   :  { %4766 = vmatprep.mubr.msk.bf16.mxu1 %vm5595_vm0, %v5594_v0  ;;  %v5296_v44 = vpop.eup %5295 }
 0x4be   :  { %v652_v24 = vmul.f32 %v5296_v44, %v6038_v40 }
 0x4c0   :  { %v633_v5 = vpop.xlane.xlu1 %632 }
 0x4c4   :  { %v636_v9 = vpop.xlane.xlu1 %635 }
 0x4c8   :  { %v910_v58 = vpop.permute.xlu1 %909 }
 0x4c9   :  { %v936_v28 = vsel %vm154_vm2, %v910_v58, 0 }
 0x4ca   :  { %4807 = vmatpush3.bf16.xpose.msra.mxu1 %v936_v28 }
 0x4cb   :  { %4808 = vmatprep.subr.bf16.mxu1 %v5594_v0 }
 0x4d5   :  { %v621_v33 = vpop.xlane.xlu0 %620 }
 0x4d6   :  { %5297 = vrcp.f32 %v621_v33 }
 0x4d9   :  { %v627_v18 = vpop.xlane.xlu0 %626 }
 0x4da   :  { %5299 = vrcp.f32 %v627_v18 }
 0x4db   :  { %5301 = vrcp.f32 %v630_v4 }
 0x4dc   :  { %5303 = vrcp.f32 %v636_v9 }
 0x4dd   :  { %v912_v22 = vpop.permute.xlu0 %911  ;;  %5305 = vrcp.f32 %v633_v5 }
 0x4de   :  { %v939_v48 = vsel %vm154_vm2, %v912_v22, 0 }
 0x4df   :  { %4809 = vmatpush3.bf16.xpose.msra.mxu1 %v939_v48 }
 0x4e0   :  { %v5298_v11 = vpop.eup %5297  ;;  %4810 = vmatprep.subr.bf16.mxu1 %v5594_v0 }
 0x4e1   :  { %v651_v21 = vmul.f32 %v5298_v11, %v5284_v16  ;;  %v914_v29 = vpop.permute.xlu0 %913 }
 0x4e2   :  { %v942_v3 = vsel %vm154_vm2, %v914_v29, 0 }
 0x4e3   :  { %v659_v32 = vpack.c.bf16 %v652_v24, %v651_v21 }
 0x4e4   :  { %v5300_v37 = vpop.eup %5299 }
 0x4e5   :  { %4767 = vmatmul.mubr.msk.bf16.gmra.mrb[28].mxu1 %vm324_vm3, %v659_v32  ;;  %v5302_v38 = vpop.eup %5301  ;;  %v653_v46 = vmul.f32 %v5300_v37, %v6061_v61  ;;  %v916_v16 = vpop.permute.xlu0 %915 }
 0x4e6   :  { %4770 = vmatprep.mubr.msk.bf16.mxu1 %vm5595_vm0, %v5594_v0  ;;  %v654_v40 = vmul.f32 %v5302_v38, %v6045_v2  ;;  %v5304_v51 = vpop.eup %5303  ;;  %v945_v53 = vsel %vm154_vm2, %v916_v16, 0  ;;  %v5180_v2 = vld [vmem:[#allocation4 + $0x10] ss:$0 sps:$4 sm:$0xff]  }
 0x4e7   :  { %4811 = vmatpush3.bf16.xpose.msra.mxu1 %v942_v3  ;;  %v5306_v52 = vpop.eup %5305  ;;  %v656_v55 = vmul.f32 %v5304_v51, %v6055_v7 }
 0x4e8   :  { %4812 = vmatprep.subr.bf16.mxu1 %v5594_v0  ;;  %v660_v47 = vpack.c.bf16 %v654_v40, %v653_v46  ;;  %v655_v61 = vmul.f32 %v5306_v52, %v6050_v34  ;;  %v806_v34 = vsel %vm170_vm1, %v5180_v2, 0 }
 0x4e9   :  { %4783 = vmatpush3.bf16.msra.mxu0 %v806_v34 }
 0x4ea   :  { %v661_v17 = vpack.c.bf16 %v656_v55, %v655_v61  ;;  %4834 = vmatprep.subr.bf16.mxu0 %v5594_v0 }
 0x4ed   :  { %4771 = vmatmul.mubr.msk.bf16.gmra.mrb[32].mxu1 %vm324_vm3, %v660_v47 }
 0x4ee   :  { %4774 = vmatprep.mubr.msk.bf16.mxu1 %vm5595_vm0, %v5594_v0 }
 0x4ef   :  { %4813 = vmatpush3.bf16.xpose.msra.mxu1 %v945_v53 }
 0x4f0   :  { %4864 = vmatprep.subr.bf16.mxu1 %v5594_v0 }
 0x4f5   :  { %4775 = vmatmul.mubr.msk.bf16.gmra.mrb[36].mxu1 %vm324_vm3, %v661_v17 }
 0x4f6   :  { %4814 = vmatprep.mubr.msk.bf16.mxu1 %vm5595_vm0, %v5594_v0 }
 0x4fd   :  { %4815 = vmatmul.mubr.msk.bf16.vlgmr.msra.gmra.mrb[40].mxu1 %vm154_vm2, %v5880_v20 }
 0x4fe   :  { %4818 = vmatprep.mubr.msk.bf16.mxu1 %vm5595_vm0, %v5594_v0 }
 0x505   :  { %4819 = vmatmul.mubr.msk.bf16.gmra.mrb[44].mxu1 %vm154_vm2, %v5886_v31 }
 0x506   :  { %4822 = vmatprep.mubr.msk.bf16.mxu1 %vm5595_vm0, %v5594_v0 }
 0x50d   :  { %4823 = vmatmul.mubr.msk.bf16.gmra.mrb[48].mxu1 %vm154_vm2, %v5890_v45 }
 0x50e   :  { %4826 = vmatprep.mubr.msk.bf16.mxu1 %vm5595_vm0, %v5594_v0 }
 0x515   :  { %4827 = vmatmul.mubr.msk.bf16.gmra.mrb[52].mxu1 %vm154_vm2, %v5895_v59 }
 0x516   :  { %4830 = vmatprep.mubr.msk.bf16.mxu1 %vm5595_vm0, %v5594_v0 }
 0x51d   :  { %4831 = vmatmul.mubr.msk.bf16.gmra.mrb[56].mxu1 %vm154_vm2, %v5903_v12 }
 0x51e   :  { %4870 = vmatprep.mubr.msk.bf16.mxu1 %vm5595_vm0, %v5594_v0 }
 0x585   :  { %v726_v7 = vpop.f32.mrb[20].mxu1 }
 0x586   :  { %v4760_v62 = vpop.f32.mrb[21].mxu1 }
 0x587   :  { %v729_v26 = vpop.f32.mrb[22].mxu1 }
 0x588   :  { %v765_v15 = vpack.c.bf16 %v729_v26, %v726_v7  ;;  %v4761_v10 = vpop.f32.mrb[23].mxu1 }
 0x58a   :  { %4785 = vmatmul.mubr.msk.bf16.vlgmr.msra.gmra.mrb[40].mxu0 %vm154_vm2, %v765_v15 }
 0x58b   :  { %4788 = vmatprep.mubr.msk.bf16.mxu0 %vm5595_vm0, %v5594_v0 }
 0x58f   :  { %v734_v4 = vpop.f32.mrb[24].mxu1 }
 0x590   :  { %v4764_v5 = vpop.f32.mrb[25].mxu1 }
 0x591   :  { %v737_v9 = vpop.f32.mrb[26].mxu1 }
 0x592   :  { %v766_v58 = vpack.c.bf16 %v737_v9, %v734_v4  ;;  %v4765_v28 = vpop.f32.mrb[27].mxu1 }
 0x594   :  { %4789 = vmatmul.mubr.msk.bf16.gmra.mrb[44].mxu0 %vm154_vm2, %v766_v58 }
 0x595   :  { %4792 = vmatprep.mubr.msk.bf16.mxu0 %vm5595_vm0, %v5594_v0 }
 0x5b8   :  { %v742_v33 = vpop.f32.mrb[28].mxu1 }
 0x5b9   :  { %v4768_v18 = vpop.f32.mrb[29].mxu1 }
 0x5ba   :  { %v745_v22 = vpop.f32.mrb[30].mxu1 }
 0x5bb   :  { %v767_v44 = vpack.c.bf16 %v745_v22, %v742_v33  ;;  %v4769_v48 = vpop.f32.mrb[31].mxu1 }
 0x5bd   :  { %4793 = vmatmul.mubr.msk.bf16.gmra.mrb[48].mxu0 %vm154_vm2, %v767_v44 }
 0x5be   :  { %4796 = vmatprep.mubr.msk.bf16.mxu0 %vm5595_vm0, %v5594_v0 }
 0x5c0   :  { %v750_v11 = vpop.f32.mrb[32].mxu1 }
 0x5c1   :  { %v4772_v21 = vpop.f32.mrb[33].mxu1 }
 0x5c2   :  { %v753_v24 = vpop.f32.mrb[34].mxu1 }
 0x5c3   :  { %v768_v29 = vpack.c.bf16 %v753_v24, %v750_v11  ;;  %v4773_v32 = vpop.f32.mrb[35].mxu1 }
 0x5c5   :  { %4797 = vmatmul.mubr.msk.bf16.gmra.mrb[52].mxu0 %vm154_vm2, %v768_v29 }
 0x5c6   :  { %4800 = vmatprep.mubr.msk.bf16.mxu0 %vm5595_vm0, %v5594_v0 }
 0x5c8   :  { %v758_v37 = vpop.f32.mrb[36].mxu1 }
 0x5c9   :  { %v4776_v38 = vpop.f32.mrb[37].mxu1 }
 0x5ca   :  { %v761_v3 = vpop.f32.mrb[38].mxu1 }
 0x5cb   :  { %v769_v46 = vpack.c.bf16 %v761_v3, %v758_v37  ;;  %v4777_v40 = vpop.f32.mrb[39].mxu1 }
 0x5cd   :  { %4801 = vmatmul.mubr.msk.bf16.gmra.mrb[56].mxu0 %vm154_vm2, %v769_v46 }
 0x5ce   :  { %4844 = vmatprep.mubr.msk.bf16.mxu0 %vm5595_vm0, %v5594_v0 }
 0x5d0   :  { %v981_v16 = vpop.f32.mrb[40].mxu1 }
 0x5d1   :  { %v982_v47 = vadd.f32 %v981_v16, %v5945_v19  ;;  %v4816_v51 = vpop.f32.mrb[41].mxu1 }
 0x5d2   :  { %v984_v52 = vpop.f32.mrb[42].mxu1 }
 0x5d3   :  { %v985_v53 = vadd.f32 %v984_v52, %v5950_v27  ;;  %v4817_v55 = vpop.f32.mrb[43].mxu1  ;;  %v1020_v61 = vsel %vm324_vm3, %v982_v47, -inf }
 0x5d4   :  { %1021 = vmax.xlane.f32.xlu1 %v1020_v61 }
 0x5d5   :  { %v1023_v17 = vsel %vm324_vm3, %v985_v53, -inf }
 0x5d6   :  { %1024 = vmax.xlane.f32.xlu0 %v1023_v17 }
 0x5d8   :  { %v989_v2 = vpop.f32.mrb[44].mxu1 }
 0x5d9   :  { %v4820_v34 = vpop.f32.mrb[45].mxu1 }
 0x5da   :  { %v992_v7 = vpop.f32.mrb[46].mxu1 }
 0x5db   :  { %v993_v62 = vadd.f32 %v992_v7, %v5964_v41  ;;  %v4821_v26 = vpop.f32.mrb[47].mxu1 }
 0x5dd   :  { %v1029_v15 = vsel %vm324_vm3, %v993_v62, -inf }
 0x5de   :  { %1030 = vmax.xlane.f32.xlu1 %v1029_v15 }
 0x5e0   :  { %v997_v19 = vpop.f32.mrb[48].mxu1 }
 0x5e1   :  { %v4824_v10 = vpop.f32.mrb[49].mxu1 }
 0x5e2   :  { %v1000_v4 = vpop.f32.mrb[50].mxu1 }
 0x5e3   :  { %v6153_v27 = vadd.f32 %v1000_v4, %v5978_v60  ;;  %v4825_v5 = vpop.f32.mrb[51].mxu1 }
 0x5e5   :  { %v1035_v9 = vsel %vm324_vm3, %v6153_v27, -inf }
 0x5e6   :  { %1036 = vmax.xlane.f32.xlu1 %v1035_v9 }
 0x5e8   :  { %v1005_v58 = vpop.f32.mrb[52].mxu1 }
 0x5e9   :  { %v4828_v28 = vpop.f32.mrb[53].mxu1 }
 0x5ea   :  { %v1008_v33 = vpop.f32.mrb[54].mxu1 }
 0x5eb   :  { %v6158_v41 = vadd.f32 %v1008_v33, %v5995_v14  ;;  %v4829_v18 = vpop.f32.mrb[55].mxu1  ;;  %v6170_v14 = vadd.f32 %v989_v2, %v5959_v39 }
 0x5ec   :  { %1135 = vrot.lane.b32.xlu0 %v5880_v20, %s5598_s2  ;;  %v6175_v20 = vadd.f32 %v997_v19, %v5973_v54 }
 0x5ed   :  { %v1041_v22 = vsel %vm324_vm3, %v6158_v41, -inf  ;;  %v1026_v29 = vsel %vm324_vm3, %v6170_v14, -inf }
 0x5ee   :  { %1042 = vmax.xlane.f32.xlu1 %v1041_v22  ;;  %v1032_v32 = vsel %vm324_vm3, %v6175_v20, -inf }
 0x5f0   :  { %v1013_v60 = vpop.f32.mrb[56].mxu1 }
 0x5f1   :  { %v4832_v44 = vpop.f32.mrb[57].mxu1  ;;  %v6185_v39 = vadd.f32 %v1013_v60, %v6007_v23 }
 0x5f2   :  { %v1016_v48 = vpop.f32.mrb[58].mxu1 }
 0x5f3   :  { %v6165_v11 = vadd.f32 %v1016_v48, %v6012_v25  ;;  %v4833_v21 = vpop.f32.mrb[59].mxu1  ;;  %v6180_v25 = vadd.f32 %v1005_v58, %v5990_v13  ;;  %v1044_v54 = vsel %vm324_vm3, %v6185_v39, -inf }
 0x5f5   :  { %v1047_v24 = vsel %vm324_vm3, %v6165_v11, -inf }
 0x5f6   :  { %1048 = vmax.xlane.f32.xlu1 %v1047_v24 }
 0x607   :  { %1137 = vrot.lane.b32.xlu1 %v5886_v31, %s5598_s2  ;;  %v1038_v31 = vsel %vm324_vm3, %v6180_v25, -inf }
 0x60b   :  { %1027 = vmax.xlane.f32.xlu0 %v1026_v29 }
 0x60f   :  { %1033 = vmax.xlane.f32.xlu0 %v1032_v32 }
 0x613   :  { %1039 = vmax.xlane.f32.xlu0 %v1038_v31 }
 0x617   :  { %1045 = vmax.xlane.f32.xlu0 %v1044_v54 }
 0x62d   :  { %1139 = vrot.lane.b32.xlu0 %v5890_v45, %s5598_s2 }
 0x65d   :  { %v6193_v13 = vpop.f32.mrb[40].mxu0 }
 0x65e   :  { %v4786_v37 = vpop.f32.mrb[41].mxu0 }
 0x65f   :  { %v6195_v38 = vpop.f32.mrb[42].mxu0 }
 0x660   :  { %v4787_v3 = vpop.f32.mrb[43].mxu0 }
 0x661   :  { %v1022_v46 = vpop.xlane.xlu1 %1021 }
 0x662   :  { %v1050_v23 = vsub.f32 %v982_v47, %v1022_v46 }
 0x663   :  { %v1025_v40 = vpop.xlane.xlu0 %1024 }
 0x664   :  { %v1060_v16 = vmul.f32 1.442695, %v1050_v23  ;;  %v1051_v51 = vsub.f32 %v985_v53, %v1025_v40 }
 0x666   :  { %5307 = vpow2.f32 %v1060_v16  ;;  %v1062_v52 = vmul.f32 1.442695, %v1051_v51 }
 0x667   :  { %v6197_v55 = vpop.f32.mrb[44].mxu0  ;;  %v1136_v61 = vpop.permute.xlu0 %1135 }
 0x668   :  { %5309 = vpow2.f32 %v1062_v52  ;;  %v4790_v17 = vpop.f32.mrb[45].mxu0  ;;  %4835 = vmatpush3.bf16.msra.mxu0 %v1136_v61 }
 0x669   :  { %v6199_v45 = vpop.f32.mrb[46].mxu0  ;;  %4836 = vmatprep.subr.bf16.mxu0 %v5594_v0 }
 0x66a   :  { %v4791_v2 = vpop.f32.mrb[47].mxu0 }
 0x66b   :  { %v1031_v34 = vpop.xlane.xlu1 %1030 }
 0x66c   :  { %v1053_v7 = vsub.f32 %v993_v62, %v1031_v34 }
 0x66e   :  { %v1066_v26 = vmul.f32 1.442695, %v1053_v7 }
 0x670   :  { %v6202_v47 = vpop.eup %5307  ;;  %5311 = vpow2.f32 %v1066_v26 }
 0x671   :  { %v1080_v53 = vsel %vm324_vm3, %v6202_v47, 0.0 }
 0x672   :  { %v6206_v15 = vpop.eup %5309  ;;  %1081 = vadd.xlane.f32.xlu0 %v1080_v53 }
 0x673   :  { %v1083_v19 = vsel %vm324_vm3, %v6206_v15, 0.0  ;;  %v1037_v4 = vpop.xlane.xlu1 %1036 }
 0x674   :  { %1084 = vadd.xlane.f32.xlu1 %v1083_v19  ;;  %v1055_v60 = vsub.f32 %v6153_v27, %v1037_v4 }
 0x676   :  { %v1070_v32 = vmul.f32 1.442695, %v1055_v60 }
 0x67a   :  { %v6210_v10 = vpop.eup %5311 }
 0x67b   :  { %v1089_v62 = vsel %vm324_vm3, %v6210_v10, 0.0  ;;  %v1043_v5 = vpop.xlane.xlu1 %1042 }
 0x67c   :  { %1090 = vadd.xlane.f32.xlu1 %v1089_v62  ;;  %v1057_v31 = vsub.f32 %v6158_v41, %v1043_v5 }
 0x67e   :  { %v1074_v23 = vmul.f32 1.442695, %v1057_v31 }
 0x683   :  { %v1049_v9 = vpop.xlane.xlu1 %1048 }
 0x687   :  { %v1138_v58 = vpop.permute.xlu1 %1137 }
 0x688   :  { %4837 = vmatpush3.bf16.msra.mxu0 %v1138_v58  ;;  %v1059_v58 = vsub.f32 %v6165_v11, %v1049_v9  ;;  %v5182_v9 = vld [vmem:[#allocation4 + $0x1c] sm:$0xff]  }
 0x689   :  { %4838 = vmatprep.subr.bf16.mxu0 %v5594_v0 }
 0x690   :  { %v6215_v28 = vpop.f32.mrb[48].mxu0 }
 0x691   :  { %v4794_v33 = vpop.f32.mrb[49].mxu0 }
 0x692   :  { %v6217_v18 = vpop.f32.mrb[50].mxu0 }
 0x693   :  { %v4795_v22 = vpop.f32.mrb[51].mxu0 }
 0x694   :  { %v1078_v22 = vmul.f32 1.442695, %v1059_v58 }
 0x698   :  { %v6220_v44 = vpop.f32.mrb[52].mxu0  ;;  %v1028_v48 = vpop.xlane.xlu0 %1027 }
 0x699   :  { %v1052_v21 = vsub.f32 %v6170_v14, %v1028_v48  ;;  %v4798_v24 = vpop.f32.mrb[53].mxu0 }
 0x69a   :  { %v6223_v29 = vpop.f32.mrb[54].mxu0 }
 0x69b   :  { %v1064_v54 = vmul.f32 1.442695, %v1052_v21  ;;  %v4799_v37 = vpop.f32.mrb[55].mxu0 }
 0x69c   :  { %v1034_v3 = vpop.xlane.xlu0 %1033 }
 0x69d   :  { %5313 = vpow2.f32 %v1064_v54  ;;  %v1054_v46 = vsub.f32 %v6175_v20, %v1034_v3 }
 0x69e   :  { %5315 = vpow2.f32 %v1070_v32 }
 0x69f   :  { %v1068_v27 = vmul.f32 1.442695, %v1054_v46 }
 0x6a0   :  { %v6227_v40 = vpop.f32.mrb[56].mxu0  ;;  %v1040_v16 = vpop.xlane.xlu0 %1039 }
 0x6a1   :  { %5317 = vpow2.f32 %v1068_v27  ;;  %v4802_v14 = vpop.f32.mrb[57].mxu0  ;;  %v1056_v4 = vsub.f32 %v6180_v25, %v1040_v16 }
 0x6a2   :  { %v6229_v51 = vpop.f32.mrb[58].mxu0  ;;  %5319 = vpow2.f32 %v1074_v23 }
 0x6a3   :  { %v4803_v52 = vpop.f32.mrb[59].mxu0  ;;  %v1072_v62 = vmul.f32 1.442695, %v1056_v4 }
 0x6a4   :  { %v1046_v61 = vpop.xlane.xlu0 %1045 }
 0x6a5   :  { %v1058_v5 = vsub.f32 %v6185_v39, %v1046_v61  ;;  %5321 = vpow2.f32 %v1072_v62  ;;  %v5181_v39 = vld [vmem:[#allocation4 + $0x14] sm:$0xff]  }
 0x6a6   :  { %4865 = vmatpush3.bf16.msra.mxu1 %v5181_v39 }
 0x6a7   :  { %v6231_v41 = vpop.eup %5313  ;;  %v1076_v33 = vmul.f32 1.442695, %v1058_v5  ;;  %4866 = vmatprep.subr.bf16.mxu1 %v5594_v0 }
 0x6a8   :  { %v1140_v17 = vpop.permute.xlu0 %1139  ;;  %v1086_v2 = vsel %vm324_vm3, %v6231_v41, 0.0  ;;  %v6235_v20 = vpop.eup %5315 }
 0x6a9   :  { %1087 = vadd.xlane.f32.xlu0 %v1086_v2  ;;  %4839 = vmatpush3.bf16.msra.mxu0 %v1140_v17  ;;  %v1095_v7 = vsel %vm324_vm3, %v6235_v20, 0.0  ;;  %5323 = vpow2.f32 %v1076_v33 }
 0x6aa   :  { %4840 = vmatprep.subr.bf16.mxu0 %v5594_v0  ;;  %5325 = vpow2.f32 %v1078_v22  ;;  %4867 = vmatpush3.bf16.msra.mxu1 %v5182_v9 }
 0x6ab   :  { %v6238_v34 = vpop.eup %5317  ;;  %4868 = vmatprep.subr.bf16.mxu1 %v5594_v0 }
 0x6ac   :  { %v1092_v26 = vsel %vm324_vm3, %v6238_v34, 0.0  ;;  %v6244_v53 = vpop.eup %5319 }
 0x6ad   :  { %1096 = vadd.xlane.f32.xlu0 %v1095_v7  ;;  %1093 = vadd.xlane.f32.xlu1 %v1092_v26  ;;  %v1101_v19 = vsel %vm324_vm3, %v6244_v53, 0.0 }
 0x6af   :  { %v6255_v60 = vpop.eup %5321 }
 0x6b1   :  { %1102 = vadd.xlane.f32.xlu0 %v1101_v19 }
 0x6b3   :  { %v6259_v48 = vpop.eup %5323 }
 0x6b4   :  { %v6263_v25 = vpop.eup %5325 }
 0x6b5   :  { %v1107_v11 = vsel %vm324_vm3, %v6263_v25, 0.0 }
 0x6be   :  { %1141 = vrot.lane.b32.xlu1 %v5895_v59, %s5598_s2  ;;  %v1098_v59 = vsel %vm324_vm3, %v6255_v60, 0.0 }
 0x6c7   :  { %1143 = vrot.lane.b32.xlu0 %v5903_v12, %s5598_s2  ;;  %v1104_v12 = vsel %vm324_vm3, %v6259_v48, 0.0 }
 0x6e2   :  { %1099 = vadd.xlane.f32.xlu1 %v1098_v59 }
 0x6e6   :  { %1105 = vadd.xlane.f32.xlu1 %v1104_v12 }
 0x6ea   :  { %1108 = vadd.xlane.f32.xlu1 %v1107_v11 }
 0x6ff   :  { %v1082_v24 = vpop.xlane.xlu0 %1081 }
 0x701   :  { %v1085_v21 = vpop.xlane.xlu1 %1084 }
 0x702   :  { %5327 = vrcp.f32 %v1085_v21 }
 0x703   :  { %5329 = vrcp.f32 %v1082_v24 }
 0x709   :  { %v1091_v32 = vpop.xlane.xlu1 %1090 }
 0x70c   :  { %v5328_v3 = vpop.eup %5327 }
 0x70d   :  { %v5330_v27 = vpop.eup %5329  ;;  %v1121_v16 = vmul.f32 %v5328_v3, %v6206_v15 }
 0x70e   :  { %v1120_v14 = vmul.f32 %v5330_v27, %v6202_v47 }
 0x710   :  { %v1130_v61 = vpack.c.bf16 %v1121_v16, %v1120_v14 }
 0x736   :  { %v1088_v31 = vpop.xlane.xlu0 %1087 }
 0x737   :  { %5331 = vrcp.f32 %v1088_v31 }
 0x738   :  { %5333 = vrcp.f32 %v1091_v32 }
 0x73a   :  { %v1097_v54 = vpop.xlane.xlu0 %1096  ;;  %v1094_v37 = vpop.xlane.xlu1 %1093 }
 0x73b   :  { %5335 = vrcp.f32 %v1097_v54 }
 0x73c   :  { %5337 = vrcp.f32 %v1094_v37 }
 0x73e   :  { %v1103_v46 = vpop.xlane.xlu0 %1102  ;;  %v1142_v23 = vpop.permute.xlu1 %1141 }
 0x73f   :  { %4841 = vmatpush3.bf16.msra.mxu0 %v1142_v23  ;;  %5339 = vrcp.f32 %v1103_v46 }
 0x740   :  { %4842 = vmatprep.subr.bf16.mxu0 %v5594_v0 }
 0x741   :  { %v5332_v17 = vpop.eup %5331 }
 0x742   :  { %v1144_v52 = vpop.permute.xlu0 %1143  ;;  %v5334_v2 = vpop.eup %5333  ;;  %v1122_v7 = vmul.f32 %v5332_v17, %v6231_v41 }
 0x743   :  { %4843 = vmatpush3.bf16.msra.mxu0 %v1144_v52  ;;  %v1123_v15 = vmul.f32 %v5334_v2, %v6210_v10 }
 0x745   :  { %v5336_v26 = vpop.eup %5335  ;;  %v1131_v19 = vpack.c.bf16 %v1123_v15, %v1122_v7 }
 0x746   :  { %4845 = vmatmul.mubr.msk.bf16.vlgmr.msra.gmra.mrb[60].mxu0 %vm324_vm3, %v1130_v61  ;;  %v5338_v4 = vpop.eup %5337  ;;  %v1125_v62 = vmul.f32 %v5336_v26, %v6235_v20 }
 0x747   :  { %4848 = vmatprep.mubr.msk.bf16.mxu0 %vm5595_vm0, %v5594_v0  ;;  %v1124_v47 = vmul.f32 %v5338_v4, %v6238_v34 }
 0x749   :  { %v1132_v5 = vpack.c.bf16 %v1125_v62, %v1124_v47  ;;  %v5340_v33 = vpop.eup %5339 }
 0x74a   :  { %v1127_v34 = vmul.f32 %v5340_v33, %v6244_v53 }
 0x74e   :  { %4849 = vmatmul.mubr.msk.bf16.gmra.mrb[64].mxu0 %vm324_vm3, %v1131_v19 }
 0x74f   :  { %4852 = vmatprep.mubr.msk.bf16.mxu0 %vm5595_vm0, %v5594_v0 }
 0x756   :  { %4853 = vmatmul.mubr.msk.bf16.gmra.mrb[68].mxu0 %vm324_vm3, %v1132_v5 }
 0x757   :  { %4856 = vmatprep.mubr.msk.bf16.mxu0 %vm5595_vm0, %v5594_v0 }
 0x76f   :  { %v1100_v10 = vpop.xlane.xlu1 %1099 }
 0x770   :  { %5341 = vrcp.f32 %v1100_v10  ;;  %v4248_v10 = vld [vmem:[%s7742_s8] ss:$0 sm:$0xff] }
 0x771   :  { %v888_v33 = vadd.f32 %v4248_v10, %v6195_v38  ;;  %v890_v38 = vadd.f32 %v4248_v10, %v6199_v45 }
 0x773   :  { %v1106_v41 = vpop.xlane.xlu1 %1105 }
 0x774   :  { %5343 = vrcp.f32 %v1106_v41  ;;  %v887_v41 = vadd.f32 %v4248_v10, %v6193_v13  ;;  %v889_v13 = vadd.f32 %v4248_v10, %v6197_v55  ;;  %v891_v55 = vadd.f32 %v4248_v10, %v6215_v28 }
 0x777   :  { %v1109_v58 = vpop.xlane.xlu1 %1108 }
 0x778   :  { %5345 = vrcp.f32 %v1109_v58 }
 0x77a   :  { %v5342_v22 = vpop.eup %5341 }
 0x77b   :  { %v1126_v59 = vmul.f32 %v5342_v22, %v6255_v60  ;;  %v5183_v60 = vld [vmem:[#allocation4 + $0x24] ss:$0 sps:$4 sm:$0xff]  }
 0x77c   :  { %v1280_v53 = vsel %vm170_vm1, %v5183_v60, 0 }
 0x77d   :  { %v1133_v20 = vpack.c.bf16 %v1127_v34, %v1126_v59  ;;  %4869 = vmatpush3.bf16.msra.mxu1 %v1280_v53 }
 0x77e   :  { %v5344_v12 = vpop.eup %5343 }
 0x77f   :  { %4857 = vmatmul.mubr.msk.bf16.gmra.mrb[72].mxu0 %vm324_vm3, %v1133_v20  ;;  %v1128_v39 = vmul.f32 %v5344_v12, %v6259_v48 }
 0x780   :  { %4860 = vmatprep.mubr.msk.bf16.mxu0 %vm5595_vm0, %v5594_v0 }
 0x782   :  { %v5346_v11 = vpop.eup %5345 }
 0x783   :  { %v1129_v9 = vmul.f32 %v5346_v11, %v6263_v25 }
 0x785   :  { %v1134_v21 = vpack.c.bf16 %v1129_v9, %v1128_v39 }
 0x787   :  { %4861 = vmatmul.mubr.msk.bf16.gmra.mrb[76].mxu0 %vm324_vm3, %v1134_v21 }
 0x788   :  { %1664 = vmatprep.mubr.bf16.mxu0 %v5596_v30 }
 0x819   :  { %v1199_v24 = vpop.f32.mrb[60].mxu0 }
 0x81a   :  { %v4846_v32 = vpop.f32.mrb[61].mxu0 }
 0x81b   :  { %v1202_v31 = vpop.f32.mrb[62].mxu0 }
 0x81c   :  { %v1238_v54 = vpack.c.bf16 %v1202_v31, %v1199_v24  ;;  %v4847_v37 = vpop.f32.mrb[63].mxu0 }
 0x81e   :  { %4871 = vmatmul.mubr.msk.bf16.vlgmr.msra.gmra.mrb[60].mxu1 %vm154_vm2, %v1238_v54 }
 0x81f   :  { %4874 = vmatprep.mubr.msk.bf16.mxu1 %vm5595_vm0, %v5594_v0 }
 0x821   :  { %v1207_v48 = vpop.f32.mrb[64].mxu0 }
 0x822   :  { %v4850_v25 = vpop.f32.mrb[65].mxu0 }
 0x823   :  { %v1210_v3 = vpop.f32.mrb[66].mxu0 }
 0x824   :  { %v1239_v46 = vpack.c.bf16 %v1210_v3, %v1207_v48  ;;  %v4851_v23 = vpop.f32.mrb[67].mxu0  ;;  %v892_v48 = vadd.f32 %v4248_v10, %v6217_v18  ;;  %v893_v18 = vadd.f32 %v4248_v10, %v6220_v44  ;;  %v895_v44 = vadd.f32 %v4248_v10, %v6227_v40 }
 0x826   :  { %4875 = vmatmul.mubr.msk.bf16.gmra.mrb[64].mxu1 %vm154_vm2, %v1239_v46 }
 0x827   :  { %4878 = vmatprep.mubr.msk.bf16.mxu1 %vm5595_vm0, %v5594_v0 }
 0x829   :  { %v1215_v27 = vpop.f32.mrb[68].mxu0 }
 0x82a   :  { %v4854_v16 = vpop.f32.mrb[69].mxu0 }
 0x82b   :  { %v1218_v14 = vpop.f32.mrb[70].mxu0 }
 0x82c   :  { %v1240_v52 = vpack.c.bf16 %v1218_v14, %v1215_v27  ;;  %v4855_v61 = vpop.f32.mrb[71].mxu0 }
 0x82d   :  { %v894_v61 = vadd.f32 %v4248_v10, %v6223_v29  ;;  %v896_v29 = vadd.f32 %v4248_v10, %v6229_v51 }
 0x82e   :  { %4879 = vmatmul.mubr.msk.bf16.gmra.mrb[68].mxu1 %vm154_vm2, %v1240_v52 }
 0x82f   :  { %4882 = vmatprep.mubr.msk.bf16.mxu1 %vm5595_vm0, %v5594_v0 }
 0x852   :  { %v1223_v17 = vpop.f32.mrb[72].mxu0 }
 0x853   :  { %v4858_v2 = vpop.f32.mrb[73].mxu0 }
 0x854   :  { %v1226_v7 = vpop.f32.mrb[74].mxu0 }
 0x855   :  { %v1241_v15 = vpack.c.bf16 %v1226_v7, %v1223_v17  ;;  %v4859_v26 = vpop.f32.mrb[75].mxu0 }
 0x857   :  { %4883 = vmatmul.mubr.msk.bf16.gmra.mrb[72].mxu1 %vm154_vm2, %v1241_v15 }
 0x858   :  { %4886 = vmatprep.mubr.msk.bf16.mxu1 %vm5595_vm0, %v5594_v0 }
 0x85a   :  { %v1231_v19 = vpop.f32.mrb[76].mxu0 }
 0x85b   :  { %v4862_v4 = vpop.f32.mrb[77].mxu0 }
 0x85c   :  { %v1234_v47 = vpop.f32.mrb[78].mxu0 }
 0x85d   :  { %v1242_v62 = vpack.c.bf16 %v1234_v47, %v1231_v19  ;;  %v4863_v5 = vpop.f32.mrb[79].mxu0 }
 0x85f   :  { %4887 = vmatmul.mubr.msk.bf16.gmra.mrb[76].mxu1 %vm154_vm2, %v1242_v62 }
 0x8f1   :  { %v1316_v58 = vpop.f32.mrb[60].mxu1 }
 0x8f2   :  { %v1355_v22 = vadd.f32 %v1316_v58, %v887_v41  ;;  %v4872_v59 = vpop.f32.mrb[61].mxu1 }
 0x8f3   :  { %v1319_v34 = vpop.f32.mrb[62].mxu1 }
 0x8f4   :  { %v1356_v20 = vadd.f32 %v1319_v34, %v888_v33  ;;  %v4873_v12 = vpop.f32.mrb[63].mxu1  ;;  %v6314_v11 = vadd.f32 %v1355_v22, %v5828_v35 }
 0x8f6   :  { %v1377_v39 = vsel %vm324_vm3, %v6314_v11, 0.0  ;;  %v6319_v9 = vadd.f32 %v1356_v20, %v5830_v36 }
 0x8f7   :  { %1378 = vadd.xlane.f32.xlu1 %v1377_v39 }
 0x8f8   :  { %v1380_v24 = vsel %vm324_vm3, %v6319_v9, 0.0 }
 0x8f9   :  { %v1324_v21 = vpop.f32.mrb[64].mxu1 }
 0x8fa   :  { %v1357_v60 = vadd.f32 %v1324_v21, %v889_v13  ;;  %v4876_v53 = vpop.f32.mrb[65].mxu1 }
 0x8fb   :  { %1381 = vadd.xlane.f32.xlu1 %v1380_v24  ;;  %v1327_v35 = vpop.f32.mrb[66].mxu1 }
 0x8fc   :  { %v1358_v32 = vadd.f32 %v1327_v35, %v890_v38  ;;  %v4877_v31 = vpop.f32.mrb[67].mxu1  ;;  %v1367_v54 = vadd.f32 %v1357_v60, %v5836_v42 }
 0x8fe   :  { %v1383_v36 = vsel %vm324_vm3, %v1367_v54, 0.0  ;;  %v6328_v37 = vadd.f32 %v1358_v32, %v5838_v43 }
 0x8ff   :  { %1384 = vadd.xlane.f32.xlu1 %v1383_v36 }
 0x900   :  { %v1386_v46 = vsel %vm324_vm3, %v6328_v37, 0.0 }
 0x901   :  { %v1332_v45 = vpop.f32.mrb[68].mxu1 }
 0x902   :  { %v1359_v25 = vadd.f32 %v1332_v45, %v891_v55  ;;  %v4880_v3 = vpop.f32.mrb[69].mxu1 }
 0x903   :  { %1387 = vadd.xlane.f32.xlu1 %v1386_v46  ;;  %v1335_v23 = vpop.f32.mrb[70].mxu1 }
 0x904   :  { %v1360_v27 = vadd.f32 %v1335_v23, %v892_v48  ;;  %v4881_v42 = vpop.f32.mrb[71].mxu1  ;;  %v1369_v16 = vadd.f32 %v1359_v25, %v5844_v49 }
 0x905   :  { %v5184_v42 = vld [vmem:[%s7745_s11] ss:$8 sps:$4 sm:$0xff]  }
 0x906   :  { %v1389_v43 = vsel %vm324_vm3, %v1369_v16, 0.0  ;;  %v1370_v14 = vadd.f32 %v1360_v27, %v5846_v50  ;;  %v5186_v27 = vld [vmem:[%s7745_s11 + $0x4] ss:$8 sps:$4 sm:$0xff]  }
 0x907   :  { %1390 = vadd.xlane.f32.xlu0 %v1389_v43  ;;  %1632 = vmatprep.subr.bf16.mxu0 %v5186_v27  ;;  %v5187_v43 = vld [vmem:[%s7745_s11 + $0x10] ss:$8 sps:$4 sm:$0xff]  }
 0x908   :  { %v1392_v28 = vsel %vm324_vm3, %v1370_v14, 0.0  ;;  %1633 = vmatpush1.bf16.msra.mxu0 %v5184_v42 }
 0x909   :  { %1393 = vadd.xlane.f32.xlu1 %v1392_v28  ;;  %v5190_v28 = vld [vmem:[%s7745_s11 + $0x20] ss:$8 sps:$4 sm:$0xff]  }
 0x92a   :  { %v1340_v52 = vpop.f32.mrb[72].mxu1 }
 0x92b   :  { %v1361_v17 = vadd.f32 %v1340_v52, %v893_v18  ;;  %v4884_v2 = vpop.f32.mrb[73].mxu1  ;;  %v5195_v18 = vld [vmem:[%s7745_s11 + $0x34] ss:$8 sps:$4 sm:$0xff]   ;;  %v5193_v52 = vld [vmem:[%s7745_s11 + $0x30] ss:$8 sps:$4 sm:$0xff]  }
 0x92c   :  { %v1343_v7 = vpop.f32.mrb[74].mxu1 }
 0x92d   :  { %v1362_v15 = vadd.f32 %v1343_v7, %v894_v61  ;;  %v4885_v26 = vpop.f32.mrb[75].mxu1  ;;  %v6341_v49 = vadd.f32 %v1361_v17, %v5852_v56  ;;  %v5198_v61 = vld [vmem:[%s7745_s11 + $0x44] ss:$8 sps:$4 sm:$0xff]   ;;  %v5196_v17 = vld [vmem:[%s7745_s11 + $0x40] ss:$8 sps:$4 sm:$0xff]  }
 0x92f   :  { %v1395_v50 = vsel %vm324_vm3, %v6341_v49, 0.0  ;;  %v6346_v19 = vadd.f32 %v1362_v15, %v5854_v57 }
 0x930   :  { %1396 = vadd.xlane.f32.xlu1 %v1395_v50 }
 0x931   :  { %v1398_v5 = vsel %vm324_vm3, %v6346_v19, 0.0 }
 0x932   :  { %v1348_v4 = vpop.f32.mrb[76].mxu1 }
 0x933   :  { %v1363_v47 = vadd.f32 %v1348_v4, %v895_v44  ;;  %v4888_v62 = vpop.f32.mrb[77].mxu1 }
 0x934   :  { %1399 = vadd.xlane.f32.xlu1 %v1398_v5  ;;  %v1351_v56 = vpop.f32.mrb[78].mxu1 }
 0x935   :  { %v1364_v41 = vadd.f32 %v1351_v56, %v896_v29  ;;  %v4889_v58 = vpop.f32.mrb[79].mxu1  ;;  %v6353_v33 = vadd.f32 %v1363_v47, %v5860_v63 }
 0x937   :  { %v1401_v57 = vsel %vm324_vm3, %v6353_v33, 0.0  ;;  %v6358_v40 = vadd.f32 %v1364_v41, %v5862_v1 }
 0x938   :  { %1402 = vadd.xlane.f32.xlu1 %v1401_v57 }
 0x939   :  { %v1404_v51 = vsel %vm324_vm3, %v6358_v40, 0.0 }
 0x93c   :  { %1405 = vadd.xlane.f32.xlu1 %v1404_v51 }
 0x984   :  { %v1379_v10 = vpop.xlane.xlu1 %1378 }
 0x985   :  { %v1408_v22 = vmul.f32 0.0125, %v1379_v10 }
 0x987   :  { %v6363_v59 = vsub.f32 %v6314_v11, %v1408_v22  ;;  %v5199_v22 = vld [vmem:[%s7747_s13 + $0x40] sm:$0xff]  }
 0x988   :  { %v1382_v34 = vpop.xlane.xlu1 %1381  ;;  %4520 = vmatprep.subr.bf16.mxu1 %v5199_v22 }
 0x989   :  { %v1409_v20 = vmul.f32 0.0125, %v1382_v34  ;;  %v1428_v63 = vmul.f32 %v6363_v59, %v6363_v59  ;;  %v5200_v34 = vld [vmem:[%s7747_s13] sm:$0xff]  }
 0x98a   :  { %4521 = vmatpush3.bf16.msra.mxu1 %v5200_v34 }
 0x98b   :  { %v6368_v12 = vsub.f32 %v6319_v9, %v1409_v20  ;;  %v1438_v1 = vsel %vm324_vm3, %v1428_v63, 0.0  ;;  %v5202_v20 = vld [vmem:[%s7747_s13 + $0x8] sm:$0xff]   ;;  %v5203_v63 = vld [vmem:[%s7747_s13 + $0x50] sm:$0xff]  }
 0x98c   :  { %v1385_v39 = vpop.xlane.xlu1 %1384  ;;  %1439 = vadd.xlane.f32.xlu1 %v1438_v1  ;;  %v5204_v1 = vld [vmem:[%s7747_s13 + $0x10] sm:$0xff]  }
 0x98d   :  { %v1410_v13 = vmul.f32 0.0125, %v1385_v39  ;;  %v1429_v21 = vmul.f32 %v6368_v12, %v6368_v12  ;;  %v5205_v39 = vld [vmem:[%s7747_s13 + $0x58] sm:$0xff]  }
 0x98f   :  { %v6373_v38 = vsub.f32 %v1367_v54, %v1410_v13  ;;  %v1441_v11 = vsel %vm324_vm3, %v1429_v21, 0.0  ;;  %v5206_v13 = vld [vmem:[%s7747_s13 + $0x18] sm:$0xff]   ;;  %v5207_v21 = vld [vmem:[%s7747_s13 + $0x60] sm:$0xff]  }
 0x990   :  { %v1388_v60 = vpop.xlane.xlu1 %1387  ;;  %1442 = vadd.xlane.f32.xlu1 %v1441_v11  ;;  %v5208_v11 = vld [vmem:[%s7747_s13 + $0x20] sm:$0xff]  }
 0x991   :  { %v1411_v53 = vmul.f32 0.0125, %v1388_v60  ;;  %v1430_v24 = vmul.f32 %v6373_v38, %v6373_v38  ;;  %v5209_v60 = vld [vmem:[%s7747_s13 + $0x68] sm:$0xff]  }
 0x993   :  { %v6379_v9 = vsub.f32 %v6328_v37, %v1411_v53  ;;  %v1444_v35 = vsel %vm324_vm3, %v1430_v24, 0.0 }
 0x994   :  { %1445 = vadd.xlane.f32.xlu0 %v1444_v35  ;;  %v1391_v32 = vpop.xlane.xlu0 %1390 }
 0x995   :  { %v1412_v31 = vmul.f32 0.0125, %v1391_v32  ;;  %v1431_v54 = vmul.f32 %v6379_v9, %v6379_v9 }
 0x996   :  { %v1394_v36 = vpop.xlane.xlu1 %1393 }
 0x997   :  { %v6384_v55 = vsub.f32 %v1369_v16, %v1412_v31  ;;  %v1413_v45 = vmul.f32 0.0125, %v1394_v36  ;;  %v1447_v48 = vsel %vm324_vm3, %v1431_v54, 0.0  ;;  %v5189_v16 = vld [vmem:[%s7745_s11 + $0x14] ss:$8 sps:$4 sm:$0xff]  }
 0x998   :  { %1448 = vadd.xlane.f32.xlu1 %v1447_v48  ;;  %1634 = vmatprep.subr.bf16.mxu0 %v5189_v16  ;;  %v6486_v16 = vld [vmem:[%s7743_s9] ss:$0 sm:$0xff] }
 0x999   :  { %v6387_v25 = vsub.f32 %v1370_v14, %v1413_v45  ;;  %v1432_v37 = vmul.f32 %v6384_v55, %v6384_v55  ;;  %1635 = vmatpush1.bf16.msra.mxu0 %v5187_v43  ;;  %v5192_v14 = vld [vmem:[%s7745_s11 + $0x24] ss:$8 sps:$4 sm:$0xff]  }
 0x99a   :  { %1636 = vmatprep.subr.bf16.mxu0 %v5192_v14 }
 0x99b   :  { %v1450_v3 = vsel %vm324_vm3, %v1432_v37, 0.0  ;;  %v1433_v46 = vmul.f32 %v6387_v25, %v6387_v25 }
 0x99c   :  { %1451 = vadd.xlane.f32.xlu0 %v1450_v3 }
 0x99d   :  { %v1453_v23 = vsel %vm324_vm3, %v1433_v46, 0.0  ;;  %1637 = vmatpush1.bf16.msra.mxu0 %v5190_v28 }
 0x99e   :  { %1454 = vadd.xlane.f32.xlu1 %v1453_v23  ;;  %1638 = vmatprep.subr.bf16.mxu0 %v5195_v18 }
 0x9a1   :  { %1639 = vmatpush1.bf16.msra.mxu0 %v5193_v52 }
 0x9a2   :  { %1640 = vmatprep.subr.bf16.mxu0 %v5198_v61 }
 0x9a5   :  { %1641 = vmatpush1.bf16.msra.mxu0 %v5196_v17 }
 0x9bd   :  { %v1397_v2 = vpop.xlane.xlu1 %1396 }
 0x9be   :  { %v1414_v7 = vmul.f32 0.0125, %v1397_v2 }
 0x9c0   :  { %v6426_v15 = vsub.f32 %v6341_v49, %v1414_v7 }
 0x9c1   :  { %v1400_v26 = vpop.xlane.xlu1 %1399 }
 0x9c2   :  { %v1415_v50 = vmul.f32 0.0125, %v1400_v26  ;;  %v1434_v44 = vmul.f32 %v6426_v15, %v6426_v15 }
 0x9c4   :  { %v6431_v4 = vsub.f32 %v6346_v19, %v1415_v50  ;;  %v1456_v29 = vsel %vm324_vm3, %v1434_v44, 0.0 }
 0x9c5   :  { %1457 = vadd.xlane.f32.xlu0 %v1456_v29  ;;  %v1403_v47 = vpop.xlane.xlu1 %1402 }
 0x9c6   :  { %v1416_v62 = vmul.f32 0.0125, %v1403_v47  ;;  %v1435_v5 = vmul.f32 %v6431_v4, %v6431_v4 }
 0x9c8   :  { %v6437_v56 = vsub.f32 %v6353_v33, %v1416_v62  ;;  %v1459_v49 = vsel %vm324_vm3, %v1435_v5, 0.0 }
 0x9c9   :  { %1460 = vadd.xlane.f32.xlu1 %v1459_v49  ;;  %v1406_v41 = vpop.xlane.xlu1 %1405 }
 0x9ca   :  { %v1417_v58 = vmul.f32 0.0125, %v1406_v41  ;;  %v1436_v19 = vmul.f32 %v6437_v56, %v6437_v56 }
 0x9cc   :  { %v6443_v57 = vsub.f32 %v6358_v40, %v1417_v58  ;;  %v1462_v51 = vsel %vm324_vm3, %v1436_v19, 0.0  ;;  %v5201_v40 = vld [vmem:[%s7747_s13 + $0x48] sm:$0xff]  }
 0x9cd   :  { %1463 = vadd.xlane.f32.xlu0 %v1462_v51  ;;  %4522 = vmatprep.subr.bf16.mxu1 %v5201_v40 }
 0x9ce   :  { %v1437_v10 = vmul.f32 %v6443_v57, %v6443_v57  ;;  %4523 = vmatpush3.bf16.msra.mxu1 %v5202_v20 }
 0x9cf   :  { %4524 = vmatprep.subr.bf16.mxu1 %v5203_v63 }
 0x9d0   :  { %v1465_v33 = vsel %vm324_vm3, %v1437_v10, 0.0 }
 0x9d1   :  { %1466 = vadd.xlane.f32.xlu1 %v1465_v33 }
 0x9d2   :  { %4525 = vmatpush3.bf16.msra.mxu1 %v5204_v1 }
 0x9d3   :  { %4526 = vmatprep.subr.bf16.mxu1 %v5205_v39 }
 0x9d6   :  { %4527 = vmatpush3.bf16.msra.mxu1 %v5206_v13 }
 0x9d7   :  { %4528 = vmatprep.subr.bf16.mxu1 %v5207_v21 }
 0x9da   :  { %4529 = vmatpush3.bf16.msra.mxu1 %v5208_v11 }
 0x9db   :  { %4530 = vmatprep.subr.bf16.mxu1 %v5209_v60 }
 0xa19   :  { %v1440_v53 = vpop.xlane.xlu1 %1439 }
 0xa1a   :  { %v1468_v24 = vmul.f32 0.0125, %v1440_v53 }
 0xa1c   :  { %v1478_v35 = vadd.f32 1e-05, %v1468_v24 }
 0xa1d   :  { %v1443_v32 = vpop.xlane.xlu1 %1442 }
 0xa1e   :  { %5347 = vrsqrt.f32 %v1478_v35  ;;  %v1469_v31 = vmul.f32 0.0125, %v1443_v32 }
 0xa20   :  { %v1479_v54 = vadd.f32 1e-05, %v1469_v31 }
 0xa21   :  { %v1446_v36 = vpop.xlane.xlu0 %1445 }
 0xa22   :  { %5349 = vrsqrt.f32 %v1479_v54  ;;  %v1470_v45 = vmul.f32 0.0125, %v1446_v36 }
 0xa24   :  { %v1480_v48 = vadd.f32 1e-05, %v1470_v45 }
 0xa25   :  { %v1449_v37 = vpop.xlane.xlu1 %1448 }
 0xa26   :  { %5351 = vrsqrt.f32 %v1480_v48  ;;  %v1471_v3 = vmul.f32 0.0125, %v1449_v37 }
 0xa28   :  { %v5348_v46 = vpop.eup %5347  ;;  %v1481_v23 = vadd.f32 1e-05, %v1471_v3 }
 0xa29   :  { %v1498_v27 = vmul.f32 %v5348_v46, %v6363_v59  ;;  %v1452_v42 = vpop.xlane.xlu0 %1451  ;;  %v6493_v59 = vld [vmem:[%s7744_s10] ss:$0 sm:$0xff] }
 0xa2a   :  { %5353 = vrsqrt.f32 %v1481_v23  ;;  %v1472_v43 = vmul.f32 0.0125, %v1452_v42 }
 0xa2b   :  { %v1455_v14 = vpop.xlane.xlu1 %1454  ;;  %v1514_v61 = vmul.f32 %v6486_v16, %v1498_v27 }
 0xa2c   :  { %v5350_v28 = vpop.eup %5349  ;;  %v1482_v18 = vadd.f32 1e-05, %v1472_v43  ;;  %v1473_v52 = vmul.f32 0.0125, %v1455_v14 }
 0xa2d   :  { %v1499_v17 = vmul.f32 %v5350_v28, %v6368_v12  ;;  %v6497_v50 = vadd.f32 %v6493_v59, %v1514_v61  ;;  %v5214_v61 = vld [vmem:[%s7747_s13 + $0x38] sm:$0xff]  }
 0xa2e   :  { %5355 = vrsqrt.f32 %v1482_v18  ;;  %v1483_v2 = vadd.f32 1e-05, %v1473_v52  ;;  %v5212_v18 = vld [vmem:[%s7747_s13 + $0x30] sm:$0xff]   ;;  %v5213_v52 = vld [vmem:[%s7747_s13 + $0x78] sm:$0xff]  }
 0xa2f   :  { %v1515_v7 = vmul.f32 %v6486_v16, %v1499_v17  ;;  %v1555_v17 = vld [vmem:[%s7746_s12] sm:$0x3] }
 0xa30   :  { %v5352_v26 = vpop.eup %5351  ;;  %5357 = vrsqrt.f32 %v1483_v2  ;;  %v6585_v2 = vrot.slane %v1555_v17, %v5874_v8 }
 0xa31   :  { %v6500_v44 = vadd.f32 %v6493_v59, %v1515_v7  ;;  %v1500_v29 = vmul.f32 %v5352_v26, %v6373_v38 }
 0xa33   :  { %v1540_v12 = vpack.c.bf16 %v6500_v44, %v6497_v50  ;;  %v1516_v5 = vmul.f32 %v6486_v16, %v1500_v29 }
 0xa34   :  { %v5354_v47 = vpop.eup %5353 }
 0xa35   :  { %4279 = vmatmul.mubr.msk.bf16.vlgmr.msra.gmra.mrb[80].mxu0 %vm324_vm3, %v1540_v12  ;;  %v1501_v62 = vmul.f32 %v5354_v47, %v6379_v9  ;;  %v6511_v58 = vadd.f32 %v6493_v59, %v1516_v5 }
 0xa36   :  { %1674 = vmatprep.mubr.bf16.mxu0 %v5596_v30 }
 0xa37   :  { %v1517_v49 = vmul.f32 %v6486_v16, %v1501_v62 }
 0xa38   :  { %v5356_v41 = vpop.eup %5355 }
 0xa39   :  { %v6514_v38 = vadd.f32 %v6493_v59, %v1517_v49  ;;  %v1502_v19 = vmul.f32 %v5356_v41, %v6384_v55 }
 0xa3a   :  { %v5358_v51 = vpop.eup %5357 }
 0xa3b   :  { %v1541_v10 = vpack.c.bf16 %v6514_v38, %v6511_v58  ;;  %v1503_v9 = vmul.f32 %v5358_v51, %v6387_v25  ;;  %v1518_v33 = vmul.f32 %v6486_v16, %v1502_v19 }
 0xa3d   :  { %4280 = vmatmul.mubr.msk.bf16.gmra.mrb[84].mxu0 %vm324_vm3, %v1541_v10  ;;  %v1519_v22 = vmul.f32 %v6486_v16, %v1503_v9  ;;  %v6528_v40 = vadd.f32 %v6493_v59, %v1518_v33 }
 0xa3e   :  { %1684 = vmatprep.mubr.bf16.mxu0 %v5596_v30 }
 0xa3f   :  { %v6525_v34 = vadd.f32 %v6493_v59, %v1519_v22 }
 0xa41   :  { %v1542_v55 = vpack.c.bf16 %v6525_v34, %v6528_v40 }
 0xa45   :  { %4281 = vmatmul.mubr.msk.bf16.gmra.mrb[88].mxu0 %vm324_vm3, %v1542_v55 }
 0xa46   :  { %1694 = vmatprep.mubr.bf16.mxu0 %v5596_v30 }
 0xa52   :  { %v1458_v25 = vpop.xlane.xlu0 %1457 }
 0xa53   :  { %v1474_v20 = vmul.f32 0.0125, %v1458_v25 }
 0xa55   :  { %v1484_v63 = vadd.f32 1e-05, %v1474_v20 }
 0xa56   :  { %v1461_v1 = vpop.xlane.xlu1 %1460 }
 0xa57   :  { %5359 = vrsqrt.f32 %v1484_v63  ;;  %v1475_v39 = vmul.f32 0.0125, %v1461_v1 }
 0xa59   :  { %v1485_v13 = vadd.f32 1e-05, %v1475_v39 }
 0xa5a   :  { %v1464_v21 = vpop.xlane.xlu0 %1463 }
 0xa5b   :  { %5361 = vrsqrt.f32 %v1485_v13  ;;  %v1476_v11 = vmul.f32 0.0125, %v1464_v21 }
 0xa5d   :  { %v1486_v60 = vadd.f32 1e-05, %v1476_v11 }
 0xa5e   :  { %v1467_v53 = vpop.xlane.xlu1 %1466 }
 0xa5f   :  { %5363 = vrsqrt.f32 %v1486_v60  ;;  %v1477_v24 = vmul.f32 0.0125, %v1467_v53 }
 0xa61   :  { %v5360_v35 = vpop.eup %5359  ;;  %v1487_v32 = vadd.f32 1e-05, %v1477_v24 }
 0xa62   :  { %v1504_v31 = vmul.f32 %v5360_v35, %v6426_v15 }
 0xa63   :  { %5365 = vrsqrt.f32 %v1487_v32 }
 0xa64   :  { %v1520_v45 = vmul.f32 %v6486_v16, %v1504_v31 }
 0xa65   :  { %v5362_v54 = vpop.eup %5361 }
 0xa66   :  { %v1505_v36 = vmul.f32 %v5362_v54, %v6431_v4  ;;  %v6539_v3 = vadd.f32 %v6493_v59, %v1520_v45 }
 0xa68   :  { %v1521_v48 = vmul.f32 %v6486_v16, %v1505_v36 }
 0xa69   :  { %v5364_v37 = vpop.eup %5363 }
 0xa6a   :  { %v6542_v46 = vadd.f32 %v6493_v59, %v1521_v48  ;;  %v1506_v23 = vmul.f32 %v5364_v37, %v6437_v56 }
 0xa6c   :  { %v1543_v15 = vpack.c.bf16 %v6542_v46, %v6539_v3  ;;  %v1522_v42 = vmul.f32 %v6486_v16, %v1506_v23 }
 0xa6d   :  { %v5366_v27 = vpop.eup %5365 }
 0xa6e   :  { %4282 = vmatmul.mubr.msk.bf16.gmra.mrb[92].mxu0 %vm324_vm3, %v1543_v15  ;;  %v1507_v4 = vmul.f32 %v5366_v27, %v6443_v57  ;;  %v6553_v14 = vadd.f32 %v6493_v59, %v1522_v42  ;;  %v5210_v57 = vld [vmem:[%s7747_s13 + $0x28] sm:$0xff]  }
 0xa6f   :  { %1704 = vmatprep.mubr.bf16.mxu0 %v5596_v30  ;;  %4531 = vmatpush3.bf16.msra.mxu1 %v5210_v57 }
 0xa70   :  { %v1523_v43 = vmul.f32 %v6486_v16, %v1507_v4  ;;  %v5211_v16 = vld [vmem:[%s7747_s13 + $0x70] sm:$0xff]  }
 0xa71   :  { %4532 = vmatprep.subr.bf16.mxu1 %v5211_v16 }
 0xa72   :  { %v6556_v28 = vadd.f32 %v6493_v59, %v1523_v43  ;;  %v6582_v59 = vrot.slane %v1555_v17, %v5869_v6 }
 0xa73   :  { %4533 = vmatpush3.bf16.msra.mxu1 %v5212_v18 }
 0xa74   :  { %v1544_v56 = vpack.c.bf16 %v6556_v28, %v6553_v14  ;;  %4534 = vmatprep.subr.bf16.mxu1 %v5213_v52 }
 0xa76   :  { %4283 = vmatmul.mubr.msk.bf16.gmra.mrb[96].mxu0 %vm324_vm3, %v1544_v56 }
 0xa77   :  { %2253 = vmatprep.mubr.bf16.mxu0 %v5596_v30  ;;  %4535 = vmatpush3.bf16.msra.mxu1 %v5214_v61 }
 0xa78   :  { %4890 = vmatprep.subr.bf16.mxu1 %v5594_v0 }
 0xb08   :  { %v1666_v7 = vpop.f32.mrb[80].mxu0 }
 0xb09   :  { %v1667_v26 = vadd.f32 %v1666_v7, %v6582_v59  ;;  %v1668_v29 = vpop.f32.mrb[81].mxu0 }
 0xb0a   :  { %v1669_v12 = vadd.f32 %v1668_v29, %v6585_v2  ;;  %v1670_v47 = vpop.f32.mrb[82].mxu0 }
 0xb0b   :  { %v1671_v62 = vadd.f32 %v1670_v47, %v6582_v59  ;;  %v1672_v5 = vpop.f32.mrb[83].mxu0  ;;  %v1715_v41 = vmax.f32 %v1667_v26, 0.0 }
 0xb0c   :  { %v1673_v49 = vadd.f32 %v1672_v5, %v6585_v2  ;;  %v1716_v51 = vmax.f32 %v1669_v12, 0.0 }
 0xb0d   :  { %v1717_v19 = vmax.f32 %v1671_v62, 0.0 }
 0xb0e   :  { %v1718_v10 = vmax.f32 %v1673_v49, 0.0 }
 0xb0f   :  { %v1735_v9 = vpack.c.bf16 %v1717_v19, %v1715_v41 }
 0xb10   :  { %v1736_v33 = vpack.c.bf16 %v1718_v10, %v1716_v51  ;;  %v1676_v22 = vpop.f32.mrb[84].mxu0 }
 0xb11   :  { %v1677_v55 = vadd.f32 %v1676_v22, %v6582_v59  ;;  %v1678_v25 = vpop.f32.mrb[85].mxu0 }
 0xb12   :  { %v1679_v20 = vadd.f32 %v1678_v25, %v6585_v2  ;;  %v1680_v63 = vpop.f32.mrb[86].mxu0  ;;  %1912 = vmatprep.mubr.bf16.mxu1 %v1736_v33 }
 0xb13   :  { %v1681_v1 = vadd.f32 %v1680_v63, %v6582_v59  ;;  %v1682_v39 = vpop.f32.mrb[87].mxu0  ;;  %1913 = vmatmul.mubr.bf16.vlgmr.msra.gmra.mrb[80].mxu1 %v1735_v9  ;;  %v1719_v21 = vmax.f32 %v1677_v55, 0.0 }
 0xb14   :  { %v1683_v13 = vadd.f32 %v1682_v39, %v6585_v2  ;;  %v1720_v60 = vmax.f32 %v1679_v20, 0.0 }
 0xb15   :  { %v1721_v11 = vmax.f32 %v1681_v1, 0.0 }
 0xb16   :  { %v1722_v53 = vmax.f32 %v1683_v13, 0.0 }
 0xb17   :  { %v1737_v24 = vpack.c.bf16 %v1721_v11, %v1719_v21 }
 0xb18   :  { %v1738_v35 = vpack.c.bf16 %v1722_v53, %v1720_v60  ;;  %v1686_v32 = vpop.f32.mrb[88].mxu0 }
 0xb19   :  { %v1687_v31 = vadd.f32 %v1686_v32, %v6582_v59  ;;  %v1688_v54 = vpop.f32.mrb[89].mxu0 }
 0xb1a   :  { %v1689_v36 = vadd.f32 %v1688_v54, %v6585_v2  ;;  %v1690_v45 = vpop.f32.mrb[90].mxu0  ;;  %1920 = vmatprep.mubr.bf16.mxu1 %v1738_v35 }
 0xb1b   :  { %v1691_v48 = vadd.f32 %v1690_v45, %v6582_v59  ;;  %v1692_v37 = vpop.f32.mrb[91].mxu0  ;;  %1921 = vmatmul.mubr.bf16.gmra.mrb[84].mxu1 %v1737_v24  ;;  %v1723_v15 = vmax.f32 %v1687_v31, 0.0 }
 0xb1c   :  { %v1693_v23 = vadd.f32 %v1692_v37, %v6585_v2  ;;  %v1724_v4 = vmax.f32 %v1689_v36, 0.0 }
 0xb1d   :  { %v1725_v27 = vmax.f32 %v1691_v48, 0.0 }
 0xb1e   :  { %v1726_v42 = vmax.f32 %v1693_v23, 0.0 }
 0xb1f   :  { %v1739_v43 = vpack.c.bf16 %v1725_v27, %v1723_v15 }
 0xb20   :  { %v1740_v56 = vpack.c.bf16 %v1726_v42, %v1724_v4 }
 0xb22   :  { %1928 = vmatprep.mubr.bf16.mxu1 %v1740_v56 }
 0xb23   :  { %1929 = vmatmul.mubr.bf16.gmra.mrb[88].mxu1 %v1739_v43 }
 0xb41   :  { %v1696_v57 = vpop.f32.mrb[92].mxu0 }
 0xb42   :  { %v1697_v16 = vadd.f32 %v1696_v57, %v6582_v59  ;;  %v1698_v18 = vpop.f32.mrb[93].mxu0 }
 0xb43   :  { %v1699_v52 = vadd.f32 %v1698_v18, %v6585_v2  ;;  %v1700_v61 = vpop.f32.mrb[94].mxu0 }
 0xb44   :  { %v1701_v17 = vadd.f32 %v1700_v61, %v6582_v59  ;;  %v1702_v7 = vpop.f32.mrb[95].mxu0  ;;  %v1727_v29 = vmax.f32 %v1697_v16, 0.0 }
 0xb45   :  { %v1703_v26 = vadd.f32 %v1702_v7, %v6585_v2  ;;  %v1728_v47 = vmax.f32 %v1699_v52, 0.0 }
 0xb46   :  { %v1729_v12 = vmax.f32 %v1701_v17, 0.0 }
 0xb47   :  { %v1730_v62 = vmax.f32 %v1703_v26, 0.0 }
 0xb48   :  { %v1741_v5 = vpack.c.bf16 %v1729_v12, %v1727_v29 }
 0xb49   :  { %v1742_v49 = vpack.c.bf16 %v1730_v62, %v1728_v47  ;;  %v1706_v41 = vpop.f32.mrb[96].mxu0 }
 0xb4a   :  { %v1707_v19 = vadd.f32 %v1706_v41, %v6582_v59  ;;  %v1708_v51 = vpop.f32.mrb[97].mxu0 }
 0xb4b   :  { %v1709_v10 = vadd.f32 %v1708_v51, %v6585_v2  ;;  %v1710_v9 = vpop.f32.mrb[98].mxu0  ;;  %1936 = vmatprep.mubr.bf16.mxu1 %v1742_v49 }
 0xb4c   :  { %v1711_v33 = vadd.f32 %v1710_v9, %v6582_v59  ;;  %v1712_v22 = vpop.f32.mrb[99].mxu0  ;;  %1937 = vmatmul.mubr.bf16.gmra.mrb[92].mxu1 %v1741_v5  ;;  %v1731_v25 = vmax.f32 %v1707_v19, 0.0  ;;  %v6612_v59 = vld [vmem:[%s7748_s14] ss:$0 sm:$0xff] }
 0xb4d   :  { %v1713_v55 = vadd.f32 %v1712_v22, %v6585_v2  ;;  %v1732_v63 = vmax.f32 %v1709_v10, 0.0 }
 0xb4e   :  { %v1733_v20 = vmax.f32 %v1711_v33, 0.0 }
 0xb4f   :  { %v1734_v1 = vmax.f32 %v1713_v55, 0.0 }
 0xb50   :  { %v1743_v39 = vpack.c.bf16 %v1733_v20, %v1731_v25 }
 0xb51   :  { %v1744_v13 = vpack.c.bf16 %v1734_v1, %v1732_v63 }
 0xb53   :  { %1944 = vmatprep.mubr.bf16.mxu1 %v1744_v13 }
 0xb54   :  { %1945 = vmatmul.mubr.bf16.gmra.mrb[96].mxu1 %v1743_v39 }
 0xb55   :  { %4900 = vmatprep.mubr.msk.bf16.mxu1 %vm5595_vm0, %v5594_v0 }
 0xbe6   :  { %v4536_v21 = vpop.f32.mrb[80].mxu1 }
 0xbe7   :  { %v4537_v11 = vpop.f32.mrb[81].mxu1 }
 0xbe8   :  { %v4538_v60 = vadd.f32 %v4537_v11, %v4536_v21  ;;  %v4539_v2 = vpop.f32.mrb[82].mxu1 }
 0xbe9   :  { %v4540_v53 = vpop.f32.mrb[83].mxu1 }
 0xbea   :  { %v1915_v24 = vadd.f32 %v4538_v60, %v6612_v59  ;;  %v4541_v35 = vadd.f32 %v4540_v53, %v4539_v2 }
 0xbec   :  { %v1918_v32 = vadd.f32 %v4541_v35, %v6612_v59  ;;  %v6617_v31 = vadd.f32 %v1915_v24, %v6497_v50 }
 0xbee   :  { %v4542_v54 = vpop.f32.mrb[84].mxu1  ;;  %v1965_v36 = vsel %vm324_vm3, %v6617_v31, 0.0  ;;  %v6622_v45 = vadd.f32 %v1918_v32, %v6500_v44 }
 0xbef   :  { %v4543_v48 = vpop.f32.mrb[85].mxu1  ;;  %1966 = vadd.xlane.f32.xlu0 %v1965_v36 }
 0xbf0   :  { %v4544_v37 = vadd.f32 %v4543_v48, %v4542_v54  ;;  %v4545_v23 = vpop.f32.mrb[86].mxu1  ;;  %v1968_v15 = vsel %vm324_vm3, %v6622_v45, 0.0 }
 0xbf1   :  { %v4546_v27 = vpop.f32.mrb[87].mxu1  ;;  %1969 = vadd.xlane.f32.xlu1 %v1968_v15 }
 0xbf2   :  { %v1923_v4 = vadd.f32 %v4544_v37, %v6612_v59  ;;  %v4547_v50 = vadd.f32 %v4546_v27, %v4545_v23 }
 0xbf4   :  { %v1926_v42 = vadd.f32 %v4547_v50, %v6612_v59  ;;  %v6629_v43 = vadd.f32 %v1923_v4, %v6511_v58 }
 0xbf6   :  { %v4548_v56 = vpop.f32.mrb[88].mxu1  ;;  %v1971_v44 = vsel %vm324_vm3, %v6629_v43, 0.0  ;;  %v1956_v57 = vadd.f32 %v1926_v42, %v6514_v38 }
 0xbf7   :  { %v4549_v16 = vpop.f32.mrb[89].mxu1  ;;  %1972 = vadd.xlane.f32.xlu0 %v1971_v44 }
 0xbf8   :  { %v4550_v18 = vadd.f32 %v4549_v16, %v4548_v56  ;;  %v4551_v52 = vpop.f32.mrb[90].mxu1  ;;  %v1974_v61 = vsel %vm324_vm3, %v1956_v57, 0.0 }
 0xbf9   :  { %v4552_v17 = vpop.f32.mrb[91].mxu1  ;;  %1975 = vadd.xlane.f32.xlu1 %v1974_v61 }
 0xbfa   :  { %v1931_v7 = vadd.f32 %v4550_v18, %v6612_v59  ;;  %v4553_v26 = vadd.f32 %v4552_v17, %v4551_v52 }
 0xbfc   :  { %v1934_v58 = vadd.f32 %v4553_v26, %v6612_v59  ;;  %v1957_v29 = vadd.f32 %v1931_v7, %v6528_v40  ;;  %v5217_v26 = vld [vmem:[%s7739_s5 + $0x54] ss:$8 sps:$4 sm:$0xff]  }
 0xbfd   :  { %2221 = vmatprep.subr.bf16.mxu0 %v5217_v26 }
 0xbfe   :  { %v1977_v12 = vsel %vm324_vm3, %v1957_v29, 0.0  ;;  %v1958_v47 = vadd.f32 %v1934_v58, %v6525_v34  ;;  %v5215_v58 = vld [vmem:[%s7739_s5 + $0x50] ss:$8 sps:$4 sm:$0xff]  }
 0xbff   :  { %1978 = vadd.xlane.f32.xlu0 %v1977_v12  ;;  %2222 = vmatpush1.bf16.msra.mxu0 %v5215_v58  ;;  %v5218_v12 = vld [vmem:[%s7739_s5 + $0x60] ss:$8 sps:$4 sm:$0xff]  }
 0xc00   :  { %v1980_v38 = vsel %vm324_vm3, %v1958_v47, 0.0 }
 0xc01   :  { %1981 = vadd.xlane.f32.xlu1 %v1980_v38  ;;  %v5221_v38 = vld [vmem:[%s7739_s5 + $0x70] ss:$8 sps:$4 sm:$0xff]  }
 0xc1f   :  { %v4554_v62 = vpop.f32.mrb[92].mxu1 }
 0xc20   :  { %v4555_v5 = vpop.f32.mrb[93].mxu1 }
 0xc21   :  { %v4556_v49 = vadd.f32 %v4555_v5, %v4554_v62  ;;  %v4557_v41 = vpop.f32.mrb[94].mxu1  ;;  %v5226_v62 = vld [vmem:[%s7739_s5 + $0x84] ss:$8 sps:$4 sm:$0xff]   ;;  %v5224_v5 = vld [vmem:[%s7739_s5 + $0x80] ss:$8 sps:$4 sm:$0xff]  }
 0xc22   :  { %v4558_v19 = vpop.f32.mrb[95].mxu1 }
 0xc23   :  { %v1939_v51 = vadd.f32 %v4556_v49, %v6612_v59  ;;  %v4559_v10 = vadd.f32 %v4558_v19, %v4557_v41  ;;  %v5229_v49 = vld [vmem:[%s7739_s5 + $0x94] ss:$8 sps:$4 sm:$0xff]   ;;  %v5227_v41 = vld [vmem:[%s7739_s5 + $0x90] ss:$8 sps:$4 sm:$0xff]  }
 0xc25   :  { %v1942_v9 = vadd.f32 %v4559_v10, %v6612_v59  ;;  %v6644_v40 = vadd.f32 %v1939_v51, %v6539_v3 }
 0xc27   :  { %v4560_v33 = vpop.f32.mrb[96].mxu1  ;;  %v1983_v34 = vsel %vm324_vm3, %v6644_v40, 0.0  ;;  %v6649_v22 = vadd.f32 %v1942_v9, %v6542_v46 }
 0xc28   :  { %v4561_v55 = vpop.f32.mrb[97].mxu1  ;;  %1984 = vadd.xlane.f32.xlu0 %v1983_v34 }
 0xc29   :  { %v4562_v25 = vadd.f32 %v4561_v55, %v4560_v33  ;;  %v4563_v20 = vpop.f32.mrb[98].mxu1  ;;  %v1986_v63 = vsel %vm324_vm3, %v6649_v22, 0.0 }
 0xc2a   :  { %v4564_v1 = vpop.f32.mrb[99].mxu1  ;;  %1987 = vadd.xlane.f32.xlu1 %v1986_v63 }
 0xc2b   :  { %v1947_v39 = vadd.f32 %v4562_v25, %v6612_v59  ;;  %v4565_v3 = vadd.f32 %v4564_v1, %v4563_v20 }
 0xc2d   :  { %v1950_v13 = vadd.f32 %v4565_v3, %v6612_v59  ;;  %v6656_v21 = vadd.f32 %v1947_v39, %v6553_v14 }
 0xc2f   :  { %v1989_v46 = vsel %vm324_vm3, %v6656_v21, 0.0  ;;  %v6661_v11 = vadd.f32 %v1950_v13, %v6556_v28 }
 0xc30   :  { %1990 = vadd.xlane.f32.xlu0 %v1989_v46 }
 0xc31   :  { %v1992_v60 = vsel %vm324_vm3, %v6661_v11, 0.0 }
 0xc32   :  { %1993 = vadd.xlane.f32.xlu1 %v1992_v60 }
 0xc7c   :  { %v1967_v2 = vpop.xlane.xlu0 %1966 }
 0xc7d   :  { %v1995_v53 = vmul.f32 0.0125, %v1967_v2 }
 0xc7e   :  { %v1970_v24 = vpop.xlane.xlu1 %1969 }
 0xc7f   :  { %v6666_v35 = vsub.f32 %v6617_v31, %v1995_v53  ;;  %v1996_v59 = vmul.f32 0.0125, %v1970_v24 }
 0xc81   :  { %v6669_v14 = vsub.f32 %v6622_v45, %v1996_v59  ;;  %v2015_v32 = vmul.f32 %v6666_v35, %v6666_v35 }
 0xc83   :  { %v2025_v28 = vsel %vm324_vm3, %v2015_v32, 0.0  ;;  %v2016_v54 = vmul.f32 %v6669_v14, %v6669_v14 }
 0xc84   :  { %2026 = vadd.xlane.f32.xlu0 %v2025_v28  ;;  %v1973_v36 = vpop.xlane.xlu0 %1972 }
 0xc85   :  { %v1997_v48 = vmul.f32 0.0125, %v1973_v36  ;;  %v2028_v37 = vsel %vm324_vm3, %v2016_v54, 0.0 }
 0xc86   :  { %2029 = vadd.xlane.f32.xlu1 %v2028_v37  ;;  %v1976_v31 = vpop.xlane.xlu1 %1975 }
 0xc87   :  { %v6678_v23 = vsub.f32 %v6629_v43, %v1997_v48  ;;  %v1998_v45 = vmul.f32 0.0125, %v1976_v31 }
 0xc89   :  { %v6680_v15 = vsub.f32 %v1956_v57, %v1998_v45  ;;  %v2017_v27 = vmul.f32 %v6678_v23, %v6678_v23 }
 0xc8b   :  { %v2031_v4 = vsel %vm324_vm3, %v2017_v27, 0.0  ;;  %v2018_v50 = vmul.f32 %v6680_v15, %v6680_v15 }
 0xc8c   :  { %2032 = vadd.xlane.f32.xlu0 %v2031_v4  ;;  %v1979_v42 = vpop.xlane.xlu0 %1978  ;;  %v6756_v4 = vld [vmem:[%s7749_s15] ss:$0 sm:$0xff] }
 0xc8d   :  { %v1999_v56 = vmul.f32 0.0125, %v1979_v42  ;;  %v2034_v44 = vsel %vm324_vm3, %v2018_v50, 0.0 }
 0xc8e   :  { %2035 = vadd.xlane.f32.xlu1 %v2034_v44  ;;  %v1982_v16 = vpop.xlane.xlu1 %1981 }
 0xc8f   :  { %v6688_v43 = vsub.f32 %v1957_v29, %v1999_v56  ;;  %v2000_v18 = vmul.f32 0.0125, %v1982_v16  ;;  %v5220_v29 = vld [vmem:[%s7739_s5 + $0x64] ss:$8 sps:$4 sm:$0xff]  }
 0xc90   :  { %2223 = vmatprep.subr.bf16.mxu0 %v5220_v29 }
 0xc91   :  { %v6690_v57 = vsub.f32 %v1958_v47, %v2000_v18  ;;  %v2019_v52 = vmul.f32 %v6688_v43, %v6688_v43  ;;  %2224 = vmatpush1.bf16.msra.mxu0 %v5218_v12  ;;  %v5223_v47 = vld [vmem:[%s7739_s5 + $0x74] ss:$8 sps:$4 sm:$0xff]  }
 0xc92   :  { %2225 = vmatprep.subr.bf16.mxu0 %v5223_v47 }
 0xc93   :  { %v2037_v61 = vsel %vm324_vm3, %v2019_v52, 0.0  ;;  %v2020_v17 = vmul.f32 %v6690_v57, %v6690_v57 }
 0xc94   :  { %2038 = vadd.xlane.f32.xlu0 %v2037_v61  ;;  %v6764_v61 = vld [vmem:[%s7750_s16] ss:$0 sm:$0xff] }
 0xc95   :  { %v2040_v7 = vsel %vm324_vm3, %v2020_v17, 0.0  ;;  %2226 = vmatpush1.bf16.msra.mxu0 %v5221_v38 }
 0xc96   :  { %2041 = vadd.xlane.f32.xlu1 %v2040_v7  ;;  %2227 = vmatprep.subr.bf16.mxu0 %v5226_v62 }
 0xc99   :  { %2228 = vmatpush1.bf16.msra.mxu0 %v5224_v5 }
 0xc9a   :  { %2229 = vmatprep.subr.bf16.mxu0 %v5229_v49 }
 0xc9d   :  { %2230 = vmatpush1.bf16.msra.mxu0 %v5227_v41 }
 0xc9e   :  { %4920 = vmatprep.subr.bf16.mxu0 %v5594_v0 }
 0xcb5   :  { %v1985_v19 = vpop.xlane.xlu0 %1984 }
 0xcb6   :  { %v2001_v51 = vmul.f32 0.0125, %v1985_v19 }
 0xcb7   :  { %v1988_v10 = vpop.xlane.xlu1 %1987 }
 0xcb8   :  { %v6730_v9 = vsub.f32 %v6644_v40, %v2001_v51  ;;  %v2002_v33 = vmul.f32 0.0125, %v1988_v10 }
 0xcba   :  { %v6733_v34 = vsub.f32 %v6649_v22, %v2002_v33  ;;  %v2021_v55 = vmul.f32 %v6730_v9, %v6730_v9 }
 0xcbc   :  { %v2043_v25 = vsel %vm324_vm3, %v2021_v55, 0.0  ;;  %v2022_v20 = vmul.f32 %v6733_v34, %v6733_v34 }
 0xcbd   :  { %2044 = vadd.xlane.f32.xlu0 %v2043_v25  ;;  %v1991_v63 = vpop.xlane.xlu0 %1990 }
 0xcbe   :  { %v2003_v1 = vmul.f32 0.0125, %v1991_v63  ;;  %v2046_v39 = vsel %vm324_vm3, %v2022_v20, 0.0 }
 0xcbf   :  { %2047 = vadd.xlane.f32.xlu1 %v2046_v39  ;;  %v1994_v40 = vpop.xlane.xlu1 %1993 }
 0xcc0   :  { %v6742_v3 = vsub.f32 %v6656_v21, %v2003_v1  ;;  %v2004_v22 = vmul.f32 0.0125, %v1994_v40 }
 0xcc2   :  { %v6745_v13 = vsub.f32 %v6661_v11, %v2004_v22  ;;  %v2023_v46 = vmul.f32 %v6742_v3, %v6742_v3 }
 0xcc4   :  { %v2049_v60 = vsel %vm324_vm3, %v2023_v46, 0.0  ;;  %v2024_v2 = vmul.f32 %v6745_v13, %v6745_v13 }
 0xcc5   :  { %2050 = vadd.xlane.f32.xlu0 %v2049_v60 }
 0xcc6   :  { %v2052_v53 = vsel %vm324_vm3, %v2024_v2, 0.0 }
 0xcc7   :  { %2053 = vadd.xlane.f32.xlu1 %v2052_v53 }
 0xd11   :  { %v2027_v24 = vpop.xlane.xlu0 %2026 }
 0xd12   :  { %v2055_v59 = vmul.f32 0.0125, %v2027_v24 }
 0xd13   :  { %v2030_v21 = vpop.xlane.xlu1 %2029 }
 0xd14   :  { %v2065_v32 = vadd.f32 1e-05, %v2055_v59  ;;  %v2056_v28 = vmul.f32 0.0125, %v2030_v21 }
 0xd16   :  { %5367 = vrsqrt.f32 %v2065_v32  ;;  %v2066_v11 = vadd.f32 1e-05, %v2056_v28 }
 0xd18   :  { %5369 = vrsqrt.f32 %v2066_v11 }
 0xd19   :  { %v2033_v54 = vpop.xlane.xlu0 %2032 }
 0xd1a   :  { %v2057_v36 = vmul.f32 0.0125, %v2033_v54 }
 0xd1b   :  { %v2036_v48 = vpop.xlane.xlu1 %2035 }
 0xd1c   :  { %v2067_v37 = vadd.f32 1e-05, %v2057_v36  ;;  %v2058_v31 = vmul.f32 0.0125, %v2036_v48 }
 0xd1e   :  { %5371 = vrsqrt.f32 %v2067_v37  ;;  %v2068_v45 = vadd.f32 1e-05, %v2058_v31 }
 0xd20   :  { %v5368_v27 = vpop.eup %5367  ;;  %5373 = vrsqrt.f32 %v2068_v45 }
 0xd21   :  { %v2085_v50 = vmul.f32 %v5368_v27, %v6666_v35  ;;  %v2039_v42 = vpop.xlane.xlu0 %2038 }
 0xd22   :  { %v5370_v56 = vpop.eup %5369  ;;  %v2059_v44 = vmul.f32 0.0125, %v2039_v42 }
 0xd23   :  { %v2101_v16 = vmul.f32 %v6756_v4, %v2085_v50  ;;  %v2086_v18 = vmul.f32 %v5370_v56, %v6669_v14  ;;  %v2042_v52 = vpop.xlane.xlu1 %2041 }
 0xd24   :  { %v2069_v17 = vadd.f32 1e-05, %v2059_v44  ;;  %v2060_v7 = vmul.f32 0.0125, %v2042_v52 }
 0xd25   :  { %v2102_v26 = vmul.f32 %v6756_v4, %v2086_v18  ;;  %v6768_v35 = vadd.f32 %v6764_v61, %v2101_v16 }
 0xd26   :  { %5375 = vrsqrt.f32 %v2069_v17  ;;  %v2070_v58 = vadd.f32 1e-05, %v2060_v7 }
 0xd27   :  { %v6771_v29 = vadd.f32 %v6764_v61, %v2102_v26 }
 0xd28   :  { %v5372_v12 = vpop.eup %5371  ;;  %5377 = vrsqrt.f32 %v2070_v58 }
 0xd29   :  { %v2127_v14 = vpack.c.bf16 %v6771_v29, %v6768_v35  ;;  %v2087_v47 = vmul.f32 %v5372_v12, %v6678_v23 }
 0xd2a   :  { %v5374_v38 = vpop.eup %5373 }
 0xd2b   :  { %v2088_v62 = vmul.f32 %v5374_v38, %v6680_v15  ;;  %4324 = vmatmul.mubr.msk.bf16.vlgmr.msra.gmra.mrb[100].mxu0 %vm324_vm3, %v2127_v14  ;;  %v2103_v5 = vmul.f32 %v6756_v4, %v2087_v47 }
 0xd2c   :  { %2263 = vmatprep.mubr.bf16.mxu0 %v5596_v30 }
 0xd2d   :  { %v2104_v49 = vmul.f32 %v6756_v4, %v2088_v62  ;;  %v6782_v41 = vadd.f32 %v6764_v61, %v2103_v5 }
 0xd2f   :  { %v6785_v19 = vadd.f32 %v6764_v61, %v2104_v49 }
 0xd30   :  { %v5376_v51 = vpop.eup %5375 }
 0xd31   :  { %v2128_v23 = vpack.c.bf16 %v6785_v19, %v6782_v41  ;;  %v2089_v15 = vmul.f32 %v5376_v51, %v6688_v43 }
 0xd32   :  { %v5378_v10 = vpop.eup %5377 }
 0xd33   :  { %v2090_v33 = vmul.f32 %v5378_v10, %v6690_v57  ;;  %4325 = vmatmul.mubr.msk.bf16.gmra.mrb[104].mxu0 %vm324_vm3, %v2128_v23  ;;  %v2105_v55 = vmul.f32 %v6756_v4, %v2089_v15 }
 0xd34   :  { %2273 = vmatprep.mubr.bf16.mxu0 %v5596_v30 }
 0xd35   :  { %v2106_v25 = vmul.f32 %v6756_v4, %v2090_v33  ;;  %v6796_v20 = vadd.f32 %v6764_v61, %v2105_v55 }
 0xd37   :  { %v6799_v63 = vadd.f32 %v6764_v61, %v2106_v25 }
 0xd39   :  { %v2129_v43 = vpack.c.bf16 %v6799_v63, %v6796_v20 }
 0xd3b   :  { %4326 = vmatmul.mubr.msk.bf16.gmra.mrb[108].mxu0 %vm324_vm3, %v2129_v43 }
 0xd3c   :  { %2283 = vmatprep.mubr.bf16.mxu0 %v5596_v30 }
 0xd4a   :  { %v2045_v57 = vpop.xlane.xlu0 %2044 }
 0xd4b   :  { %v2061_v1 = vmul.f32 0.0125, %v2045_v57 }
 0xd4c   :  { %v2048_v39 = vpop.xlane.xlu1 %2047 }
 0xd4d   :  { %v2071_v40 = vadd.f32 1e-05, %v2061_v1  ;;  %v2062_v22 = vmul.f32 0.0125, %v2048_v39 }
 0xd4f   :  { %5379 = vrsqrt.f32 %v2071_v40  ;;  %v2072_v46 = vadd.f32 1e-05, %v2062_v22 }
 0xd51   :  { %5381 = vrsqrt.f32 %v2072_v46 }
 0xd52   :  { %v2051_v60 = vpop.xlane.xlu0 %2050 }
 0xd53   :  { %v2063_v2 = vmul.f32 0.0125, %v2051_v60 }
 0xd54   :  { %v2054_v53 = vpop.xlane.xlu1 %2053 }
 0xd55   :  { %v2073_v24 = vadd.f32 1e-05, %v2063_v2  ;;  %v2064_v59 = vmul.f32 0.0125, %v2054_v53 }
 0xd57   :  { %5383 = vrsqrt.f32 %v2073_v24  ;;  %v2074_v21 = vadd.f32 1e-05, %v2064_v59 }
 0xd59   :  { %v5380_v32 = vpop.eup %5379  ;;  %5385 = vrsqrt.f32 %v2074_v21 }
 0xd5a   :  { %v2091_v28 = vmul.f32 %v5380_v32, %v6730_v9 }
 0xd5b   :  { %v5382_v11 = vpop.eup %5381 }
 0xd5c   :  { %v2092_v54 = vmul.f32 %v5382_v11, %v6733_v34  ;;  %v2107_v36 = vmul.f32 %v6756_v4, %v2091_v28 }
 0xd5e   :  { %v2108_v48 = vmul.f32 %v6756_v4, %v2092_v54  ;;  %v6810_v37 = vadd.f32 %v6764_v61, %v2107_v36 }
 0xd60   :  { %v6813_v31 = vadd.f32 %v6764_v61, %v2108_v48 }
 0xd61   :  { %v5384_v45 = vpop.eup %5383 }
 0xd62   :  { %v2130_v27 = vpack.c.bf16 %v6813_v31, %v6810_v37  ;;  %v2093_v50 = vmul.f32 %v5384_v45, %v6742_v3 }
 0xd63   :  { %v5386_v9 = vpop.eup %5385 }
 0xd64   :  { %v2094_v42 = vmul.f32 %v5386_v9, %v6745_v13  ;;  %4327 = vmatmul.mubr.msk.bf16.gmra.mrb[112].mxu0 %vm324_vm3, %v2130_v27  ;;  %v2109_v34 = vmul.f32 %v6756_v4, %v2093_v50  ;;  %v4313_v13 = vld [vmem:[%s7740_s6 + $0x2] sm:$0x3] }
 0xd65   :  { %2293 = vmatprep.mubr.bf16.mxu0 %v5596_v30  ;;  %v2153_v52 = vrot.slane %v4313_v13, %v5874_v8 }
 0xd66   :  { %v2110_v56 = vmul.f32 %v6756_v4, %v2094_v42  ;;  %v6824_v44 = vadd.f32 %v6764_v61, %v2109_v34  ;;  %v2149_v4 = vrot.slane %v4313_v13, %v5869_v6 }
 0xd68   :  { %v6827_v16 = vadd.f32 %v6764_v61, %v2110_v56 }
 0xd6a   :  { %v2131_v3 = vpack.c.bf16 %v6827_v16, %v6824_v44 }
 0xd6c   :  { %4328 = vmatmul.mubr.msk.bf16.gmra.mrb[116].mxu0 %vm324_vm3, %v2131_v3 }
 0xd6d   :  { %4930 = vmatprep.mubr.msk.bf16.mxu0 %vm5595_vm0, %v5594_v0 }
 0xdfe   :  { %v2255_v18 = vpop.f32.mrb[100].mxu0 }
 0xdff   :  { %v2257_v17 = vpop.f32.mrb[101].mxu0  ;;  %v2256_v7 = vadd.f32 %v2255_v18, %v2149_v4 }
 0xe00   :  { %v2259_v61 = vpop.f32.mrb[102].mxu0  ;;  %v2258_v12 = vadd.f32 %v2257_v17, %v2153_v52 }
 0xe01   :  { %v2260_v26 = vadd.f32 %v2259_v61, %v2149_v4  ;;  %v2261_v58 = vpop.f32.mrb[103].mxu0 }
 0xe02   :  { %v2262_v14 = vadd.f32 %v2261_v58, %v2153_v52 }
 0xe03   :  { %v6839_v47 = vpack.c.bf16 %v2260_v26, %v2256_v7 }
 0xe04   :  { %v6841_v38 = vpack.c.bf16 %v2262_v14, %v2258_v12 }
 0xe05   :  { %2316 = vrot.lane.b32.xlu0 %v6839_v47, %s5597_s22 }
 0xe06   :  { %v2265_v62 = vpop.f32.mrb[104].mxu0 }
 0xe07   :  { %v2267_v5 = vpop.f32.mrb[105].mxu0  ;;  %v2266_v51 = vadd.f32 %v2265_v62, %v2149_v4 }
 0xe08   :  { %v2269_v49 = vpop.f32.mrb[106].mxu0  ;;  %v2268_v10 = vadd.f32 %v2267_v5, %v2153_v52 }
 0xe09   :  { %v2270_v23 = vadd.f32 %v2269_v49, %v2149_v4  ;;  %v2271_v15 = vpop.f32.mrb[107].mxu0 }
 0xe0a   :  { %v2272_v33 = vadd.f32 %v2271_v15, %v2153_v52  ;;  %v6906_v15 = vld [vmem:[%s7766_s23] sm:$0xff] }
 0xe0b   :  { %v6845_v55 = vpack.c.bf16 %v2270_v23, %v2266_v51 }
 0xe0c   :  { %v6847_v25 = vpack.c.bf16 %v2272_v33, %v2268_v10 }
 0xe0d   :  { %2318 = vrot.lane.b32.xlu1 %v6845_v55, %s5597_s22 }
 0xe0e   :  { %v2275_v43 = vpop.f32.mrb[108].mxu0 }
 0xe0f   :  { %v2277_v57 = vpop.f32.mrb[109].mxu0  ;;  %v2276_v39 = vadd.f32 %v2275_v43, %v2149_v4  ;;  %v6914_v43 = vld [vmem:[%s7766_s23 + $0x8] sm:$0xff] }
 0xe10   :  { %v2279_v1 = vpop.f32.mrb[110].mxu0  ;;  %v2278_v46 = vadd.f32 %v2277_v57, %v2153_v52 }
 0xe11   :  { %v2280_v40 = vadd.f32 %v2279_v1, %v2149_v4  ;;  %v2281_v22 = vpop.f32.mrb[111].mxu0 }
 0xe12   :  { %v2282_v60 = vadd.f32 %v2281_v22, %v2153_v52 }
 0xe13   :  { %v2308_v2 = vpack.c.bf16 %v2280_v40, %v2276_v39 }
 0xe14   :  { %v6851_v53 = vpack.c.bf16 %v2282_v60, %v2278_v46  ;;  %v6923_v46 = vld [vmem:[%s7766_s23 + $0x10] sm:$0xff] }
 0xe15   :  { %2320 = vrot.lane.b32.xlu1 %v2308_v2, %s5597_s22 }
 0xe37   :  { %v2285_v24 = vpop.f32.mrb[112].mxu0 }
 0xe38   :  { %v2287_v59 = vpop.f32.mrb[113].mxu0  ;;  %v2286_v32 = vadd.f32 %v2285_v24, %v2149_v4 }
 0xe39   :  { %v2289_v21 = vpop.f32.mrb[114].mxu0  ;;  %v2288_v54 = vadd.f32 %v2287_v59, %v2153_v52  ;;  %v6929_v59 = vld [vmem:[%s7766_s23 + $0x18] sm:$0xff] }
 0xe3a   :  { %v2290_v28 = vadd.f32 %v2289_v21, %v2149_v4  ;;  %v2291_v11 = vpop.f32.mrb[115].mxu0 }
 0xe3b   :  { %v2292_v36 = vadd.f32 %v2291_v11, %v2153_v52 }
 0xe3c   :  { %v6854_v48 = vpack.c.bf16 %v2290_v28, %v2286_v32 }
 0xe3d   :  { %v6856_v45 = vpack.c.bf16 %v2292_v36, %v2288_v54  ;;  %v6937_v36 = vld [vmem:[%s7766_s23 + $0x20] sm:$0xff] }
 0xe3e   :  { %2322 = vrot.lane.b32.xlu1 %v6854_v48, %s5597_s22 }
 0xe3f   :  { %v2295_v27 = vpop.f32.mrb[116].mxu0 }
 0xe40   :  { %v2297_v50 = vpop.f32.mrb[117].mxu0  ;;  %v2296_v42 = vadd.f32 %v2295_v27, %v2149_v4 }
 0xe41   :  { %v2299_v9 = vpop.f32.mrb[118].mxu0  ;;  %v2298_v3 = vadd.f32 %v2297_v50, %v2153_v52 }
 0xe42   :  { %v2300_v34 = vadd.f32 %v2299_v9, %v2149_v4  ;;  %2544 = vrot.lane.b32.xlu1 %v6839_v47, %s5598_s2  ;;  %v2301_v56 = vpop.f32.mrb[119].mxu0 }
 0xe43   :  { %v2302_v13 = vadd.f32 %v2301_v56, %v2153_v52 }
 0xe44   :  { %v6862_v18 = vpack.c.bf16 %v2300_v34, %v2296_v42  ;;  %v6945_v42 = vld [vmem:[%s7766_s23 + $0x28] sm:$0xff] }
 0xe45   :  { %v6864_v17 = vpack.c.bf16 %v2302_v13, %v2298_v3 }
 0xe46   :  { %2548 = vrot.lane.b32.xlu1 %v2308_v2, %s5598_s2  ;;  %2324 = vrot.lane.b32.xlu0 %v6862_v18, %s5597_s22 }
 0xe4a   :  { %2546 = vrot.lane.b32.xlu0 %v6845_v55, %s5598_s2 }
 0xe77   :  { %v2317_v61 = vpop.permute.xlu0 %2316 }
 0xe78   :  { %v2342_v4 = vsel %vm154_vm2, %v2317_v61, 0 }
 0xe79   :  { %4891 = vmatpush3.bf16.xpose.msra.mxu1 %v2342_v4  ;;  %v6954_v4 = vld [vmem:[%s7766_s23 + $0x30] sm:$0xff] }
 0xe7a   :  { %4892 = vmatprep.subr.bf16.mxu1 %v5594_v0 }
 0xe7f   :  { %v2319_v7 = vpop.permute.xlu1 %2318 }
 0xe80   :  { %v2345_v52 = vsel %vm154_vm2, %v2319_v7, 0 }
 0xe81   :  { %4893 = vmatpush3.bf16.xpose.msra.mxu1 %v2345_v52 }
 0xe82   :  { %4894 = vmatprep.subr.bf16.mxu1 %v5594_v0 }
 0xe87   :  { %v2321_v26 = vpop.permute.xlu1 %2320 }
 0xe88   :  { %v2348_v58 = vsel %vm154_vm2, %v2321_v26, 0 }
 0xe89   :  { %4895 = vmatpush3.bf16.xpose.msra.mxu1 %v2348_v58  ;;  %v6962_v58 = vld [vmem:[%s7766_s23 + $0x38] sm:$0xff] }
 0xe8a   :  { %4896 = vmatprep.subr.bf16.mxu1 %v5594_v0 }
 0xeb0   :  { %v2323_v12 = vpop.permute.xlu1 %2322 }
 0xeb1   :  { %v2351_v14 = vsel %vm154_vm2, %v2323_v12, 0 }
 0xeb2   :  { %4897 = vmatpush3.bf16.xpose.msra.mxu1 %v2351_v14 }
 0xeb3   :  { %4898 = vmatprep.subr.bf16.mxu1 %v5594_v0 }
 0xeb4   :  { %v2545_v62 = vpop.permute.xlu1 %2544 }
 0xeb5   :  { %4921 = vmatpush3.bf16.msra.mxu0 %v2545_v62 }
 0xeb6   :  { %4922 = vmatprep.subr.bf16.mxu0 %v5594_v0 }
 0xeb8   :  { %v2325_v5 = vpop.permute.xlu0 %2324  ;;  %v2549_v23 = vpop.permute.xlu1 %2548 }
 0xeb9   :  { %v2354_v49 = vsel %vm154_vm2, %v2325_v5, 0 }
 0xeba   :  { %4899 = vmatpush3.bf16.xpose.msra.mxu1 %v2354_v49 }
 0xebb   :  { %4950 = vmatprep.subr.bf16.mxu1 %v5594_v0 }
 0xebc   :  { %v2547_v51 = vpop.permute.xlu0 %2546 }
 0xebd   :  { %4923 = vmatpush3.bf16.msra.mxu0 %v2547_v51  ;;  %v6971_v51 = vld [vmem:[%s7766_s23 + $0x40] sm:$0xff] }
 0xebe   :  { %4924 = vmatprep.subr.bf16.mxu0 %v5594_v0 }
 0xec1   :  { %4901 = vmatmul.mubr.msk.bf16.vlgmr.msra.gmra.mrb[100].mxu1 %vm154_vm2, %v6839_v47  ;;  %4925 = vmatpush3.bf16.msra.mxu0 %v2549_v23 }
 0xec2   :  { %4904 = vmatprep.mubr.msk.bf16.mxu1 %vm5595_vm0, %v5594_v0  ;;  %4926 = vmatprep.subr.bf16.mxu0 %v5594_v0 }
 0xec9   :  { %4905 = vmatmul.mubr.msk.bf16.gmra.mrb[104].mxu1 %vm154_vm2, %v6845_v55 }
 0xeca   :  { %4908 = vmatprep.mubr.msk.bf16.mxu1 %vm5595_vm0, %v5594_v0 }
 0xed1   :  { %4909 = vmatmul.mubr.msk.bf16.gmra.mrb[108].mxu1 %vm154_vm2, %v2308_v2 }
 0xed2   :  { %4912 = vmatprep.mubr.msk.bf16.mxu1 %vm5595_vm0, %v5594_v0 }
 0xed9   :  { %4913 = vmatmul.mubr.msk.bf16.gmra.mrb[112].mxu1 %vm154_vm2, %v6854_v48 }
 0xeda   :  { %4916 = vmatprep.mubr.msk.bf16.mxu1 %vm5595_vm0, %v5594_v0 }
 0xee1   :  { %4917 = vmatmul.mubr.msk.bf16.gmra.mrb[116].mxu1 %vm154_vm2, %v6862_v18 }
 0xee2   :  { %4956 = vmatprep.mubr.msk.bf16.mxu1 %vm5595_vm0, %v5594_v0 }
 0xf94   :  { %v2390_v47 = vpop.f32.mrb[100].mxu1 }
 0xf95   :  { %v6909_v10 = vadd.f32 %v6906_v15, %v2390_v47  ;;  %v4902_v33 = vpop.f32.mrb[101].mxu1 }
 0xf96   :  { %v2393_v55 = vpop.f32.mrb[102].mxu1 }
 0xf97   :  { %v2394_v57 = vadd.f32 %v6914_v43, %v2393_v55  ;;  %v4903_v1 = vpop.f32.mrb[103].mxu1  ;;  %v2429_v39 = vsel %vm324_vm3, %v6909_v10, -inf  ;;  %v6977_v55 = vld [vmem:[%s7766_s23 + $0x48] sm:$0xff] }
 0xf98   :  { %2430 = vmax.xlane.f32.xlu1 %v2429_v39 }
 0xf99   :  { %v2432_v40 = vsel %vm324_vm3, %v2394_v57, -inf }
 0xf9a   :  { %2433 = vmax.xlane.f32.xlu0 %v2432_v40 }
 0xf9c   :  { %v2398_v22 = vpop.f32.mrb[104].mxu1 }
 0xf9d   :  { %v2399_v60 = vadd.f32 %v6923_v46, %v2398_v22  ;;  %v4906_v2 = vpop.f32.mrb[105].mxu1 }
 0xf9e   :  { %v2401_v24 = vpop.f32.mrb[106].mxu1 }
 0xf9f   :  { %v2402_v21 = vadd.f32 %v6929_v59, %v2401_v24  ;;  %v4907_v32 = vpop.f32.mrb[107].mxu1  ;;  %v2435_v28 = vsel %vm324_vm3, %v2399_v60, -inf }
 0xfa0   :  { %2436 = vmax.xlane.f32.xlu0 %v2435_v28 }
 0xfa1   :  { %v2438_v11 = vsel %vm324_vm3, %v2402_v21, -inf }
 0xfa4   :  { %2439 = vmax.xlane.f32.xlu0 %v2438_v11  ;;  %v2406_v54 = vpop.f32.mrb[108].mxu1 }
 0xfa5   :  { %v6940_v27 = vadd.f32 %v6937_v36, %v2406_v54  ;;  %v4910_v50 = vpop.f32.mrb[109].mxu1 }
 0xfa6   :  { %v2409_v9 = vpop.f32.mrb[110].mxu1 }
 0xfa7   :  { %v2410_v34 = vadd.f32 %v6945_v42, %v2409_v9  ;;  %v4911_v56 = vpop.f32.mrb[111].mxu1  ;;  %v2441_v3 = vsel %vm324_vm3, %v6940_v27, -inf }
 0xfa8   :  { %2442 = vmax.xlane.f32.xlu1 %v2441_v3 }
 0xfa9   :  { %v2444_v13 = vsel %vm324_vm3, %v2410_v34, -inf }
 0xfaa   :  { %2445 = vmax.xlane.f32.xlu0 %v2444_v13 }
 0xfac   :  { %v2414_v61 = vpop.f32.mrb[112].mxu1 }
 0xfad   :  { %v6957_v7 = vadd.f32 %v6954_v4, %v2414_v61  ;;  %v4914_v52 = vpop.f32.mrb[113].mxu1 }
 0xfae   :  { %v2417_v26 = vpop.f32.mrb[114].mxu1 }
 0xfaf   :  { %v2418_v12 = vadd.f32 %v6962_v58, %v2417_v26  ;;  %v4915_v14 = vpop.f32.mrb[115].mxu1  ;;  %v2447_v62 = vsel %vm324_vm3, %v6957_v7, -inf }
 0xfb0   :  { %2448 = vmax.xlane.f32.xlu1 %v2447_v62 }
 0xfb1   :  { %v2450_v5 = vsel %vm324_vm3, %v2418_v12, -inf }
 0xfb2   :  { %2451 = vmax.xlane.f32.xlu0 %v2450_v5 }
 0xfb4   :  { %v2422_v49 = vpop.f32.mrb[116].mxu1 }
 0xfb5   :  { %v2423_v23 = vadd.f32 %v6971_v51, %v2422_v49  ;;  %v4918_v47 = vpop.f32.mrb[117].mxu1 }
 0xfb6   :  { %v2425_v33 = vpop.f32.mrb[118].mxu1 }
 0xfb7   :  { %v2426_v1 = vadd.f32 %v6977_v55, %v2425_v33  ;;  %v4919_v39 = vpop.f32.mrb[119].mxu1  ;;  %v2453_v40 = vsel %vm324_vm3, %v2423_v23, -inf }
 0xfb8   :  { %2454 = vmax.xlane.f32.xlu1 %v2453_v40 }
 0xfb9   :  { %v2456_v22 = vsel %vm324_vm3, %v2426_v1, -inf }
 0xfba   :  { %2457 = vmax.xlane.f32.xlu0 %v2456_v22 }
 0xfc9   :  { %2550 = vrot.lane.b32.xlu1 %v6854_v48, %s5598_s2 }
 0xfd0   :  { %2552 = vrot.lane.b32.xlu0 %v6862_v18, %s5598_s2 }
0x1025   :  { %v2431_v2 = vpop.xlane.xlu1 %2430 }
0x1026   :  { %v2459_v24 = vsub.f32 %v6909_v10, %v2431_v2 }
0x1027   :  { %v2434_v32 = vpop.xlane.xlu0 %2433 }
0x1028   :  { %v2469_v28 = vmul.f32 1.442695, %v2459_v24  ;;  %v2460_v11 = vsub.f32 %v2394_v57, %v2434_v32 }
0x102a   :  { %5387 = vpow2.f32 %v2469_v28  ;;  %v2471_v54 = vmul.f32 1.442695, %v2460_v11 }
0x102c   :  { %5389 = vpow2.f32 %v2471_v54 }
0x102d   :  { %v2437_v50 = vpop.xlane.xlu0 %2436 }
0x102e   :  { %v2461_v9 = vsub.f32 %v2399_v60, %v2437_v50 }
0x1030   :  { %v2473_v56 = vmul.f32 1.442695, %v2461_v9 }
0x1031   :  { %v2440_v3 = vpop.xlane.xlu0 %2439 }
0x1032   :  { %5391 = vpow2.f32 %v2473_v56  ;;  %v2462_v13 = vsub.f32 %v2402_v21, %v2440_v3 }
0x1034   :  { %v6987_v61 = vpop.eup %5387  ;;  %v2475_v48 = vmul.f32 1.442695, %v2462_v13 }
0x1035   :  { %v2489_v18 = vsel %vm324_vm3, %v6987_v61, 0.0  ;;  %v2443_v21 = vpop.xlane.xlu1 %2442 }
0x1036   :  { %v6991_v52 = vpop.eup %5389  ;;  %5393 = vpow2.f32 %v2475_v48  ;;  %2490 = vadd.xlane.f32.xlu1 %v2489_v18 }
0x1037   :  { %v2446_v10 = vpop.xlane.xlu0 %2445  ;;  %v2492_v57 = vsel %vm324_vm3, %v6991_v52, 0.0 }
0x1038   :  { %v2464_v26 = vsub.f32 %v2410_v34, %v2446_v10  ;;  %2493 = vadd.xlane.f32.xlu0 %v2492_v57 }
0x103a   :  { %v2479_v60 = vmul.f32 1.442695, %v2464_v26 }
0x103c   :  { %v6995_v14 = vpop.eup %5391  ;;  %5395 = vpow2.f32 %v2479_v60 }
0x103d   :  { %v2495_v62 = vsel %vm324_vm3, %v6995_v14, 0.0  ;;  %v2449_v33 = vpop.xlane.xlu1 %2448 }
0x103e   :  { %2496 = vadd.xlane.f32.xlu0 %v2495_v62  ;;  %v2465_v18 = vsub.f32 %v6957_v7, %v2449_v33  ;;  %v5230_v7 = vld [vmem:[#allocation4 + $0x28] sm:$0xff]   ;;  %v5231_v62 = vld [vmem:[#allocation4 + $0x30] sm:$0xff]  }
0x103f   :  { %v2452_v5 = vpop.xlane.xlu0 %2451  ;;  %4951 = vmatpush3.bf16.msra.mxu1 %v5230_v7 }
0x1040   :  { %v6999_v49 = vpop.eup %5393  ;;  %v2466_v47 = vsub.f32 %v2418_v12, %v2452_v5  ;;  %v2481_v57 = vmul.f32 1.442695, %v2465_v18  ;;  %4952 = vmatprep.subr.bf16.mxu1 %v5594_v0 }
0x1041   :  { %v2498_v39 = vsel %vm324_vm3, %v6999_v49, 0.0 }
0x1042   :  { %v2483_v40 = vmul.f32 1.442695, %v2466_v47  ;;  %2499 = vadd.xlane.f32.xlu0 %v2498_v39 }
0x1043   :  { %4953 = vmatpush3.bf16.msra.mxu1 %v5231_v62 }
0x1044   :  { %5397 = vpow2.f32 %v2483_v40  ;;  %4954 = vmatprep.subr.bf16.mxu1 %v5594_v0 }
0x1045   :  { %v2455_v34 = vpop.xlane.xlu1 %2454 }
0x1046   :  { %v7003_v22 = vpop.eup %5395  ;;  %v2467_v2 = vsub.f32 %v2423_v23, %v2455_v34 }
0x1047   :  { %2790 = vrot.lane.b32.xlu1 %v6841_v38, %s5597_s22  ;;  %v2458_v24 = vpop.xlane.xlu0 %2457  ;;  %v2504_v32 = vsel %vm324_vm3, %v7003_v22, 0.0 }
0x1048   :  { %v2485_v28 = vmul.f32 1.442695, %v2467_v2  ;;  %v2468_v12 = vsub.f32 %v2426_v1, %v2458_v24  ;;  %2505 = vadd.xlane.f32.xlu0 %v2504_v32  ;;  %v2463_v1 = vsub.f32 %v6940_v27, %v2443_v21 }
0x1049   :  { %v2551_v11 = vpop.permute.xlu1 %2550 }
0x104a   :  { %5399 = vpow2.f32 %v2485_v28  ;;  %v2487_v54 = vmul.f32 1.442695, %v2468_v12  ;;  %4927 = vmatpush3.bf16.msra.mxu0 %v2551_v11  ;;  %v2477_v48 = vmul.f32 1.442695, %v2463_v1 }
0x104b   :  { %4928 = vmatprep.subr.bf16.mxu0 %v5594_v0  ;;  %v2553_v50 = vpop.permute.xlu0 %2552 }
0x104c   :  { %5401 = vpow2.f32 %v2487_v54 }
0x104d   :  { %5403 = vpow2.f32 %v2477_v48 }
0x104e   :  { %v7010_v9 = vpop.eup %5397  ;;  %4929 = vmatpush3.bf16.msra.mxu0 %v2553_v50  ;;  %5405 = vpow2.f32 %v2481_v57 }
0x104f   :  { %v2510_v23 = vsel %vm324_vm3, %v7010_v9, 0.0  ;;  %4976 = vmatprep.subr.bf16.mxu0 %v5594_v0 }
0x1050   :  { %2511 = vadd.xlane.f32.xlu0 %v2510_v23 }
0x1054   :  { %v7015_v56 = vpop.eup %5399 }
0x1055   :  { %v2513_v3 = vsel %vm324_vm3, %v7015_v56, 0.0 }
0x1056   :  { %v7020_v13 = vpop.eup %5401  ;;  %2514 = vadd.xlane.f32.xlu0 %v2513_v3 }
0x1057   :  { %v2516_v10 = vsel %vm324_vm3, %v7020_v13, 0.0  ;;  %v7025_v26 = vpop.eup %5403 }
0x1058   :  { %v2501_v27 = vsel %vm324_vm3, %v7025_v26, 0.0  ;;  %v7029_v60 = vpop.eup %5405 }
0x1059   :  { %v2507_v21 = vsel %vm324_vm3, %v7029_v60, 0.0 }
0x105a   :  { %2517 = vadd.xlane.f32.xlu0 %v2516_v10 }
0x106b   :  { %2502 = vadd.xlane.f32.xlu1 %v2501_v27 }
0x106f   :  { %2508 = vadd.xlane.f32.xlu1 %v2507_v21 }
0x1070   :  { %2792 = vrot.lane.b32.xlu0 %v6847_v25, %s5597_s22 }
0x1080   :  { %2794 = vrot.lane.b32.xlu1 %v6851_v53, %s5597_s22 }
0x1084   :  { %2796 = vrot.lane.b32.xlu1 %v6856_v45, %s5597_s22 }
0x1088   :  { %2798 = vrot.lane.b32.xlu1 %v6864_v17, %s5597_s22 }
0x108c   :  { %3018 = vrot.lane.b32.xlu1 %v6841_v38, %s5598_s2 }
0x10c3   :  { %v2491_v5 = vpop.xlane.xlu1 %2490 }
0x10c4   :  { %5407 = vrcp.f32 %v2491_v5 }
0x10c5   :  { %v2494_v47 = vpop.xlane.xlu0 %2493 }
0x10c6   :  { %5409 = vrcp.f32 %v2494_v47 }
0x10c7   :  { %v2791_v32 = vpop.permute.xlu1 %2790 }
0x10c8   :  { %v2816_v12 = vsel %vm154_vm2, %v2791_v32, 0 }
0x10cb   :  { %v2497_v33 = vpop.xlane.xlu0 %2496 }
0x10cc   :  { %5411 = vrcp.f32 %v2497_v33 }
0x10ce   :  { %v5408_v39 = vpop.eup %5407 }
0x10cf   :  { %v2500_v40 = vpop.xlane.xlu0 %2499  ;;  %v2529_v2 = vmul.f32 %v5408_v39, %v6987_v61 }
0x10d0   :  { %v5410_v34 = vpop.eup %5409  ;;  %5413 = vrcp.f32 %v2500_v40 }
0x10d1   :  { %v2530_v24 = vmul.f32 %v5410_v34, %v6991_v52 }
0x10d3   :  { %v2539_v28 = vpack.c.bf16 %v2530_v24, %v2529_v2 }
0x10d5   :  { %4931 = vmatmul.mubr.msk.bf16.vlgmr.msra.gmra.mrb[120].mxu0 %vm324_vm3, %v2539_v28  ;;  %v2506_v50 = vpop.xlane.xlu0 %2505 }
0x10d6   :  { %4977 = vmatpush3.bf16.xpose.msra.mxu0 %v2816_v12  ;;  %4934 = vmatprep.mubr.msk.bf16.mxu0 %vm5595_vm0, %v5594_v0  ;;  %v5412_v11 = vpop.eup %5411  ;;  %5415 = vrcp.f32 %v2506_v50 }
0x10d7   :  { %4978 = vmatprep.subr.bf16.mxu0 %v5594_v0  ;;  %v2531_v23 = vmul.f32 %v5412_v11, %v6995_v14 }
0x10da   :  { %v5414_v54 = vpop.eup %5413 }
0x10db   :  { %v2532_v61 = vmul.f32 %v5414_v54, %v6999_v49 }
0x10dd   :  { %v2540_v52 = vpack.c.bf16 %v2532_v61, %v2531_v23  ;;  %v2512_v1 = vpop.xlane.xlu0 %2511 }
0x10df   :  { %4935 = vmatmul.mubr.msk.bf16.gmra.mrb[124].mxu0 %vm324_vm3, %v2540_v52 }
0x10e0   :  { %4938 = vmatprep.mubr.msk.bf16.mxu0 %vm5595_vm0, %v5594_v0  ;;  %v5416_v27 = vpop.eup %5415 }
0x10e1   :  { %v2534_v5 = vmul.f32 %v5416_v27, %v7003_v22 }
0x10e3   :  { %v2515_v3 = vpop.xlane.xlu0 %2514 }
0x10e7   :  { %v2518_v48 = vpop.xlane.xlu0 %2517 }
0x10eb   :  { %v2793_v18 = vpop.permute.xlu0 %2792 }
0x10ec   :  { %v2819_v10 = vsel %vm154_vm2, %v2793_v18, 0 }
0x10ed   :  { %4979 = vmatpush3.bf16.xpose.msra.mxu0 %v2819_v10 }
0x10ee   :  { %4980 = vmatprep.subr.bf16.mxu0 %v5594_v0 }
0x10f8   :  { %v2503_v57 = vpop.xlane.xlu1 %2502 }
0x10f9   :  { %5417 = vrcp.f32 %v2503_v57 }
0x10fc   :  { %v2509_v14 = vpop.xlane.xlu1 %2508 }
0x10fd   :  { %5419 = vrcp.f32 %v2509_v14 }
0x10fe   :  { %5421 = vrcp.f32 %v2512_v1 }
0x10ff   :  { %5423 = vrcp.f32 %v2518_v48 }
0x1100   :  { %v2795_v49 = vpop.permute.xlu1 %2794  ;;  %5425 = vrcp.f32 %v2515_v3 }
0x1101   :  { %v2822_v21 = vsel %vm154_vm2, %v2795_v49, 0 }
0x1102   :  { %4981 = vmatpush3.bf16.xpose.msra.mxu0 %v2822_v21 }
0x1103   :  { %v5418_v7 = vpop.eup %5417  ;;  %4982 = vmatprep.subr.bf16.mxu0 %v5594_v0 }
0x1104   :  { %v2533_v62 = vmul.f32 %v5418_v7, %v7025_v26  ;;  %v2797_v47 = vpop.permute.xlu1 %2796 }
0x1105   :  { %v2825_v34 = vsel %vm154_vm2, %v2797_v47, 0 }
0x1106   :  { %v2541_v33 = vpack.c.bf16 %v2534_v5, %v2533_v62 }
0x1107   :  { %v5420_v39 = vpop.eup %5419 }
0x1108   :  { %4939 = vmatmul.mubr.msk.bf16.gmra.mrb[128].mxu0 %vm324_vm3, %v2541_v33  ;;  %v5422_v40 = vpop.eup %5421  ;;  %v2535_v2 = vmul.f32 %v5420_v39, %v7029_v60  ;;  %v2799_v26 = vpop.permute.xlu1 %2798 }
0x1109   :  { %4942 = vmatprep.mubr.msk.bf16.mxu0 %vm5595_vm0, %v5594_v0  ;;  %v2536_v22 = vmul.f32 %v5422_v40, %v7010_v9  ;;  %v5424_v32 = vpop.eup %5423  ;;  %v2828_v12 = vsel %vm154_vm2, %v2799_v26, 0  ;;  %v5232_v9 = vld [vmem:[#allocation4 + $0x38] ss:$0 sps:$4 sm:$0xff]  }
0x110a   :  { %4983 = vmatpush3.bf16.xpose.msra.mxu0 %v2825_v34  ;;  %v5426_v28 = vpop.eup %5425  ;;  %v2538_v11 = vmul.f32 %v5424_v32, %v7020_v13 }
0x110b   :  { %4984 = vmatprep.subr.bf16.mxu0 %v5594_v0  ;;  %v2542_v24 = vpack.c.bf16 %v2536_v22, %v2535_v2  ;;  %v2537_v60 = vmul.f32 %v5426_v28, %v7015_v56  ;;  %v2689_v56 = vsel %vm170_vm1, %v5232_v9, 0 }
0x110c   :  { %4955 = vmatpush3.bf16.msra.mxu1 %v2689_v56  ;;  %v3019_v52 = vpop.permute.xlu1 %3018 }
0x110d   :  { %v2543_v54 = vpack.c.bf16 %v2538_v11, %v2537_v60  ;;  %5006 = vmatprep.subr.bf16.mxu1 %v5594_v0 }
0x1110   :  { %4943 = vmatmul.mubr.msk.bf16.gmra.mrb[132].mxu0 %vm324_vm3, %v2542_v24 }
0x1111   :  { %4946 = vmatprep.mubr.msk.bf16.mxu0 %vm5595_vm0, %v5594_v0 }
0x1112   :  { %4985 = vmatpush3.bf16.xpose.msra.mxu0 %v2828_v12 }
0x1113   :  { %5036 = vmatprep.subr.bf16.mxu0 %v5594_v0 }
0x1118   :  { %4947 = vmatmul.mubr.msk.bf16.gmra.mrb[136].mxu0 %vm324_vm3, %v2543_v54 }
0x1119   :  { %4986 = vmatprep.mubr.msk.bf16.mxu0 %vm5595_vm0, %v5594_v0 }
0x1120   :  { %4987 = vmatmul.mubr.msk.bf16.vlgmr.msra.gmra.mrb[140].mxu0 %vm154_vm2, %v6841_v38 }
0x1121   :  { %4990 = vmatprep.mubr.msk.bf16.mxu0 %vm5595_vm0, %v5594_v0 }
0x1128   :  { %4991 = vmatmul.mubr.msk.bf16.gmra.mrb[144].mxu0 %vm154_vm2, %v6847_v25 }
0x1129   :  { %4994 = vmatprep.mubr.msk.bf16.mxu0 %vm5595_vm0, %v5594_v0 }
0x1130   :  { %4995 = vmatmul.mubr.msk.bf16.gmra.mrb[148].mxu0 %vm154_vm2, %v6851_v53 }
0x1131   :  { %4998 = vmatprep.mubr.msk.bf16.mxu0 %vm5595_vm0, %v5594_v0 }
0x1138   :  { %4999 = vmatmul.mubr.msk.bf16.gmra.mrb[152].mxu0 %vm154_vm2, %v6856_v45 }
0x1139   :  { %5002 = vmatprep.mubr.msk.bf16.mxu0 %vm5595_vm0, %v5594_v0 }
0x1140   :  { %5003 = vmatmul.mubr.msk.bf16.gmra.mrb[156].mxu0 %vm154_vm2, %v6864_v17 }
0x1141   :  { %5042 = vmatprep.mubr.msk.bf16.mxu0 %vm5595_vm0, %v5594_v0 }
0x11a8   :  { %v2608_v38 = vpop.f32.mrb[120].mxu0 }
0x11a9   :  { %v4932_v13 = vpop.f32.mrb[121].mxu0 }
0x11aa   :  { %v2611_v50 = vpop.f32.mrb[122].mxu0 }
0x11ab   :  { %v2647_v23 = vpack.c.bf16 %v2611_v50, %v2608_v38  ;;  %v4933_v61 = vpop.f32.mrb[123].mxu0 }
0x11ad   :  { %4957 = vmatmul.mubr.msk.bf16.vlgmr.msra.gmra.mrb[120].mxu1 %vm154_vm2, %v2647_v23 }
0x11ae   :  { %5007 = vmatpush3.bf16.msra.mxu1 %v3019_v52  ;;  %4960 = vmatprep.mubr.msk.bf16.mxu1 %vm5595_vm0, %v5594_v0 }
0x11af   :  { %5008 = vmatprep.subr.bf16.mxu1 %v5594_v0 }
0x11b2   :  { %v2616_v1 = vpop.f32.mrb[124].mxu0 }
0x11b3   :  { %v4936_v3 = vpop.f32.mrb[125].mxu0 }
0x11b4   :  { %v2619_v48 = vpop.f32.mrb[126].mxu0 }
0x11b5   :  { %v2648_v18 = vpack.c.bf16 %v2619_v48, %v2616_v1  ;;  %v4937_v10 = vpop.f32.mrb[127].mxu0 }
0x11b7   :  { %4961 = vmatmul.mubr.msk.bf16.gmra.mrb[124].mxu1 %vm154_vm2, %v2648_v18 }
0x11b8   :  { %4964 = vmatprep.mubr.msk.bf16.mxu1 %vm5595_vm0, %v5594_v0 }
0x11db   :  { %v2624_v57 = vpop.f32.mrb[128].mxu0 }
0x11dc   :  { %v4940_v14 = vpop.f32.mrb[129].mxu0 }
0x11dd   :  { %v2627_v49 = vpop.f32.mrb[130].mxu0 }
0x11de   :  { %v2649_v27 = vpack.c.bf16 %v2627_v49, %v2624_v57  ;;  %v4941_v21 = vpop.f32.mrb[131].mxu0 }
0x11e0   :  { %4965 = vmatmul.mubr.msk.bf16.gmra.mrb[128].mxu1 %vm154_vm2, %v2649_v27 }
0x11e1   :  { %4968 = vmatprep.mubr.msk.bf16.mxu1 %vm5595_vm0, %v5594_v0 }
0x11e3   :  { %v2632_v7 = vpop.f32.mrb[132].mxu0 }
0x11e4   :  { %v4944_v62 = vpop.f32.mrb[133].mxu0 }
0x11e5   :  { %v2635_v5 = vpop.f32.mrb[134].mxu0 }
0x11e6   :  { %v2650_v47 = vpack.c.bf16 %v2635_v5, %v2632_v7  ;;  %v4945_v33 = vpop.f32.mrb[135].mxu0 }
0x11e8   :  { %4969 = vmatmul.mubr.msk.bf16.gmra.mrb[132].mxu1 %vm154_vm2, %v2650_v47 }
0x11e9   :  { %4972 = vmatprep.mubr.msk.bf16.mxu1 %vm5595_vm0, %v5594_v0 }
0x11eb   :  { %v2640_v39 = vpop.f32.mrb[136].mxu0 }
0x11ec   :  { %v4948_v40 = vpop.f32.mrb[137].mxu0 }
0x11ed   :  { %v2643_v34 = vpop.f32.mrb[138].mxu0 }
0x11ee   :  { %v2651_v2 = vpack.c.bf16 %v2643_v34, %v2640_v39  ;;  %v4949_v22 = vpop.f32.mrb[139].mxu0 }
0x11f0   :  { %4973 = vmatmul.mubr.msk.bf16.gmra.mrb[136].mxu1 %vm154_vm2, %v2651_v2 }
0x11f1   :  { %5016 = vmatprep.mubr.msk.bf16.mxu1 %vm5595_vm0, %v5594_v0 }
0x11f3   :  { %v2864_v26 = vpop.f32.mrb[140].mxu0 }
0x11f4   :  { %v2865_v24 = vadd.f32 %v6906_v15, %v2864_v26  ;;  %v4988_v32 = vpop.f32.mrb[141].mxu0 }
0x11f5   :  { %v2867_v28 = vpop.f32.mrb[142].mxu0 }
0x11f6   :  { %v2868_v12 = vadd.f32 %v6914_v43, %v2867_v28  ;;  %v4989_v11 = vpop.f32.mrb[143].mxu0  ;;  %v2903_v60 = vsel %vm324_vm3, %v2865_v24, -inf }
0x11f7   :  { %2904 = vmax.xlane.f32.xlu1 %v2903_v60 }
0x11f8   :  { %v2906_v54 = vsel %vm324_vm3, %v2868_v12, -inf }
0x11f9   :  { %2907 = vmax.xlane.f32.xlu0 %v2906_v54 }
0x11fb   :  { %v2872_v9 = vpop.f32.mrb[144].mxu0 }
0x11fc   :  { %v2873_v56 = vadd.f32 %v6923_v46, %v2872_v9  ;;  %v4992_v38 = vpop.f32.mrb[145].mxu0 }
0x11fd   :  { %v2875_v13 = vpop.f32.mrb[146].mxu0 }
0x11fe   :  { %v2876_v50 = vadd.f32 %v6929_v59, %v2875_v13  ;;  %v4993_v23 = vpop.f32.mrb[147].mxu0  ;;  %v2909_v15 = vsel %vm324_vm3, %v2873_v56, -inf }
0x11ff   :  { %2910 = vmax.xlane.f32.xlu1 %v2909_v15 }
0x1200   :  { %v2912_v43 = vsel %vm324_vm3, %v2876_v50, -inf }
0x1201   :  { %2913 = vmax.xlane.f32.xlu0 %v2912_v43 }
0x1203   :  { %v2880_v61 = vpop.f32.mrb[148].mxu0 }
0x1204   :  { %v7127_v52 = vadd.f32 %v6937_v36, %v2880_v61  ;;  %v4996_v1 = vpop.f32.mrb[149].mxu0 }
0x1205   :  { %v2883_v3 = vpop.f32.mrb[150].mxu0 }
0x1206   :  { %v7130_v48 = vadd.f32 %v6945_v42, %v2883_v3  ;;  %v4997_v46 = vpop.f32.mrb[151].mxu0  ;;  %v2915_v59 = vsel %vm324_vm3, %v7127_v52, -inf }
0x1207   :  { %2916 = vmax.xlane.f32.xlu1 %v2915_v59 }
0x1208   :  { %v2918_v18 = vsel %vm324_vm3, %v7130_v48, -inf }
0x1209   :  { %2919 = vmax.xlane.f32.xlu0 %v2918_v18 }
0x120b   :  { %v2888_v10 = vpop.f32.mrb[152].mxu0 }
0x120c   :  { %v7137_v57 = vadd.f32 %v6954_v4, %v2888_v10  ;;  %v5000_v36 = vpop.f32.mrb[153].mxu0 }
0x120d   :  { %v2891_v14 = vpop.f32.mrb[154].mxu0 }
0x120e   :  { %v7140_v49 = vadd.f32 %v6962_v58, %v2891_v14  ;;  %v5001_v42 = vpop.f32.mrb[155].mxu0  ;;  %v2921_v27 = vsel %vm324_vm3, %v7137_v57, -inf }
0x120f   :  { %2922 = vmax.xlane.f32.xlu1 %v2921_v27 }
0x1210   :  { %v2924_v21 = vsel %vm324_vm3, %v7140_v49, -inf }
0x1211   :  { %2925 = vmax.xlane.f32.xlu0 %v2924_v21 }
0x1213   :  { %v2896_v7 = vpop.f32.mrb[156].mxu0 }
0x1214   :  { %v7147_v62 = vadd.f32 %v6971_v51, %v2896_v7  ;;  %v5004_v4 = vpop.f32.mrb[157].mxu0 }
0x1215   :  { %v2899_v5 = vpop.f32.mrb[158].mxu0 }
0x1216   :  { %v7150_v47 = vadd.f32 %v6977_v55, %v2899_v5  ;;  %v5005_v58 = vpop.f32.mrb[159].mxu0  ;;  %v2927_v33 = vsel %vm324_vm3, %v7147_v62, -inf }
0x1217   :  { %2928 = vmax.xlane.f32.xlu1 %v2927_v33 }
0x1218   :  { %v2930_v39 = vsel %vm324_vm3, %v7150_v47, -inf }
0x1219   :  { %2931 = vmax.xlane.f32.xlu0 %v2930_v39 }
0x1228   :  { %3022 = vrot.lane.b32.xlu1 %v6851_v53, %s5598_s2 }
0x122f   :  { %3020 = vrot.lane.b32.xlu0 %v6847_v25, %s5598_s2 }
0x1280   :  { %v7160_v51 = vpop.f32.mrb[120].mxu1 }
0x1281   :  { %v4958_v40 = vpop.f32.mrb[121].mxu1 }
0x1282   :  { %v7162_v55 = vpop.f32.mrb[122].mxu1 }
0x1283   :  { %v4959_v34 = vpop.f32.mrb[123].mxu1 }
0x1284   :  { %v2905_v2 = vpop.xlane.xlu1 %2904 }
0x1285   :  { %v2933_v22 = vsub.f32 %v2865_v24, %v2905_v2 }
0x1286   :  { %v2908_v26 = vpop.xlane.xlu0 %2907 }
0x1287   :  { %v2943_v32 = vmul.f32 1.442695, %v2933_v22  ;;  %v2934_v28 = vsub.f32 %v2868_v12, %v2908_v26 }
0x1289   :  { %5427 = vpow2.f32 %v2943_v32  ;;  %v2945_v11 = vmul.f32 1.442695, %v2934_v28 }
0x128a   :  { %v7164_v60 = vpop.f32.mrb[124].mxu1 }
0x128b   :  { %5429 = vpow2.f32 %v2945_v11  ;;  %v4962_v53 = vpop.f32.mrb[125].mxu1 }
0x128c   :  { %v7166_v54 = vpop.f32.mrb[126].mxu1  ;;  %v2911_v25 = vpop.xlane.xlu1 %2910 }
0x128d   :  { %v2935_v9 = vsub.f32 %v2873_v56, %v2911_v25  ;;  %v4963_v38 = vpop.f32.mrb[127].mxu1 }
0x128e   :  { %v2914_v13 = vpop.xlane.xlu0 %2913 }
0x128f   :  { %v2947_v23 = vmul.f32 1.442695, %v2935_v9  ;;  %v2936_v15 = vsub.f32 %v2876_v50, %v2914_v13 }
0x1291   :  { %5431 = vpow2.f32 %v2947_v23  ;;  %v2949_v43 = vmul.f32 1.442695, %v2936_v15 }
0x1293   :  { %v7168_v24 = vpop.eup %5427  ;;  %5433 = vpow2.f32 %v2949_v43 }
0x1294   :  { %v2917_v12 = vpop.xlane.xlu1 %2916  ;;  %v2963_v61 = vsel %vm324_vm3, %v7168_v24, 0.0 }
0x1295   :  { %v7172_v1 = vpop.eup %5429  ;;  %v2937_v3 = vsub.f32 %v7127_v52, %v2917_v12  ;;  %2964 = vadd.xlane.f32.xlu1 %v2963_v61 }
0x1296   :  { %v2920_v46 = vpop.xlane.xlu0 %2919  ;;  %v2966_v56 = vsel %vm324_vm3, %v7172_v1, 0.0 }
0x1297   :  { %v2951_v59 = vmul.f32 1.442695, %v2937_v3  ;;  %v2938_v50 = vsub.f32 %v7130_v48, %v2920_v46  ;;  %2967 = vadd.xlane.f32.xlu0 %v2966_v56 }
0x1299   :  { %5435 = vpow2.f32 %v2951_v59  ;;  %v2953_v18 = vmul.f32 1.442695, %v2938_v50 }
0x129b   :  { %v7178_v10 = vpop.eup %5431  ;;  %5437 = vpow2.f32 %v2953_v18  ;;  %v5234_v18 = vld [vmem:[#allocation4 + $0x44] sm:$0xff]  }
0x129c   :  { %v2923_v36 = vpop.xlane.xlu1 %2922  ;;  %v2969_v14 = vsel %vm324_vm3, %v7178_v10, 0.0 }
0x129d   :  { %v7182_v42 = vpop.eup %5433  ;;  %v2939_v52 = vsub.f32 %v7137_v57, %v2923_v36  ;;  %2970 = vadd.xlane.f32.xlu1 %v2969_v14 }
0x129e   :  { %v2972_v27 = vsel %vm324_vm3, %v7182_v42, 0.0  ;;  %v2926_v48 = vpop.xlane.xlu0 %2925 }
0x129f   :  { %v2955_v21 = vmul.f32 1.442695, %v2939_v52  ;;  %2973 = vadd.xlane.f32.xlu0 %v2972_v27  ;;  %v2940_v15 = vsub.f32 %v7140_v49, %v2926_v48 }
0x12a1   :  { %5439 = vpow2.f32 %v2955_v21  ;;  %v2957_v12 = vmul.f32 1.442695, %v2940_v15 }
0x12a3   :  { %v7187_v7 = vpop.eup %5435  ;;  %5441 = vpow2.f32 %v2957_v12 }
0x12a4   :  { %v2975_v4 = vsel %vm324_vm3, %v7187_v7, 0.0  ;;  %v2929_v33 = vpop.xlane.xlu1 %2928 }
0x12a5   :  { %v7191_v5 = vpop.eup %5437  ;;  %2976 = vadd.xlane.f32.xlu1 %v2975_v4  ;;  %v2941_v61 = vsub.f32 %v7147_v62, %v2929_v33 }
0x12a6   :  { %v2932_v58 = vpop.xlane.xlu0 %2931  ;;  %v2978_v57 = vsel %vm324_vm3, %v7191_v5, 0.0 }
0x12a7   :  { %2979 = vadd.xlane.f32.xlu0 %v2978_v57  ;;  %v2959_v3 = vmul.f32 1.442695, %v2941_v61  ;;  %v2942_v46 = vsub.f32 %v7150_v47, %v2932_v58  ;;  %v5233_v47 = vld [vmem:[#allocation4 + $0x3c] sm:$0xff]  }
0x12a8   :  { %v3023_v2 = vpop.permute.xlu1 %3022  ;;  %5037 = vmatpush3.bf16.msra.mxu0 %v5233_v47 }
0x12a9   :  { %5443 = vpow2.f32 %v2959_v3  ;;  %5038 = vmatprep.subr.bf16.mxu0 %v5594_v0 }
0x12aa   :  { %v3021_v39 = vpop.permute.xlu0 %3020 }
0x12ab   :  { %v7195_v40 = vpop.eup %5439  ;;  %5009 = vmatpush3.bf16.msra.mxu1 %v3021_v39 }
0x12ac   :  { %v2981_v34 = vsel %vm324_vm3, %v7195_v40, 0.0  ;;  %5010 = vmatprep.subr.bf16.mxu1 %v5594_v0  ;;  %5039 = vmatpush3.bf16.msra.mxu0 %v5234_v18 }
0x12ad   :  { %2982 = vadd.xlane.f32.xlu1 %v2981_v34  ;;  %v7220_v56 = vpop.eup %5441  ;;  %5040 = vmatprep.subr.bf16.mxu0 %v5594_v0 }
0x12af   :  { %5011 = vmatpush3.bf16.msra.mxu1 %v3023_v2 }
0x12b0   :  { %5012 = vmatprep.subr.bf16.mxu1 %v5594_v0 }
0x12b3   :  { %v7201_v22 = vpop.f32.mrb[128].mxu1  ;;  %v7224_v59 = vpop.eup %5443 }
0x12b4   :  { %v4966_v26 = vpop.f32.mrb[129].mxu1  ;;  %v2987_v49 = vsel %vm324_vm3, %v7224_v59, 0.0 }
0x12b5   :  { %v7203_v32 = vpop.f32.mrb[130].mxu1 }
0x12b6   :  { %v4967_v28 = vpop.f32.mrb[131].mxu1 }
0x12bb   :  { %v7205_v11 = vpop.f32.mrb[132].mxu1 }
0x12bc   :  { %v4970_v53 = vpop.f32.mrb[133].mxu1 }
0x12bd   :  { %v7207_v25 = vpop.f32.mrb[134].mxu1  ;;  %3024 = vrot.lane.b32.xlu0 %v6856_v45, %s5598_s2  ;;  %v2961_v45 = vmul.f32 1.442695, %v2942_v46 }
0x12be   :  { %v4971_v9 = vpop.f32.mrb[135].mxu1  ;;  %3026 = vrot.lane.b32.xlu1 %v6864_v17, %s5598_s2  ;;  %v2984_v17 = vsel %vm324_vm3, %v7220_v56, 0.0 }
0x12bf   :  { %5445 = vpow2.f32 %v2961_v45 }
0x12c3   :  { %v7213_v38 = vpop.f32.mrb[136].mxu1 }
0x12c4   :  { %v4974_v13 = vpop.f32.mrb[137].mxu1 }
0x12c5   :  { %v7215_v23 = vpop.f32.mrb[138].mxu1 }
0x12c6   :  { %v4975_v43 = vpop.f32.mrb[139].mxu1 }
0x12c9   :  { %v7228_v50 = vpop.eup %5445 }
0x12ca   :  { %v2990_v62 = vsel %vm324_vm3, %v7228_v50, 0.0 }
0x12dc   :  { %2985 = vadd.xlane.f32.xlu0 %v2984_v17 }
0x12e0   :  { %2988 = vadd.xlane.f32.xlu0 %v2987_v49 }
0x12e4   :  { %2991 = vadd.xlane.f32.xlu0 %v2990_v62 }
0x1322   :  { %v2965_v14 = vpop.xlane.xlu1 %2964 }
0x1324   :  { %v2968_v36 = vpop.xlane.xlu0 %2967 }
0x1325   :  { %5447 = vrcp.f32 %v2968_v36 }
0x1326   :  { %5449 = vrcp.f32 %v2965_v14 }
0x132a   :  { %v2971_v27 = vpop.xlane.xlu1 %2970 }
0x132c   :  { %v2974_v52 = vpop.xlane.xlu0 %2973 }
0x132d   :  { %5451 = vrcp.f32 %v2974_v52 }
0x132e   :  { %5453 = vrcp.f32 %v2971_v27 }
0x132f   :  { %v5448_v58 = vpop.eup %5447 }
0x1330   :  { %v5450_v33 = vpop.eup %5449  ;;  %v3004_v39 = vmul.f32 %v5448_v58, %v7172_v1 }
0x1331   :  { %v3003_v34 = vmul.f32 %v5450_v33, %v7168_v24 }
0x1332   :  { %v2977_v48 = vpop.xlane.xlu1 %2976 }
0x1333   :  { %v3013_v26 = vpack.c.bf16 %v3004_v39, %v3003_v34 }
0x1334   :  { %v2980_v21 = vpop.xlane.xlu0 %2979 }
0x1335   :  { %5455 = vrcp.f32 %v2980_v21 }
0x1336   :  { %5457 = vrcp.f32 %v2977_v48 }
0x1337   :  { %v5452_v28 = vpop.eup %5451 }
0x1338   :  { %v3025_v4 = vpop.permute.xlu0 %3024  ;;  %v5454_v53 = vpop.eup %5453  ;;  %v3006_v9 = vmul.f32 %v5452_v28, %v7182_v42 }
0x1339   :  { %5013 = vmatpush3.bf16.msra.mxu1 %v3025_v4  ;;  %v3005_v13 = vmul.f32 %v5454_v53, %v7178_v10 }
0x133a   :  { %v2983_v57 = vpop.xlane.xlu1 %2982  ;;  %5014 = vmatprep.subr.bf16.mxu1 %v5594_v0 }
0x133b   :  { %v3014_v15 = vpack.c.bf16 %v3006_v9, %v3005_v13  ;;  %5459 = vrcp.f32 %v2983_v57 }
0x133e   :  { %v3027_v2 = vpop.permute.xlu1 %3026 }
0x133f   :  { %5015 = vmatpush3.bf16.msra.mxu1 %v3027_v2  ;;  %v5456_v1 = vpop.eup %5455 }
0x1340   :  { %v5458_v24 = vpop.eup %5457  ;;  %v3008_v43 = vmul.f32 %v5456_v1, %v7191_v5 }
0x1341   :  { %v3007_v12 = vmul.f32 %v5458_v24, %v7187_v7 }
0x1342   :  { %5017 = vmatmul.mubr.msk.bf16.vlgmr.msra.gmra.mrb[140].mxu1 %vm324_vm3, %v3013_v26 }
0x1343   :  { %5020 = vmatprep.mubr.msk.bf16.mxu1 %vm5595_vm0, %v5594_v0  ;;  %v3015_v61 = vpack.c.bf16 %v3008_v43, %v3007_v12 }
0x1345   :  { %v5460_v46 = vpop.eup %5459 }
0x1346   :  { %v3009_v17 = vmul.f32 %v5460_v46, %v7195_v40  ;;  %v5235_v40 = vld [vmem:[#allocation4 + $0x4c] ss:$0 sps:$4 sm:$0xff]  }
0x134a   :  { %5021 = vmatmul.mubr.msk.bf16.gmra.mrb[144].mxu1 %vm324_vm3, %v3014_v15 }
0x134b   :  { %5024 = vmatprep.mubr.msk.bf16.mxu1 %vm5595_vm0, %v5594_v0 }
0x1352   :  { %5025 = vmatmul.mubr.msk.bf16.gmra.mrb[148].mxu1 %vm324_vm3, %v3015_v61 }
0x1353   :  { %5028 = vmatprep.mubr.msk.bf16.mxu1 %vm5595_vm0, %v5594_v0 }
0x1369   :  { %v2986_v10 = vpop.xlane.xlu0 %2985 }
0x136a   :  { %5461 = vrcp.f32 %v2986_v10  ;;  %v4348_v10 = vld [vmem:[%s7742_s8 + $0x1] ss:$0 sm:$0xff] }
0x136b   :  { %v2771_v46 = vadd.f32 %v4348_v10, %v7162_v55  ;;  %v2773_v55 = vadd.f32 %v4348_v10, %v7166_v54  ;;  %v2774_v54 = vadd.f32 %v4348_v10, %v7201_v22 }
0x136d   :  { %v2989_v42 = vpop.xlane.xlu0 %2988 }
0x136e   :  { %5463 = vrcp.f32 %v2989_v42  ;;  %v2770_v42 = vadd.f32 %v4348_v10, %v7160_v51  ;;  %v2772_v51 = vadd.f32 %v4348_v10, %v7164_v60 }
0x1371   :  { %v2992_v3 = vpop.xlane.xlu0 %2991 }
0x1372   :  { %5465 = vrcp.f32 %v2992_v3 }
0x1374   :  { %v5462_v45 = vpop.eup %5461 }
0x1375   :  { %v3010_v5 = vmul.f32 %v5462_v45, %v7220_v56  ;;  %v3163_v56 = vsel %vm170_vm1, %v5235_v40, 0 }
0x1376   :  { %5041 = vmatpush3.bf16.msra.mxu0 %v3163_v56 }
0x1377   :  { %v3016_v7 = vpack.c.bf16 %v3010_v5, %v3009_v17 }
0x1378   :  { %v5464_v49 = vpop.eup %5463 }
0x1379   :  { %5029 = vmatmul.mubr.msk.bf16.gmra.mrb[152].mxu1 %vm324_vm3, %v3016_v7  ;;  %v3011_v47 = vmul.f32 %v5464_v49, %v7224_v59 }
0x137a   :  { %5032 = vmatprep.mubr.msk.bf16.mxu1 %vm5595_vm0, %v5594_v0 }
0x137c   :  { %v5466_v62 = vpop.eup %5465 }
0x137d   :  { %v3012_v18 = vmul.f32 %v5466_v62, %v7228_v50 }
0x137f   :  { %v3017_v36 = vpack.c.bf16 %v3012_v18, %v3011_v47 }
0x1381   :  { %5033 = vmatmul.mubr.msk.bf16.gmra.mrb[156].mxu1 %vm324_vm3, %v3017_v36 }
0x1382   :  { %3550 = vmatprep.mubr.bf16.mxu1 %v5596_v30 }
0x1415   :  { %v3082_v14 = vpop.f32.mrb[140].mxu1 }
0x1416   :  { %v5018_v52 = vpop.f32.mrb[141].mxu1 }
0x1417   :  { %v3085_v27 = vpop.f32.mrb[142].mxu1 }
0x1418   :  { %v3121_v21 = vpack.c.bf16 %v3085_v27, %v3082_v14  ;;  %v5019_v48 = vpop.f32.mrb[143].mxu1 }
0x141a   :  { %5043 = vmatmul.mubr.msk.bf16.vlgmr.msra.gmra.mrb[160].mxu0 %vm154_vm2, %v3121_v21 }
0x141b   :  { %5046 = vmatprep.mubr.msk.bf16.mxu0 %vm5595_vm0, %v5594_v0 }
0x141d   :  { %v3090_v59 = vpop.f32.mrb[144].mxu1 }
0x141e   :  { %v5022_v50 = vpop.f32.mrb[145].mxu1 }
0x141f   :  { %v3093_v4 = vpop.f32.mrb[146].mxu1 }
0x1420   :  { %v3122_v58 = vpack.c.bf16 %v3093_v4, %v3090_v59  ;;  %v5023_v57 = vpop.f32.mrb[147].mxu1  ;;  %v2775_v59 = vadd.f32 %v4348_v10, %v7203_v32 }
0x1422   :  { %5047 = vmatmul.mubr.msk.bf16.gmra.mrb[164].mxu0 %vm154_vm2, %v3122_v58 }
0x1423   :  { %5050 = vmatprep.mubr.msk.bf16.mxu0 %vm5595_vm0, %v5594_v0 }
0x1425   :  { %v3098_v33 = vpop.f32.mrb[148].mxu1 }
0x1426   :  { %v5026_v39 = vpop.f32.mrb[149].mxu1 }
0x1427   :  { %v3101_v34 = vpop.f32.mrb[150].mxu1 }
0x1428   :  { %v3123_v2 = vpack.c.bf16 %v3101_v34, %v3098_v33  ;;  %v5027_v26 = vpop.f32.mrb[151].mxu1  ;;  %v2776_v34 = vadd.f32 %v4348_v10, %v7205_v11  ;;  %v2778_v11 = vadd.f32 %v4348_v10, %v7213_v38 }
0x142a   :  { %5051 = vmatmul.mubr.msk.bf16.gmra.mrb[168].mxu0 %vm154_vm2, %v3123_v2  ;;  %v2777_v2 = vadd.f32 %v4348_v10, %v7207_v25  ;;  %v2779_v25 = vadd.f32 %v4348_v10, %v7215_v23 }
0x142b   :  { %5054 = vmatprep.mubr.msk.bf16.mxu0 %vm5595_vm0, %v5594_v0 }
0x144c   :  { %v3106_v28 = vpop.f32.mrb[152].mxu1 }
0x144d   :  { %v5030_v53 = vpop.f32.mrb[153].mxu1 }
0x144e   :  { %v3109_v9 = vpop.f32.mrb[154].mxu1 }
0x144f   :  { %v3124_v13 = vpack.c.bf16 %v3109_v9, %v3106_v28  ;;  %v5031_v15 = vpop.f32.mrb[155].mxu1 }
0x1451   :  { %5055 = vmatmul.mubr.msk.bf16.gmra.mrb[172].mxu0 %vm154_vm2, %v3124_v13 }
0x1452   :  { %5058 = vmatprep.mubr.msk.bf16.mxu0 %vm5595_vm0, %v5594_v0 }
0x1454   :  { %v3114_v1 = vpop.f32.mrb[156].mxu1 }
0x1455   :  { %v5034_v24 = vpop.f32.mrb[157].mxu1 }
0x1456   :  { %v3117_v43 = vpop.f32.mrb[158].mxu1 }
0x1457   :  { %v3125_v12 = vpack.c.bf16 %v3117_v43, %v3114_v1  ;;  %v5035_v61 = vpop.f32.mrb[159].mxu1 }
0x1459   :  { %5059 = vmatmul.mubr.msk.bf16.gmra.mrb[176].mxu0 %vm154_vm2, %v3125_v12 }
0x14ed   :  { %v3199_v3 = vpop.f32.mrb[160].mxu0 }
0x14ee   :  { %v3238_v45 = vadd.f32 %v3199_v3, %v2770_v42  ;;  %v5044_v17 = vpop.f32.mrb[161].mxu0 }
0x14ef   :  { %v3202_v5 = vpop.f32.mrb[162].mxu0 }
0x14f0   :  { %v7279_v0 = vadd.f32 %v3238_v45, %v6768_v35  ;;  %v3239_v7 = vadd.f32 %v3202_v5, %v2771_v46  ;;  %v5045_v49 = vpop.f32.mrb[163].mxu0 }
0x14f2   :  { %v7282_v62 = vadd.f32 %v3239_v7, %v6771_v29  ;;  %v3262_v47 = vsel %vm324_vm3, %v7279_v0, 0.0 }
0x14f3   :  { %3263 = vadd.xlane.f32.xlu0 %v3262_v47 }
0x14f4   :  { %v3265_v35 = vsel %vm324_vm3, %v7282_v62, 0.0 }
0x14f5   :  { %v3207_v18 = vpop.f32.mrb[164].mxu0 }
0x14f6   :  { %v3240_v36 = vadd.f32 %v3207_v18, %v2772_v51  ;;  %v5048_v40 = vpop.f32.mrb[165].mxu0 }
0x14f7   :  { %3266 = vadd.xlane.f32.xlu0 %v3265_v35  ;;  %v3210_v56 = vpop.f32.mrb[166].mxu0 }
0x14f8   :  { %v7291_v14 = vadd.f32 %v3240_v36, %v6782_v41  ;;  %v3241_v29 = vadd.f32 %v3210_v56, %v2773_v55  ;;  %v5049_v52 = vpop.f32.mrb[167].mxu0 }
0x14fa   :  { %v7294_v27 = vadd.f32 %v3241_v29, %v6785_v19  ;;  %v3268_v60 = vsel %vm324_vm3, %v7291_v14, 0.0 }
0x14fb   :  { %3269 = vadd.xlane.f32.xlu1 %v3268_v60 }
0x14fc   :  { %v3271_v21 = vsel %vm324_vm3, %v7294_v27, 0.0 }
0x14fd   :  { %3272 = vadd.xlane.f32.xlu0 %v3271_v21  ;;  %v3215_v48 = vpop.f32.mrb[168].mxu0 }
0x14fe   :  { %v3242_v41 = vadd.f32 %v3215_v48, %v2774_v54  ;;  %v5052_v50 = vpop.f32.mrb[169].mxu0 }
0x14ff   :  { %v3218_v4 = vpop.f32.mrb[170].mxu0 }
0x1500   :  { %v3252_v58 = vadd.f32 %v3242_v41, %v6796_v20  ;;  %v3243_v19 = vadd.f32 %v3218_v4, %v2775_v59  ;;  %v5053_v57 = vpop.f32.mrb[171].mxu0  ;;  %v5238_v4 = vld [vmem:[%s7745_s11 + $0x54] ss:$8 sps:$4 sm:$0xff]  }
0x1501   :  { %3518 = vmatprep.subr.bf16.mxu1 %v5238_v4  ;;  %v5239_v57 = vld [vmem:[%s7745_s11 + $0x60] ss:$8 sps:$4 sm:$0xff]  }
0x1502   :  { %v7304_v33 = vadd.f32 %v3243_v19, %v6799_v63  ;;  %v3274_v39 = vsel %vm324_vm3, %v3252_v58, 0.0  ;;  %v5241_v19 = vld [vmem:[%s7745_s11 + $0x64] ss:$8 sps:$4 sm:$0xff]  }
0x1503   :  { %3275 = vadd.xlane.f32.xlu0 %v3274_v39  ;;  %v5242_v39 = vld [vmem:[%s7745_s11 + $0x70] ss:$8 sps:$4 sm:$0xff]  }
0x1504   :  { %v3277_v22 = vsel %vm324_vm3, %v7304_v33, 0.0 }
0x1507   :  { %3278 = vadd.xlane.f32.xlu0 %v3277_v22  ;;  %v5247_v22 = vld [vmem:[%s7745_s11 + $0x84] ss:$8 sps:$4 sm:$0xff]  }
0x1524   :  { %v3223_v32 = vpop.f32.mrb[172].mxu0 }
0x1525   :  { %v3244_v26 = vadd.f32 %v3223_v32, %v2776_v34  ;;  %v5056_v28 = vpop.f32.mrb[173].mxu0  ;;  %v5245_v34 = vld [vmem:[%s7745_s11 + $0x80] ss:$8 sps:$4 sm:$0xff]   ;;  %v5250_v32 = vld [vmem:[%s7745_s11 + $0x94] ss:$8 sps:$4 sm:$0xff]  }
0x1526   :  { %v3226_v20 = vpop.f32.mrb[174].mxu0 }
0x1527   :  { %v7312_v53 = vadd.f32 %v3244_v26, %v6810_v37  ;;  %v3245_v63 = vadd.f32 %v3226_v20, %v2777_v2  ;;  %v5057_v9 = vpop.f32.mrb[175].mxu0  ;;  %v5248_v2 = vld [vmem:[%s7745_s11 + $0x90] ss:$8 sps:$4 sm:$0xff]  }
0x1529   :  { %v7315_v13 = vadd.f32 %v3245_v63, %v6813_v31  ;;  %v3280_v15 = vsel %vm324_vm3, %v7312_v53, 0.0 }
0x152a   :  { %3281 = vadd.xlane.f32.xlu0 %v3280_v15 }
0x152b   :  { %v3283_v37 = vsel %vm324_vm3, %v7315_v13, 0.0 }
0x152c   :  { %v3231_v1 = vpop.f32.mrb[176].mxu0 }
0x152d   :  { %v3246_v24 = vadd.f32 %v3231_v1, %v2778_v11  ;;  %v5060_v43 = vpop.f32.mrb[177].mxu0 }
0x152e   :  { %3284 = vadd.xlane.f32.xlu0 %v3283_v37  ;;  %v3234_v12 = vpop.f32.mrb[178].mxu0 }
0x152f   :  { %v7324_v61 = vadd.f32 %v3246_v24, %v6824_v44  ;;  %v3247_v31 = vadd.f32 %v3234_v12, %v2779_v25  ;;  %v5061_v42 = vpop.f32.mrb[179].mxu0 }
0x1531   :  { %v7327_v3 = vadd.f32 %v3247_v31, %v6827_v16  ;;  %v3286_v38 = vsel %vm324_vm3, %v7324_v61, 0.0 }
0x1532   :  { %3287 = vadd.xlane.f32.xlu0 %v3286_v38 }
0x1533   :  { %v3289_v23 = vsel %vm324_vm3, %v7327_v3, 0.0 }
0x1536   :  { %3290 = vadd.xlane.f32.xlu0 %v3289_v23 }
0x1580   :  { %v3264_v10 = vpop.xlane.xlu0 %3263 }
0x1581   :  { %v3292_v46 = vmul.f32 0.0125, %v3264_v10  ;;  %v5251_v10 = vld [vmem:[%s7747_s13 + $0xc0] sm:$0xff]  }
0x1582   :  { %4622 = vmatprep.subr.bf16.mxu0 %v5251_v10 }
0x1583   :  { %v7334_v45 = vsub.f32 %v7279_v0, %v3292_v46  ;;  %v5252_v46 = vld [vmem:[%s7747_s13 + $0x80] sm:$0xff]  }
0x1584   :  { %v3267_v44 = vpop.xlane.xlu0 %3266  ;;  %4623 = vmatpush3.bf16.msra.mxu0 %v5252_v46 }
0x1585   :  { %v3293_v17 = vmul.f32 0.0125, %v3267_v44  ;;  %v3312_v5 = vmul.f32 %v7334_v45, %v7334_v45  ;;  %v5254_v44 = vld [vmem:[%s7747_s13 + $0x88] sm:$0xff]  }
0x1587   :  { %v7339_v16 = vsub.f32 %v7282_v62, %v3293_v17  ;;  %v3322_v7 = vsel %vm324_vm3, %v3312_v5, 0.0  ;;  %v5255_v17 = vld [vmem:[%s7747_s13 + $0xd0] sm:$0xff]  }
0x1588   :  { %v3270_v49 = vpop.xlane.xlu1 %3269  ;;  %3323 = vadd.xlane.f32.xlu0 %v3322_v7  ;;  %v5256_v5 = vld [vmem:[%s7747_s13 + $0x90] sm:$0xff]   ;;  %v5257_v7 = vld [vmem:[%s7747_s13 + $0xd8] sm:$0xff]  }
0x1589   :  { %v3294_v47 = vmul.f32 0.0125, %v3270_v49  ;;  %v3313_v51 = vmul.f32 %v7339_v16, %v7339_v16  ;;  %v5258_v49 = vld [vmem:[%s7747_s13 + $0x98] sm:$0xff]  }
0x158a   :  { %v3273_v18 = vpop.xlane.xlu0 %3272 }
0x158b   :  { %v7345_v0 = vsub.f32 %v7291_v14, %v3294_v47  ;;  %v3295_v55 = vmul.f32 0.0125, %v3273_v18  ;;  %v3325_v36 = vsel %vm324_vm3, %v3313_v51, 0.0  ;;  %v5259_v47 = vld [vmem:[%s7747_s13 + $0xe0] sm:$0xff]   ;;  %v5261_v18 = vld [vmem:[%s7747_s13 + $0xe8] sm:$0xff]  }
0x158c   :  { %3326 = vadd.xlane.f32.xlu0 %v3325_v36  ;;  %v5260_v51 = vld [vmem:[%s7747_s13 + $0xa0] sm:$0xff]  }
0x158d   :  { %v7349_v40 = vsub.f32 %v7294_v27, %v3295_v55  ;;  %v3314_v62 = vmul.f32 %v7345_v0, %v7345_v0 }
0x158f   :  { %v3328_v35 = vsel %vm324_vm3, %v3314_v62, 0.0  ;;  %v3315_v56 = vmul.f32 %v7349_v40, %v7349_v40 }
0x1590   :  { %3329 = vadd.xlane.f32.xlu1 %v3328_v35  ;;  %v3276_v29 = vpop.xlane.xlu0 %3275 }
0x1591   :  { %v3296_v52 = vmul.f32 0.0125, %v3276_v29  ;;  %v3331_v14 = vsel %vm324_vm3, %v3315_v56, 0.0 }
0x1592   :  { %3332 = vadd.xlane.f32.xlu0 %v3331_v14 }
0x1593   :  { %v7357_v60 = vsub.f32 %v3252_v58, %v3296_v52  ;;  %v5236_v58 = vld [vmem:[%s7745_s11 + $0x50] ss:$8 sps:$4 sm:$0xff]  }
0x1594   :  { %v3279_v54 = vpop.xlane.xlu0 %3278  ;;  %3519 = vmatpush1.bf16.msra.mxu1 %v5236_v58  ;;  %v7459_v58 = vld [vmem:[%s7743_s9 + $0x1] ss:$0 sm:$0xff] }
0x1595   :  { %v3297_v21 = vmul.f32 0.0125, %v3279_v54  ;;  %v3316_v27 = vmul.f32 %v7357_v60, %v7357_v60  ;;  %3520 = vmatprep.subr.bf16.mxu1 %v5241_v19 }
0x1597   :  { %v7362_v48 = vsub.f32 %v7304_v33, %v3297_v21  ;;  %v3334_v59 = vsel %vm324_vm3, %v3316_v27, 0.0  ;;  %v5244_v33 = vld [vmem:[%s7745_s11 + $0x74] ss:$8 sps:$4 sm:$0xff]   ;;  %s7768_s11 = sld [smem:[#allocation13_spill]] }
0x1598   :  { %3335 = vadd.xlane.f32.xlu1 %v3334_v59  ;;  %3521 = vmatpush1.bf16.msra.mxu1 %v5239_v57 }
0x1599   :  { %v3317_v41 = vmul.f32 %v7362_v48, %v7362_v48  ;;  %3522 = vmatprep.subr.bf16.mxu1 %v5244_v33 }
0x159b   :  { %v3337_v50 = vsel %vm324_vm3, %v3317_v41, 0.0 }
0x159c   :  { %3338 = vadd.xlane.f32.xlu0 %v3337_v50  ;;  %3523 = vmatpush1.bf16.msra.mxu1 %v5242_v39 }
0x159d   :  { %3524 = vmatprep.subr.bf16.mxu1 %v5247_v22 }
0x15a0   :  { %3525 = vmatpush1.bf16.msra.mxu1 %v5245_v34 }
0x15a1   :  { %3526 = vmatprep.subr.bf16.mxu1 %v5250_v32  ;;  %v7466_v32 = vld [vmem:[%s7744_s10 + $0x1] ss:$0 sm:$0xff] }
0x15a4   :  { %3527 = vmatpush1.bf16.msra.mxu1 %v5248_v2 }
0x15b7   :  { %v3282_v26 = vpop.xlane.xlu0 %3281 }
0x15b8   :  { %v3298_v28 = vmul.f32 0.0125, %v3282_v26 }
0x15ba   :  { %v7399_v20 = vsub.f32 %v7312_v53, %v3298_v28 }
0x15bb   :  { %v3285_v63 = vpop.xlane.xlu0 %3284 }
0x15bc   :  { %v3299_v9 = vmul.f32 0.0125, %v3285_v63  ;;  %v3318_v15 = vmul.f32 %v7399_v20, %v7399_v20 }
0x15be   :  { %v7404_v11 = vsub.f32 %v7315_v13, %v3299_v9  ;;  %v3340_v1 = vsel %vm324_vm3, %v3318_v15, 0.0 }
0x15bf   :  { %3341 = vadd.xlane.f32.xlu1 %v3340_v1  ;;  %v3288_v25 = vpop.xlane.xlu0 %3287 }
0x15c0   :  { %v3300_v24 = vmul.f32 0.0125, %v3288_v25  ;;  %v3319_v43 = vmul.f32 %v7404_v11, %v7404_v11 }
0x15c2   :  { %v7410_v37 = vsub.f32 %v7324_v61, %v3300_v24  ;;  %v3343_v53 = vsel %vm324_vm3, %v3319_v43, 0.0 }
0x15c3   :  { %3344 = vadd.xlane.f32.xlu0 %v3343_v53  ;;  %v3291_v12 = vpop.xlane.xlu0 %3290 }
0x15c4   :  { %v3301_v31 = vmul.f32 0.0125, %v3291_v12  ;;  %v3320_v13 = vmul.f32 %v7410_v37, %v7410_v37 }
0x15c6   :  { %v7416_v42 = vsub.f32 %v7327_v3, %v3301_v31  ;;  %v3346_v38 = vsel %vm324_vm3, %v3320_v13, 0.0  ;;  %v5253_v3 = vld [vmem:[%s7747_s13 + $0xc8] sm:$0xff]  }
0x15c7   :  { %3347 = vadd.xlane.f32.xlu1 %v3346_v38  ;;  %4624 = vmatprep.subr.bf16.mxu0 %v5253_v3 }
0x15c8   :  { %v3321_v23 = vmul.f32 %v7416_v42, %v7416_v42  ;;  %4625 = vmatpush3.bf16.msra.mxu0 %v5254_v44 }
0x15c9   :  { %4626 = vmatprep.subr.bf16.mxu0 %v5255_v17 }
0x15ca   :  { %v3349_v61 = vsel %vm324_vm3, %v3321_v23, 0.0 }
0x15cb   :  { %3350 = vadd.xlane.f32.xlu0 %v3349_v61 }
0x15cc   :  { %4627 = vmatpush3.bf16.msra.mxu0 %v5256_v5 }
0x15cd   :  { %4628 = vmatprep.subr.bf16.mxu0 %v5257_v7 }
0x15d0   :  { %4629 = vmatpush3.bf16.msra.mxu0 %v5258_v49 }
0x15d1   :  { %4630 = vmatprep.subr.bf16.mxu0 %v5259_v47 }
0x15d4   :  { %4631 = vmatpush3.bf16.msra.mxu0 %v5260_v51 }
0x15d5   :  { %4632 = vmatprep.subr.bf16.mxu0 %v5261_v18 }
0x1615   :  { %v3324_v55 = vpop.xlane.xlu0 %3323 }
0x1616   :  { %v3352_v36 = vmul.f32 0.0125, %v3324_v55 }
0x1618   :  { %v3362_v62 = vadd.f32 1e-05, %v3352_v36 }
0x1619   :  { %v3327_v35 = vpop.xlane.xlu0 %3326 }
0x161a   :  { %5467 = vrsqrt.f32 %v3362_v62  ;;  %v3353_v56 = vmul.f32 0.0125, %v3327_v35 }
0x161c   :  { %v3363_v29 = vadd.f32 1e-05, %v3353_v56 }
0x161d   :  { %v3330_v52 = vpop.xlane.xlu1 %3329 }
0x161e   :  { %5469 = vrsqrt.f32 %v3363_v29  ;;  %v3354_v14 = vmul.f32 0.0125, %v3330_v52 }
0x161f   :  { %v3333_v54 = vpop.xlane.xlu0 %3332 }
0x1620   :  { %v3364_v21 = vadd.f32 1e-05, %v3354_v14  ;;  %v3355_v27 = vmul.f32 0.0125, %v3333_v54 }
0x1622   :  { %5471 = vrsqrt.f32 %v3364_v21  ;;  %v3365_v59 = vadd.f32 1e-05, %v3355_v27 }
0x1624   :  { %v5468_v41 = vpop.eup %5467  ;;  %5473 = vrsqrt.f32 %v3365_v59 }
0x1625   :  { %v3382_v50 = vmul.f32 %v5468_v41, %v7334_v45  ;;  %v3336_v4 = vpop.xlane.xlu1 %3335 }
0x1626   :  { %v3356_v19 = vmul.f32 0.0125, %v3336_v4 }
0x1627   :  { %v3398_v39 = vmul.f32 %v7459_v58, %v3382_v50 }
0x1628   :  { %v5470_v57 = vpop.eup %5469  ;;  %v3366_v33 = vadd.f32 1e-05, %v3356_v19 }
0x1629   :  { %v3383_v22 = vmul.f32 %v5470_v57, %v7339_v16  ;;  %v3339_v34 = vpop.xlane.xlu0 %3338  ;;  %v7470_v63 = vadd.f32 %v7466_v32, %v3398_v39  ;;  %v5266_v39 = vld [vmem:[%s7747_s13 + $0xb8] sm:$0xff]  }
0x162a   :  { %5475 = vrsqrt.f32 %v3366_v33  ;;  %v3357_v45 = vmul.f32 0.0125, %v3339_v34  ;;  %v5265_v33 = vld [vmem:[%s7747_s13 + $0xf8] sm:$0xff]  }
0x162b   :  { %v3399_v2 = vmul.f32 %v7459_v58, %v3383_v22  ;;  %v4381_v22 = vld [vmem:[%s7746_s12 + $0x2] sm:$0x3] }
0x162c   :  { %v5472_v26 = vpop.eup %5471  ;;  %v3367_v28 = vadd.f32 1e-05, %v3357_v45  ;;  %v7553_v34 = vrot.slane %v4381_v22, %v5869_v6 }
0x162d   :  { %v7473_v9 = vadd.f32 %v7466_v32, %v3399_v2  ;;  %v3384_v16 = vmul.f32 %v5472_v26, %v7345_v0 }
0x162e   :  { %v5474_v15 = vpop.eup %5473  ;;  %5477 = vrsqrt.f32 %v3367_v28 }
0x162f   :  { %v3385_v1 = vmul.f32 %v5474_v15, %v7349_v40  ;;  %v3424_v25 = vpack.c.bf16 %v7473_v9, %v7470_v63  ;;  %v3400_v24 = vmul.f32 %v7459_v58, %v3384_v16 }
0x1631   :  { %4392 = vmatmul.mubr.msk.bf16.vlgmr.msra.gmra.mrb[160].mxu1 %vm324_vm3, %v3424_v25  ;;  %v3401_v43 = vmul.f32 %v7459_v58, %v3385_v1  ;;  %v7488_v31 = vadd.f32 %v7466_v32, %v3400_v24 }
0x1632   :  { %3560 = vmatprep.mubr.bf16.mxu1 %v5596_v30 }
0x1633   :  { %v7484_v53 = vadd.f32 %v7466_v32, %v3401_v43 }
0x1634   :  { %v5476_v12 = vpop.eup %5475 }
0x1635   :  { %v3386_v0 = vmul.f32 %v5476_v12, %v7357_v60  ;;  %v3425_v40 = vpack.c.bf16 %v7484_v53, %v7488_v31 }
0x1637   :  { %v3402_v23 = vmul.f32 %v7459_v58, %v3386_v0 }
0x1638   :  { %v5478_v13 = vpop.eup %5477 }
0x1639   :  { %v3387_v38 = vmul.f32 %v5478_v13, %v7362_v48  ;;  %4393 = vmatmul.mubr.msk.bf16.gmra.mrb[164].mxu1 %vm324_vm3, %v3425_v40  ;;  %v7498_v10 = vadd.f32 %v7466_v32, %v3402_v23 }
0x163a   :  { %3570 = vmatprep.mubr.bf16.mxu1 %v5596_v30 }
0x163b   :  { %v3403_v61 = vmul.f32 %v7459_v58, %v3387_v38 }
0x163d   :  { %v7501_v60 = vadd.f32 %v7466_v32, %v3403_v61 }
0x163f   :  { %v3426_v46 = vpack.c.bf16 %v7501_v60, %v7498_v10 }
0x1641   :  { %4394 = vmatmul.mubr.msk.bf16.gmra.mrb[168].mxu1 %vm324_vm3, %v3426_v46 }
0x1642   :  { %3580 = vmatprep.mubr.bf16.mxu1 %v5596_v30 }
0x164c   :  { %v3342_v48 = vpop.xlane.xlu1 %3341 }
0x164d   :  { %v3358_v3 = vmul.f32 0.0125, %v3342_v48 }
0x164f   :  { %v3368_v44 = vadd.f32 1e-05, %v3358_v3 }
0x1650   :  { %v3345_v17 = vpop.xlane.xlu0 %3344 }
0x1651   :  { %5479 = vrsqrt.f32 %v3368_v44  ;;  %v3359_v5 = vmul.f32 0.0125, %v3345_v17 }
0x1653   :  { %v3369_v7 = vadd.f32 1e-05, %v3359_v5 }
0x1654   :  { %v3348_v49 = vpop.xlane.xlu1 %3347 }
0x1655   :  { %5481 = vrsqrt.f32 %v3369_v7  ;;  %v3360_v47 = vmul.f32 0.0125, %v3348_v49 }
0x1657   :  { %v3370_v51 = vadd.f32 1e-05, %v3360_v47 }
0x1658   :  { %v3351_v18 = vpop.xlane.xlu0 %3350 }
0x1659   :  { %5483 = vrsqrt.f32 %v3370_v51  ;;  %v3361_v55 = vmul.f32 0.0125, %v3351_v18 }
0x165b   :  { %v5480_v36 = vpop.eup %5479  ;;  %v3371_v62 = vadd.f32 1e-05, %v3361_v55 }
0x165c   :  { %v3388_v35 = vmul.f32 %v5480_v36, %v7399_v20 }
0x165d   :  { %5485 = vrsqrt.f32 %v3371_v62 }
0x165e   :  { %v3404_v52 = vmul.f32 %v7459_v58, %v3388_v35 }
0x165f   :  { %v5482_v56 = vpop.eup %5481 }
0x1660   :  { %v3389_v29 = vmul.f32 %v5482_v56, %v7404_v11  ;;  %v7513_v27 = vadd.f32 %v7466_v32, %v3404_v52 }
0x1662   :  { %v3405_v14 = vmul.f32 %v7459_v58, %v3389_v29 }
0x1663   :  { %v5484_v54 = vpop.eup %5483 }
0x1664   :  { %v3390_v21 = vmul.f32 %v5484_v54, %v7410_v37  ;;  %v7516_v59 = vadd.f32 %v7466_v32, %v3405_v14 }
0x1666   :  { %v3427_v20 = vpack.c.bf16 %v7516_v59, %v7513_v27  ;;  %v3406_v11 = vmul.f32 %v7459_v58, %v3390_v21 }
0x1667   :  { %v5486_v41 = vpop.eup %5485 }
0x1668   :  { %v3391_v50 = vmul.f32 %v5486_v41, %v7416_v42  ;;  %4395 = vmatmul.mubr.msk.bf16.gmra.mrb[172].mxu1 %vm324_vm3, %v3427_v20  ;;  %v7526_v4 = vadd.f32 %v7466_v32, %v3406_v11  ;;  %v5262_v42 = vld [vmem:[%s7747_s13 + $0xa8] sm:$0xff]  }
0x1669   :  { %3590 = vmatprep.mubr.bf16.mxu1 %v5596_v30  ;;  %4633 = vmatpush3.bf16.msra.mxu0 %v5262_v42  ;;  %v5263_v30 = vld [vmem:[%s7747_s13 + $0xf0] sm:$0xff]  }
0x166a   :  { %v3407_v37 = vmul.f32 %v7459_v58, %v3391_v50  ;;  %v5264_v58 = vld [vmem:[%s7747_s13 + $0xb0] sm:$0xff]   ;;  %4634 = vmatprep.subr.bf16.mxu0 %v5263_v30 }
0x166c   :  { %v7529_v19 = vadd.f32 %v7466_v32, %v3407_v37  ;;  %v7556_v32 = vrot.slane %v4381_v22, %v5874_v8 }
0x166d   :  { %4635 = vmatpush3.bf16.msra.mxu0 %v5264_v58 }
0x166e   :  { %v3428_v57 = vpack.c.bf16 %v7529_v19, %v7526_v4  ;;  %4636 = vmatprep.subr.bf16.mxu0 %v5265_v33 }
0x1670   :  { %4396 = vmatmul.mubr.msk.bf16.gmra.mrb[176].mxu1 %vm324_vm3, %v3428_v57 }
0x1671   :  { %4637 = vmatpush3.bf16.msra.mxu0 %v5266_v39 }
0x1704   :  { %v3552_v45 = vpop.f32.mrb[160].mxu1 }
0x1705   :  { %v3553_v2 = vadd.f32 %v3552_v45, %v7553_v34  ;;  %v3554_v26 = vpop.f32.mrb[161].mxu1 }
0x1706   :  { %v3555_v28 = vadd.f32 %v3554_v26, %v7556_v32  ;;  %v3556_v16 = vpop.f32.mrb[162].mxu1 }
0x1707   :  { %v3557_v15 = vadd.f32 %v3556_v16, %v7553_v34  ;;  %v3558_v1 = vpop.f32.mrb[163].mxu1  ;;  %v3601_v24 = vmax.f32 %v3553_v2, 0.0 }
0x1708   :  { %v3559_v25 = vadd.f32 %v3558_v1, %v7556_v32  ;;  %v3602_v12 = vmax.f32 %v3555_v28, 0.0 }
0x1709   :  { %v3603_v43 = vmax.f32 %v3557_v15, 0.0 }
0x170a   :  { %v3604_v6 = vmax.f32 %v3559_v25, 0.0 }
0x170b   :  { %v3621_v0 = vpack.c.bf16 %v3603_v43, %v3601_v24 }
0x170c   :  { %v3622_v40 = vpack.c.bf16 %v3604_v6, %v3602_v12  ;;  %v3562_v8 = vpop.f32.mrb[164].mxu1 }
0x170d   :  { %v3563_v13 = vadd.f32 %v3562_v8, %v7553_v34  ;;  %v3564_v38 = vpop.f32.mrb[165].mxu1 }
0x170e   :  { %v3565_v23 = vadd.f32 %v3564_v38, %v7556_v32  ;;  %v3566_v61 = vpop.f32.mrb[166].mxu1  ;;  %3800 = vmatprep.mubr.bf16.mxu0 %v3622_v40 }
0x170f   :  { %v3567_v46 = vadd.f32 %v3566_v61, %v7553_v34  ;;  %v3568_v48 = vpop.f32.mrb[167].mxu1  ;;  %3801 = vmatmul.mubr.bf16.vlgmr.msra.gmra.mrb[180].mxu0 %v3621_v0  ;;  %v3605_v44 = vmax.f32 %v3563_v13, 0.0 }
0x1710   :  { %v3569_v3 = vadd.f32 %v3568_v48, %v7556_v32  ;;  %v3606_v5 = vmax.f32 %v3565_v23, 0.0 }
0x1711   :  { %v3607_v17 = vmax.f32 %v3567_v46, 0.0  ;;  %v7581_v46 = vld [vmem:[%s7748_s14 + $0x1] ss:$0 sm:$0xff] }
0x1712   :  { %v3608_v7 = vmax.f32 %v3569_v3, 0.0 }
0x1713   :  { %v3623_v49 = vpack.c.bf16 %v3607_v17, %v3605_v44 }
0x1714   :  { %v3624_v47 = vpack.c.bf16 %v3608_v7, %v3606_v5  ;;  %v3572_v51 = vpop.f32.mrb[168].mxu1 }
0x1715   :  { %v3573_v18 = vadd.f32 %v3572_v51, %v7553_v34  ;;  %v3574_v55 = vpop.f32.mrb[169].mxu1 }
0x1716   :  { %v3575_v36 = vadd.f32 %v3574_v55, %v7556_v32  ;;  %v3576_v62 = vpop.f32.mrb[170].mxu1  ;;  %3808 = vmatprep.mubr.bf16.mxu0 %v3624_v47 }
0x1717   :  { %v3577_v35 = vadd.f32 %v3576_v62, %v7553_v34  ;;  %v3578_v56 = vpop.f32.mrb[171].mxu1  ;;  %3809 = vmatmul.mubr.bf16.gmra.mrb[184].mxu0 %v3623_v49  ;;  %v3609_v52 = vmax.f32 %v3573_v18, 0.0 }
0x1718   :  { %v3579_v29 = vadd.f32 %v3578_v56, %v7556_v32  ;;  %v3610_v54 = vmax.f32 %v3575_v36, 0.0 }
0x1719   :  { %v3611_v14 = vmax.f32 %v3577_v35, 0.0 }
0x171a   :  { %v3612_v21 = vmax.f32 %v3579_v29, 0.0 }
0x171b   :  { %v3625_v20 = vpack.c.bf16 %v3611_v14, %v3609_v52 }
0x171c   :  { %v3626_v41 = vpack.c.bf16 %v3612_v21, %v3610_v54 }
0x171e   :  { %3816 = vmatprep.mubr.bf16.mxu0 %v3626_v41 }
0x171f   :  { %3817 = vmatmul.mubr.bf16.gmra.mrb[188].mxu0 %v3625_v20 }
0x173b   :  { %v3582_v50 = vpop.f32.mrb[172].mxu1 }
0x173c   :  { %v3583_v11 = vadd.f32 %v3582_v50, %v7553_v34  ;;  %v3584_v37 = vpop.f32.mrb[173].mxu1 }
0x173d   :  { %v3585_v57 = vadd.f32 %v3584_v37, %v7556_v32  ;;  %v3586_v42 = vpop.f32.mrb[174].mxu1 }
0x173e   :  { %v3587_v30 = vadd.f32 %v3586_v42, %v7553_v34  ;;  %v3588_v58 = vpop.f32.mrb[175].mxu1  ;;  %v3613_v39 = vmax.f32 %v3583_v11, 0.0 }
0x173f   :  { %v3589_v33 = vadd.f32 %v3588_v58, %v7556_v32  ;;  %v3614_v45 = vmax.f32 %v3585_v57, 0.0 }
0x1740   :  { %v3615_v22 = vmax.f32 %v3587_v30, 0.0 }
0x1741   :  { %v3616_v2 = vmax.f32 %v3589_v33, 0.0 }
0x1742   :  { %v3627_v26 = vpack.c.bf16 %v3615_v22, %v3613_v39 }
0x1743   :  { %v3628_v28 = vpack.c.bf16 %v3616_v2, %v3614_v45  ;;  %v3592_v16 = vpop.f32.mrb[176].mxu1 }
0x1744   :  { %v3593_v15 = vadd.f32 %v3592_v16, %v7553_v34  ;;  %v3594_v1 = vpop.f32.mrb[177].mxu1 }
0x1745   :  { %v3595_v25 = vadd.f32 %v3594_v1, %v7556_v32  ;;  %v3596_v24 = vpop.f32.mrb[178].mxu1  ;;  %3824 = vmatprep.mubr.bf16.mxu0 %v3628_v28 }
0x1746   :  { %v3597_v43 = vadd.f32 %v3596_v24, %v7553_v34  ;;  %v3598_v12 = vpop.f32.mrb[179].mxu1  ;;  %3825 = vmatmul.mubr.bf16.gmra.mrb[192].mxu0 %v3627_v26  ;;  %v3617_v0 = vmax.f32 %v3593_v15, 0.0 }
0x1747   :  { %v3599_v6 = vadd.f32 %v3598_v12, %v7556_v32  ;;  %v3618_v8 = vmax.f32 %v3595_v25, 0.0 }
0x1748   :  { %v3619_v40 = vmax.f32 %v3597_v43, 0.0 }
0x1749   :  { %v3620_v13 = vmax.f32 %v3599_v6, 0.0 }
0x174a   :  { %v3629_v38 = vpack.c.bf16 %v3619_v40, %v3617_v0 }
0x174b   :  { %v3630_v23 = vpack.c.bf16 %v3620_v13, %v3618_v8 }
0x174d   :  { %3832 = vmatprep.mubr.bf16.mxu0 %v3630_v23 }
0x174e   :  { %3833 = vmatmul.mubr.bf16.gmra.mrb[196].mxu0 %v3629_v38 }
0x17e2   :  { %v4638_v61 = vpop.f32.mrb[180].mxu0 }
0x17e3   :  { %v4639_v48 = vpop.f32.mrb[181].mxu0 }
0x17e4   :  { %v4640_v34 = vadd.f32 %v4639_v48, %v4638_v61  ;;  %v4641_v3 = vpop.f32.mrb[182].mxu0 }
0x17e5   :  { %v4642_v44 = vpop.f32.mrb[183].mxu0 }
0x17e6   :  { %v3803_v32 = vadd.f32 %v4640_v34, %v7581_v46  ;;  %v4643_v17 = vadd.f32 %v4642_v44, %v4641_v3 }
0x17e8   :  { %v3806_v5 = vadd.f32 %v4643_v17, %v7581_v46  ;;  %v7586_v7 = vadd.f32 %v3803_v32, %v7470_v63 }
0x17ea   :  { %v4644_v49 = vpop.f32.mrb[184].mxu0  ;;  %v3855_v47 = vsel %vm324_vm3, %v7586_v7, 0.0  ;;  %v7591_v51 = vadd.f32 %v3806_v5, %v7473_v9 }
0x17eb   :  { %v4645_v18 = vpop.f32.mrb[185].mxu0  ;;  %3856 = vadd.xlane.f32.xlu1 %v3855_v47 }
0x17ec   :  { %v4646_v55 = vadd.f32 %v4645_v18, %v4644_v49  ;;  %v4647_v36 = vpop.f32.mrb[186].mxu0  ;;  %v3858_v62 = vsel %vm324_vm3, %v7591_v51, 0.0 }
0x17ed   :  { %v4648_v35 = vpop.f32.mrb[187].mxu0  ;;  %3859 = vadd.xlane.f32.xlu0 %v3858_v62 }
0x17ee   :  { %v3811_v56 = vadd.f32 %v4646_v55, %v7581_v46  ;;  %v4649_v63 = vadd.f32 %v4648_v35, %v4647_v36 }
0x17f0   :  { %v3814_v29 = vadd.f32 %v4649_v63, %v7581_v46  ;;  %v7598_v52 = vadd.f32 %v3811_v56, %v7488_v31 }
0x17f2   :  { %v4650_v14 = vpop.f32.mrb[188].mxu0  ;;  %v3861_v9 = vsel %vm324_vm3, %v7598_v52, 0.0  ;;  %v3844_v54 = vadd.f32 %v3814_v29, %v7484_v53 }
0x17f3   :  { %v4651_v21 = vpop.f32.mrb[189].mxu0  ;;  %3862 = vadd.xlane.f32.xlu1 %v3861_v9 }
0x17f4   :  { %v4652_v20 = vadd.f32 %v4651_v21, %v4650_v14  ;;  %v4653_v41 = vpop.f32.mrb[190].mxu0  ;;  %v3864_v50 = vsel %vm324_vm3, %v3844_v54, 0.0 }
0x17f5   :  { %v4654_v11 = vpop.f32.mrb[191].mxu0  ;;  %3865 = vadd.xlane.f32.xlu0 %v3864_v50 }
0x17f6   :  { %v3819_v37 = vadd.f32 %v4652_v20, %v7581_v46  ;;  %v4655_v57 = vadd.f32 %v4654_v11, %v4653_v41 }
0x17f8   :  { %v3822_v31 = vadd.f32 %v4655_v57, %v7581_v46  ;;  %v3845_v42 = vadd.f32 %v3819_v37, %v7498_v10 }
0x17fa   :  { %v3867_v30 = vsel %vm324_vm3, %v3845_v42, 0.0  ;;  %v3846_v58 = vadd.f32 %v3822_v31, %v7501_v60 }
0x17fb   :  { %3868 = vadd.xlane.f32.xlu1 %v3867_v30 }
0x17fc   :  { %v3870_v53 = vsel %vm324_vm3, %v3846_v58, 0.0 }
0x17fd   :  { %3871 = vadd.xlane.f32.xlu0 %v3870_v53 }
0x1819   :  { %v4656_v33 = vpop.f32.mrb[192].mxu0 }
0x181a   :  { %v4657_v39 = vpop.f32.mrb[193].mxu0 }
0x181b   :  { %v4658_v22 = vadd.f32 %v4657_v39, %v4656_v33  ;;  %v4659_v45 = vpop.f32.mrb[194].mxu0 }
0x181c   :  { %v4660_v2 = vpop.f32.mrb[195].mxu0 }
0x181d   :  { %v3827_v26 = vadd.f32 %v4658_v22, %v7581_v46  ;;  %v4661_v28 = vadd.f32 %v4660_v2, %v4659_v45 }
0x181f   :  { %v3830_v16 = vadd.f32 %v4661_v28, %v7581_v46  ;;  %v3847_v10 = vadd.f32 %v3827_v26, %v7513_v27 }
0x1821   :  { %v4662_v15 = vpop.f32.mrb[196].mxu0  ;;  %v3873_v1 = vsel %vm324_vm3, %v3847_v10, 0.0  ;;  %v3848_v60 = vadd.f32 %v3830_v16, %v7516_v59 }
0x1822   :  { %v4663_v25 = vpop.f32.mrb[197].mxu0  ;;  %3874 = vadd.xlane.f32.xlu1 %v3873_v1  ;;  %v4017_v1 = vld [vmem:[%s7767_s30] sm:$0xff] }
0x1823   :  { %v4664_v24 = vadd.f32 %v4663_v25, %v4662_v15  ;;  %v4665_v43 = vpop.f32.mrb[198].mxu0  ;;  %v3876_v12 = vsel %vm324_vm3, %v3848_v60, 0.0  ;;  %5082 = vmatprep.mubr.msk.f32.mxu1 %vm324_vm3, %v4017_v1 }
0x1824   :  { %v4666_v6 = vpop.f32.mrb[199].mxu0  ;;  %3877 = vadd.xlane.f32.xlu0 %v3876_v12 }
0x1825   :  { %v3835_v0 = vadd.f32 %v4664_v24, %v7581_v46  ;;  %v4667_v40 = vadd.f32 %v4666_v6, %v4665_v43 }
0x1827   :  { %v3838_v8 = vadd.f32 %v4667_v40, %v7581_v46  ;;  %v3849_v27 = vadd.f32 %v3835_v0, %v7526_v4 }
0x1829   :  { %v3879_v13 = vsel %vm324_vm3, %v3849_v27, 0.0  ;;  %v3850_v38 = vadd.f32 %v3838_v8, %v7529_v19 }
0x182a   :  { %3880 = vadd.xlane.f32.xlu1 %v3879_v13 }
0x182b   :  { %v3882_v59 = vsel %vm324_vm3, %v3850_v38, 0.0 }
0x182c   :  { %3883 = vadd.xlane.f32.xlu0 %v3882_v59 }
0x1878   :  { %v3857_v23 = vpop.xlane.xlu1 %3856 }
0x1879   :  { %v3885_v61 = vmul.f32 0.0125, %v3857_v23  ;;  %v7682_v23 = vld [vmem:[%s7749_s15 + $0x1] ss:$0 sm:$0xff] }
0x187a   :  { %v3860_v48 = vpop.xlane.xlu0 %3859 }
0x187b   :  { %v7623_v34 = vsub.f32 %v7586_v7, %v3885_v61  ;;  %v3886_v3 = vmul.f32 0.0125, %v3860_v48 }
0x187d   :  { %v7626_v44 = vsub.f32 %v7591_v51, %v3886_v3  ;;  %v3905_v4 = vmul.f32 %v7623_v34, %v7623_v34 }
0x187f   :  { %v3915_v46 = vsel %vm324_vm3, %v3905_v4, 0.0  ;;  %v3906_v19 = vmul.f32 %v7626_v44, %v7626_v44 }
0x1880   :  { %3916 = vadd.xlane.f32.xlu1 %v3915_v46  ;;  %v3863_v32 = vpop.xlane.xlu1 %3862 }
0x1881   :  { %v3887_v17 = vmul.f32 0.0125, %v3863_v32  ;;  %v3918_v5 = vsel %vm324_vm3, %v3906_v19, 0.0 }
0x1882   :  { %3919 = vadd.xlane.f32.xlu0 %v3918_v5  ;;  %v3866_v7 = vpop.xlane.xlu0 %3865 }
0x1883   :  { %v7635_v49 = vsub.f32 %v7598_v52, %v3887_v17  ;;  %v3888_v47 = vmul.f32 0.0125, %v3866_v7  ;;  %v7690_v7 = vld [vmem:[%s7750_s16 + $0x1] ss:$0 sm:$0xff] }
0x1885   :  { %v7637_v51 = vsub.f32 %v3844_v54, %v3888_v47  ;;  %v3907_v18 = vmul.f32 %v7635_v49, %v7635_v49 }
0x1887   :  { %v3921_v55 = vsel %vm324_vm3, %v3907_v18, 0.0  ;;  %v3908_v36 = vmul.f32 %v7637_v51, %v7637_v51 }
0x1888   :  { %3922 = vadd.xlane.f32.xlu1 %v3921_v55  ;;  %v3869_v62 = vpop.xlane.xlu1 %3868 }
0x1889   :  { %v3889_v35 = vmul.f32 0.0125, %v3869_v62  ;;  %v3924_v56 = vsel %vm324_vm3, %v3908_v36, 0.0 }
0x188a   :  { %3925 = vadd.xlane.f32.xlu0 %v3924_v56  ;;  %v3872_v63 = vpop.xlane.xlu0 %3871 }
0x188b   :  { %v7645_v29 = vsub.f32 %v3845_v42, %v3889_v35  ;;  %v3890_v52 = vmul.f32 0.0125, %v3872_v63 }
0x188d   :  { %v7647_v14 = vsub.f32 %v3846_v58, %v3890_v52  ;;  %v3909_v9 = vmul.f32 %v7645_v29, %v7645_v29 }
0x188f   :  { %v3927_v54 = vsel %vm324_vm3, %v3909_v9, 0.0  ;;  %v3910_v21 = vmul.f32 %v7647_v14, %v7647_v14 }
0x1890   :  { %3928 = vadd.xlane.f32.xlu1 %v3927_v54 }
0x1891   :  { %v3930_v20 = vsel %vm324_vm3, %v3910_v21, 0.0 }
0x1892   :  { %3931 = vadd.xlane.f32.xlu0 %v3930_v20 }
0x18af   :  { %v3875_v41 = vpop.xlane.xlu1 %3874 }
0x18b0   :  { %v3891_v50 = vmul.f32 0.0125, %v3875_v41 }
0x18b1   :  { %v3878_v11 = vpop.xlane.xlu0 %3877 }
0x18b2   :  { %v7655_v37 = vsub.f32 %v3847_v10, %v3891_v50  ;;  %v3892_v57 = vmul.f32 0.0125, %v3878_v11 }
0x18b4   :  { %v7657_v31 = vsub.f32 %v3848_v60, %v3892_v57  ;;  %v3911_v42 = vmul.f32 %v7655_v37, %v7655_v37 }
0x18b6   :  { %v3933_v30 = vsel %vm324_vm3, %v3911_v42, 0.0  ;;  %v3912_v58 = vmul.f32 %v7657_v31, %v7657_v31 }
0x18b7   :  { %3934 = vadd.xlane.f32.xlu1 %v3933_v30  ;;  %v3881_v53 = vpop.xlane.xlu1 %3880 }
0x18b8   :  { %v3893_v33 = vmul.f32 0.0125, %v3881_v53  ;;  %v3936_v39 = vsel %vm324_vm3, %v3912_v58, 0.0 }
0x18b9   :  { %3937 = vadd.xlane.f32.xlu0 %v3936_v39  ;;  %v3884_v22 = vpop.xlane.xlu0 %3883 }
0x18ba   :  { %v7665_v45 = vsub.f32 %v3849_v27, %v3893_v33  ;;  %v3894_v2 = vmul.f32 0.0125, %v3884_v22 }
0x18bc   :  { %v7667_v26 = vsub.f32 %v3850_v38, %v3894_v2  ;;  %v3913_v28 = vmul.f32 %v7665_v45, %v7665_v45 }
0x18be   :  { %v3939_v16 = vsel %vm324_vm3, %v3913_v28, 0.0  ;;  %v3914_v10 = vmul.f32 %v7667_v26, %v7667_v26 }
0x18bf   :  { %3940 = vadd.xlane.f32.xlu1 %v3939_v16 }
0x18c0   :  { %v3942_v15 = vsel %vm324_vm3, %v3914_v10, 0.0 }
0x18c1   :  { %3943 = vadd.xlane.f32.xlu0 %v3942_v15 }
0x190d   :  { %v3917_v60 = vpop.xlane.xlu1 %3916 }
0x190e   :  { %v3945_v25 = vmul.f32 0.0125, %v3917_v60 }
0x190f   :  { %v3920_v24 = vpop.xlane.xlu0 %3919 }
0x1910   :  { %v3955_v43 = vadd.f32 1e-05, %v3945_v25  ;;  %v3946_v12 = vmul.f32 0.0125, %v3920_v24 }
0x1912   :  { %5487 = vrsqrt.f32 %v3955_v43  ;;  %v3956_v6 = vadd.f32 1e-05, %v3946_v12 }
0x1914   :  { %5489 = vrsqrt.f32 %v3956_v6 }
0x1915   :  { %v3923_v0 = vpop.xlane.xlu1 %3922 }
0x1916   :  { %v3947_v40 = vmul.f32 0.0125, %v3923_v0 }
0x1917   :  { %v3926_v8 = vpop.xlane.xlu0 %3925 }
0x1918   :  { %v3957_v27 = vadd.f32 1e-05, %v3947_v40  ;;  %v3948_v13 = vmul.f32 0.0125, %v3926_v8 }
0x191a   :  { %5491 = vrsqrt.f32 %v3957_v27  ;;  %v3958_v38 = vadd.f32 1e-05, %v3948_v13 }
0x191c   :  { %v5488_v59 = vpop.eup %5487  ;;  %5493 = vrsqrt.f32 %v3958_v38 }
0x191d   :  { %v3929_v61 = vpop.xlane.xlu1 %3928  ;;  %v3975_v48 = vmul.f32 %v5488_v59, %v7623_v34  ;;  %v4100_v59 = vld [vmem:[#allocation6] sm:$0xff] }
0x191e   :  { %v5490_v3 = vpop.eup %5489  ;;  %v3949_v4 = vmul.f32 0.0125, %v3929_v61  ;;  %v4101_v61 = vld [vmem:[#allocation6 + $0x8] sm:$0xff] }
0x191f   :  { %v3932_v46 = vpop.xlane.xlu0 %3931  ;;  %v3976_v19 = vmul.f32 %v5490_v3, %v7626_v44  ;;  %v3991_v32 = vmul.f32 %v7682_v23, %v3975_v48 }
0x1920   :  { %v3959_v17 = vadd.f32 1e-05, %v3949_v4  ;;  %v3950_v5 = vmul.f32 0.0125, %v3932_v46  ;;  %v5128_v46 = vpack.c.bf16 %v4101_v61, %v4100_v59 }
0x1921   :  { %v3992_v47 = vmul.f32 %v7682_v23, %v3976_v19  ;;  %v4007_v34 = vadd.f32 %v7690_v7, %v3991_v32  ;;  %v4102_v19 = vld [vmem:[#allocation6 + $0x10] sm:$0xff]  ;;  %v4103_v32 = vld [vmem:[#allocation6 + $0x18] sm:$0xff] }
0x1922   :  { %5495 = vrsqrt.f32 %v3959_v17  ;;  %v3960_v18 = vadd.f32 1e-05, %v3950_v5  ;;  %v4104_v17 = vld [vmem:[#allocation6 + $0x20] sm:$0xff] }
0x1923   :  { %v4008_v55 = vadd.f32 %v7690_v7, %v3992_v47  ;;  %v4107_v47 = vld [vmem:[#allocation6 + $0x38] sm:$0xff] }
0x1924   :  { %v5492_v36 = vpop.eup %5491  ;;  %5497 = vrsqrt.f32 %v3960_v18 }
0x1925   :  { %v5108_v44 = vpack.c.bf16 %v4008_v55, %v4007_v34  ;;  %v3977_v62 = vmul.f32 %v5492_v36, %v7635_v49  ;;  %v4108_v34 = vld [vmem:[#allocation6 + $0x40] sm:$0xff]  ;;  %v4109_v55 = vld [vmem:[#allocation6 + $0x48] sm:$0xff] }
0x1926   :  { %v5494_v35 = vpop.eup %5493  ;;  %v5144_v36 = vpack.c.bf16 %v4109_v55, %v4108_v34 }
0x1927   :  { %5109 = vmatprep.subr.bf16.mxu1 %v5108_v44  ;;  %v3978_v56 = vmul.f32 %v5494_v35, %v7637_v51  ;;  %v3993_v63 = vmul.f32 %v7682_v23, %v3977_v62  ;;  %v4453_v35 = vld [vmem:[%s7752_s18] ss:$0 sm:$0xff] }
0x1928   :  { %5111 = vmatpush3.bf16.msra.mxu1 %v5108_v44 }
0x1929   :  { %v3994_v52 = vmul.f32 %v7682_v23, %v3978_v56  ;;  %v4009_v9 = vadd.f32 %v7690_v7, %v3993_v63 }
0x192b   :  { %v4010_v54 = vadd.f32 %v7690_v7, %v3994_v52 }
0x192c   :  { %v5496_v21 = vpop.eup %5495 }
0x192d   :  { %v5112_v20 = vpack.c.bf16 %v4010_v54, %v4009_v9  ;;  %v3979_v41 = vmul.f32 %v5496_v21, %v7645_v29 }
0x192e   :  { %v5498_v50 = vpop.eup %5497 }
0x192f   :  { %5113 = vmatprep.subr.bf16.mxu1 %v5112_v20  ;;  %v3980_v49 = vmul.f32 %v5498_v50, %v7647_v14  ;;  %v3995_v11 = vmul.f32 %v7682_v23, %v3979_v41 }
0x1930   :  { %5115 = vmatpush3.bf16.msra.mxu1 %v5112_v20 }
0x1931   :  { %v3996_v51 = vmul.f32 %v7682_v23, %v3980_v49  ;;  %v4011_v57 = vadd.f32 %v7690_v7, %v3995_v11 }
0x1933   :  { %v4012_v42 = vadd.f32 %v7690_v7, %v3996_v51 }
0x1935   :  { %v5116_v30 = vpack.c.bf16 %v4012_v42, %v4011_v57 }
0x1937   :  { %5117 = vmatprep.subr.bf16.mxu1 %v5116_v30 }
0x1938   :  { %5119 = vmatpush3.bf16.msra.mxu1 %v5116_v30 }
0x1944   :  { %v3935_v58 = vpop.xlane.xlu1 %3934 }
0x1945   :  { %v3951_v53 = vmul.f32 0.0125, %v3935_v58 }
0x1946   :  { %v3938_v33 = vpop.xlane.xlu0 %3937 }
0x1947   :  { %v3961_v29 = vadd.f32 1e-05, %v3951_v53  ;;  %v3952_v39 = vmul.f32 0.0125, %v3938_v33 }
0x1949   :  { %5499 = vrsqrt.f32 %v3961_v29  ;;  %v3962_v22 = vadd.f32 1e-05, %v3952_v39 }
0x194b   :  { %5501 = vrsqrt.f32 %v3962_v22 }
0x194c   :  { %v3941_v14 = vpop.xlane.xlu1 %3940 }
0x194d   :  { %v3953_v2 = vmul.f32 0.0125, %v3941_v14 }
0x194e   :  { %v3944_v28 = vpop.xlane.xlu0 %3943 }
0x194f   :  { %v3963_v16 = vadd.f32 1e-05, %v3953_v2  ;;  %v3954_v10 = vmul.f32 0.0125, %v3944_v28 }
0x1951   :  { %5503 = vrsqrt.f32 %v3963_v16  ;;  %v3964_v15 = vadd.f32 1e-05, %v3954_v10 }
0x1953   :  { %v5500_v1 = vpop.eup %5499  ;;  %5505 = vrsqrt.f32 %v3964_v15 }
0x1954   :  { %v3981_v60 = vmul.f32 %v5500_v1, %v7655_v37 }
0x1955   :  { %v5502_v25 = vpop.eup %5501 }
0x1956   :  { %v3982_v24 = vmul.f32 %v5502_v25, %v7657_v31  ;;  %v3997_v43 = vmul.f32 %v7682_v23, %v3981_v60 }
0x1958   :  { %v3998_v12 = vmul.f32 %v7682_v23, %v3982_v24  ;;  %v4013_v6 = vadd.f32 %v7690_v7, %v3997_v43 }
0x195a   :  { %v4014_v0 = vadd.f32 %v7690_v7, %v3998_v12 }
0x195b   :  { %v5504_v40 = vpop.eup %5503 }
0x195c   :  { %v5120_v8 = vpack.c.bf16 %v4014_v0, %v4013_v6  ;;  %v3983_v27 = vmul.f32 %v5504_v40, %v7665_v45  ;;  %v4018_v45 = vld [vmem:[%s7767_s30 + $0x8] sm:$0x3] }
0x195d   :  { %v5506_v13 = vpop.eup %5505 }
0x195e   :  { %5121 = vmatprep.subr.bf16.mxu1 %v5120_v8  ;;  %v3984_v38 = vmul.f32 %v5506_v13, %v7667_v26  ;;  %v3999_v37 = vmul.f32 %v7682_v23, %v3983_v27  ;;  %v5132_v26 = vpack.c.bf16 %v4103_v32, %v4102_v19 }
0x195f   :  { %5123 = vmatpush3.bf16.msra.mxu1 %v5120_v8 }
0x1960   :  { %v4000_v31 = vmul.f32 %v7682_v23, %v3984_v38  ;;  %v4015_v48 = vadd.f32 %v7690_v7, %v3999_v37  ;;  %v4105_v23 = vld [vmem:[#allocation6 + $0x28] sm:$0xff] }
0x1961   :  { %v5136_v5 = vpack.c.bf16 %v4105_v23, %v4104_v17 }
0x1962   :  { %v4016_v3 = vadd.f32 %v7690_v7, %v4000_v31  ;;  %v4106_v7 = vld [vmem:[#allocation6 + $0x30] sm:$0xff] }
0x1963   :  { %v5140_v18 = vpack.c.bf16 %v4107_v47, %v4106_v7 }
0x1964   :  { %v5124_v4 = vpack.c.bf16 %v4016_v3, %v4015_v48 }
0x1966   :  { %5125 = vmatprep.subr.bf16.mxu1 %v5124_v4 }
0x1967   :  { %5127 = vmatpush3.bf16.msra.mxu1 %v5124_v4 }
0x1968   :  { %5129 = vmatprep.subr.bf16.mxu1 %v5128_v46 }
0x196a   :  { %5083 = vmatmul.mubr.msk.f32.vlgmr.msra.gmra.mrb[180].mxu1 %vm324_vm3, %v4018_v45 }
0x196b   :  { %5131 = vmatpush3.bf16.msra.mxu1 %v5128_v46 }
0x196c   :  { %5133 = vmatprep.subr.bf16.mxu1 %v5132_v26 }
0x196f   :  { %5135 = vmatpush3.bf16.msra.mxu1 %v5132_v26 }
0x1970   :  { %5137 = vmatprep.subr.bf16.mxu1 %v5136_v5 }
0x1973   :  { %5139 = vmatpush3.bf16.msra.mxu1 %v5136_v5 }
0x1974   :  { %5141 = vmatprep.subr.bf16.mxu1 %v5140_v18 }
0x1977   :  { %5143 = vmatpush3.bf16.msra.mxu1 %v5140_v18 }
0x1978   :  { %5145 = vmatprep.subr.bf16.mxu1 %v5144_v36 }
0x197b   :  { %5147 = vmatpush3.bf16.msra.mxu1 %v5144_v36 }
0x1a3d   :  { %v5084_v44 = vpop.f32.mrb[180].mxu1 }
0x1a3e   :  { %v4091_v62 = vpop.f32.mrb[181].mxu1 }
0x1a3f   :  { %5105 = vmatprep.mubr.msk.f32.mxu1 %vm324_vm3, %v4091_v62 }
0x1a40   :  { %5106 = vmatmul.mubr.msk.f32.vlgmr.msra.gmra.mrb[182].mxu1 %vm324_vm3, %v5084_v44 }
0x1b13   :  { %v5107_v56 = vpop.f32.mrb[182].mxu1 }
0x1b14   :  { %v4195_v63 = vadd.f32 %v5107_v56, %v4453_v35  ;;  %v4189_v52 = vpop.f32.mrb[183].mxu1 }
0x1b15   :  { %v4190_v9 = vadd.f32 %v4453_v35, %v4189_v52 }
0x1b16   :  { %4199 = vst [vmem:[%s7768_s11 + $0x8] sm:$0x3] %v4195_v63 }
0x1b17   :  { %4198 = vst [vmem:[%s7768_s11] sm:$0xff] %v4190_v9 }
0x1b18   :  { %4204 = vsyncpa [#allocation3], 1 }
0x1b19   :  { %4205 = vsyncpa [#allocation5], 1 }

</bundles_post_ra>
